<compile_context>
chip_gen: v5e
topology: v5e:2x2
jax: 0.10.0
libtpu: 0.0.40
codegen_flags: <defaults>
</compile_context>

<pallas_src>
import functools

import jax
import jax.numpy as jnp
from jax.experimental import pallas as pl
from jax.experimental.pallas import tpu as pltpu

EPS = 1e-5                        # PyTorch LayerNorm default eps
MATMUL_DTYPE = jnp.float32        # keep f32 on v5e; matmuls here are tiny-K anyway
ACT_DTYPE = jnp.float32           # HBM storage for inter-layer activations;
                                  # set jnp.bfloat16 on v6e/v7x (f32 accumulation kept in-kernel)
MAX_TILE_PIXELS = 4096            # lane-axis pixel tile (power-of-two multiple of 128)
MAX_TILE_PIXELS_HEAD = 1024       # cap for the fused head (bounds its (128, tile) intermediate)
VMEM_LIMIT_BYTES = 32 * 1024 * 1024


def _gelu_exact(x):
    # matches torch.nn.functional.gelu default (erf-based, not tanh approx)
    return 0.5 * x * (1.0 + jax.lax.erf(x / jnp.sqrt(2.0).astype(x.dtype)))


def _layernorm_cf(y, g, b):
    """LayerNorm over channels for channels-first (C, tile) data: sublane reduce."""
    mu = jnp.mean(y, axis=0, keepdims=True)
    var = jnp.mean((y - mu) ** 2, axis=0, keepdims=True)
    y = (y - mu) * jax.lax.rsqrt(var + EPS)
    return y * g + b


def _ceil_to(x, m):
    return -(-x // m) * m


def _pixel_tiling(n, max_tile=MAX_TILE_PIXELS):
    """Pick a lane-axis pixel tile (power-of-two multiple of 128) and padded N.

    Ensures >=2 grid steps whenever there is enough data (so both v7x
    TensorCores get work via dimension_semantics=("parallel",)).
    """
    np128 = _ceil_to(max(n, 1), 128)
    limit = min(max_tile, np128 if np128 < 256 else np128 // 2)
    tile = 128
    while tile * 2 <= limit:
        tile *= 2
    n_pad = _ceil_to(np128, tile)
    return tile, n_pad


def _pad_cols(x, n_pad):
    n = x.shape[-1]
    if n_pad != n:
        x = jnp.pad(x, ((0, 0), (0, n_pad - n)))
    return x


def _cparams():
    return pltpu.CompilerParams(
        dimension_semantics=("parallel",),
        vmem_limit_bytes=VMEM_LIMIT_BYTES,
    )


# ---------------------------------------------------------------------------
# Kernel 1: fc0 = Linear(3, width) + LayerNorm, channels-first.
# cin=3 contraction is done with unrolled VPU broadcast-FMAs (f32 accumulation).
# ---------------------------------------------------------------------------
def _make_fc0_kernel(cin, use_fma):
    def kernel(x_ref, w_ref, b_ref, g_ref, beta_ref, o_ref):
        x = x_ref[...].astype(jnp.float32)          # (cin, tile)
        w = w_ref[...].astype(jnp.float32)          # (width, cin)
        if use_fma:
            y = w[:, 0:1] * x[0:1, :]
            for c in range(1, cin):
                y = y + w[:, c:c + 1] * x[c:c + 1, :]
        else:
            y = jnp.dot(w.astype(MATMUL_DTYPE), x.astype(MATMUL_DTYPE),
                        preferred_element_type=jnp.float32)
        y = y + b_ref[...].astype(jnp.float32)
        y = _layernorm_cf(y, g_ref[...].astype(jnp.float32),
                          beta_ref[...].astype(jnp.float32))
        o_ref[...] = y.astype(o_ref.dtype)

    return kernel


def fc0_pallas(x_cf, w, b, gamma, beta, tile):
    cin, n_pad = x_cf.shape
    cout = w.shape[0]
    kernel = _make_fc0_kernel(cin, use_fma=(cin < 8))
    return pl.pallas_call(
        kernel,
        out_shape=jax.ShapeDtypeStruct((cout, n_pad), ACT_DTYPE),
        grid=(n_pad // tile,),
        in_specs=[
            pl.BlockSpec((cin, tile), lambda i: (0, i)),
            pl.BlockSpec((cout, cin), lambda i: (0, 0)),
            pl.BlockSpec((cout, 1), lambda i: (0, 0)),
            pl.BlockSpec((cout, 1), lambda i: (0, 0)),
            pl.BlockSpec((cout, 1), lambda i: (0, 0)),
        ],
        out_specs=pl.BlockSpec((cout, tile), lambda i: (0, i)),
        compiler_params=_cparams(),
    )(x_cf, w, b, gamma, beta)


# ---------------------------------------------------------------------------
# Kernel 2: fused FNO-block combine (channels-first):
#   x2 = W @ h + b        (the 1x1 Conv2d; MXU matmul with N = tile pixels)
#   y  = LayerNorm(x1 + x2) [+ GELU]
# ---------------------------------------------------------------------------
def _make_combine_kernel(do_gelu):
    def kernel(x1_ref, h_ref, w_ref, b_ref, g_ref, beta_ref, o_ref):
        x2 = jnp.dot(w_ref[...].astype(MATMUL_DTYPE),
                     h_ref[...].astype(MATMUL_DTYPE),
                     preferred_element_type=jnp.float32)        # (width, tile)
        y = x1_ref[...].astype(jnp.float32) + x2 + b_ref[...].astype(jnp.float32)
        y = _layernorm_cf(y, g_ref[...].astype(jnp.float32),
                          beta_ref[...].astype(jnp.float32))
        if do_gelu:
            y = _gelu_exact(y)
        o_ref[...] = y.astype(o_ref.dtype)

    return kernel


def combine_pallas(x1_cf, h_cf, w, b, gamma, beta, gelu, tile):
    c, n_pad = h_cf.shape
    return pl.pallas_call(
        _make_combine_kernel(gelu),
        out_shape=jax.ShapeDtypeStruct((c, n_pad), ACT_DTYPE),
        grid=(n_pad // tile,),
        in_specs=[
            pl.BlockSpec((c, tile), lambda i: (0, i)),   # x1 (spectral branch)
            pl.BlockSpec((c, tile), lambda i: (0, i)),   # h  (previous activation)
            pl.BlockSpec((c, c), lambda i: (0, 0)),      # 1x1 conv weight (out, in)
            pl.BlockSpec((c, 1), lambda i: (0, 0)),
            pl.BlockSpec((c, 1), lambda i: (0, 0)),
            pl.BlockSpec((c, 1), lambda i: (0, 0)),
        ],
        out_specs=pl.BlockSpec((c, tile), lambda i: (0, i)),
        compiler_params=_cparams(),
    )(x1_cf, h_cf, w, b, gamma, beta)


# ---------------------------------------------------------------------------
# Kernel 3: fused projection head  fc1 -> GELU -> fc2 -> GELU -> fc3.
# Intermediates (128, tile)/(64, tile) stay in VMEM; only the lane-dense
# (1, tile) result hits HBM.
# ---------------------------------------------------------------------------
def _head_kernel(h_ref, w1_ref, b1_ref, w2_ref, b2_ref, w3_ref, b3_ref, o_ref):
    y = jnp.dot(w1_ref[...].astype(MATMUL_DTYPE), h_ref[...].astype(MATMUL_DTYPE),
                preferred_element_type=jnp.float32) + b1_ref[...]
    y = _gelu_exact(y)
    y = jnp.dot(w2_ref[...].astype(MATMUL_DTYPE), y.astype(MATMUL_DTYPE),
                preferred_element_type=jnp.float32) + b2_ref[...]
    y = _gelu_exact(y)
    y = jnp.dot(w3_ref[...].astype(MATMUL_DTYPE), y.astype(MATMUL_DTYPE),
                preferred_element_type=jnp.float32) + b3_ref[...]
    o_ref[...] = y.astype(o_ref.dtype)


def head_pallas(h_cf, w1, b1, w2, b2, w3, b3, tile):
    c0, n_pad = h_cf.shape
    c1, c2, c3 = w1.shape[0], w2.shape[0], w3.shape[0]
    return pl.pallas_call(
        _head_kernel,
        out_shape=jax.ShapeDtypeStruct((c3, n_pad), jnp.float32),
        grid=(n_pad // tile,),
        in_specs=[
            pl.BlockSpec((c0, tile), lambda i: (0, i)),
            pl.BlockSpec((c1, c0), lambda i: (0, 0)),
            pl.BlockSpec((c1, 1), lambda i: (0, 0)),
            pl.BlockSpec((c2, c1), lambda i: (0, 0)),
            pl.BlockSpec((c2, 1), lambda i: (0, 0)),
            pl.BlockSpec((c3, c2), lambda i: (0, 0)),
            pl.BlockSpec((c3, 1), lambda i: (0, 0)),
        ],
        out_specs=pl.BlockSpec((c3, tile), lambda i: (0, i)),
        compiler_params=_cparams(),
    )(h_cf, w1, b1, w2, b2, w3, b3)


# ---------------------------------------------------------------------------
# Spectral convolution (channels-first).
# TODO(synk): FFT/IFFT have no Pallas TPU primitive; per the perf review, at these
# sizes the per-mode complex multiply is also left to XLA (the Pallas launch plus
# the mode-tensor transposes cost more than the math), fused around the FFTs.
# ---------------------------------------------------------------------------
def spectral_conv2d_cf(h_sp, w1, w2, modes1, modes2):
    # h_sp: (C, B, H, W) float32; w1/w2: (wr, wi) tuples, each (Cin, Cout, m1, m2) f32
    c, b, hh, ww = h_sp.shape
    wf = ww // 2 + 1
    x_ft = jnp.fft.rfft2(h_sp, axes=(-2, -1))                  # (C, B, H, Wf) complex64

    def cmul(x_c, wri):                                         # 'ibxy,ioxy->obxy'
        wr, wi = wri
        xr, xi = jnp.real(x_c), jnp.imag(x_c)
        out_r = (jnp.einsum('ibxy,ioxy->obxy', xr, wr)
                 - jnp.einsum('ibxy,ioxy->obxy', xi, wi))
        out_i = (jnp.einsum('ibxy,ioxy->obxy', xr, wi)
                 + jnp.einsum('ibxy,ioxy->obxy', xi, wr))
        return jax.lax.complex(out_r, out_i)

    top = cmul(x_ft[:, :, :modes1, :modes2], w1)                # (C, B, m1, m2)
    bot = cmul(x_ft[:, :, hh - modes1:, :modes2], w2)           # (C, B, m1, m2)
    mid = jnp.zeros((c, b, hh - 2 * modes1, modes2), jnp.complex64)
    out_ft = jnp.concatenate([top, mid, bot], axis=2)           # (C, B, H, m2)
    out_ft = jnp.pad(out_ft, ((0, 0), (0, 0), (0, 0), (0, wf - modes2)))
    return jnp.fft.irfft2(out_ft, s=(hh, ww), axes=(-2, -1)).astype(jnp.float32)


# ---------------------------------------------------------------------------
# FNO2d forward
# ---------------------------------------------------------------------------
def fno2d_forward(x, params, *, modes1, modes2, width, layers):
    bsz, hh, ww, cin0 = x.shape
    wf = ww // 2 + 1
    if 2 * modes1 > hh or modes2 > wf:
        raise ValueError("require modes1 <= H//2 and modes2 <= W//2+1 so the "
                         "top/bottom Fourier-mode blocks do not overlap")
    n = bsz * hh * ww
    tile, n_pad = _pixel_tiling(n)
    head_tile = min(MAX_TILE_PIXELS_HEAD, tile)

    # channels-first (C, N): pixels on the 128-lane axis (lane-dense kernels)
    x_cf = _pad_cols(jnp.transpose(x.reshape(n, cin0)), n_pad)       # (3, n_pad)

    # fc0: Linear(3, width) + LayerNorm, fused
    h = fc0_pallas(x_cf, params["fc0_w"], params["fc0_b"],
                   params["fc0_ln_g"], params["fc0_ln_b"], tile)      # (width, n_pad)

    for i in range(layers):
        h_valid = h if n_pad == n else h[:, :n]
        h_sp = h_valid.astype(jnp.float32).reshape(width, bsz, hh, ww)
        x1 = spectral_conv2d_cf(h_sp, params["spec_w1"][i], params["spec_w2"][i],
                                modes1, modes2)                       # (width,B,H,W)
        x1_cf = _pad_cols(x1.reshape(width, n).astype(ACT_DTYPE), n_pad)
        # fused: 1x1 conv (W @ h + b) + residual add + LayerNorm (+ GELU)
        h = combine_pallas(x1_cf, h, params["w_w"][i], params["w_b"][i],
                           params["ln_g"][i], params["ln_b"][i],
                           gelu=(i < layers - 1), tile=tile)

    # fused head: fc1 -> GELU -> fc2 -> GELU -> fc3, lane-dense (1, n_pad) output
    out = head_pallas(h, params["fc1_w"], params["fc1_b"],
                      params["fc2_w"], params["fc2_b"],
                      params["fc3_w"], params["fc3_b"], tile=head_tile)
    return out[0, :n].reshape(bsz, hh, ww)


# ---------------------------------------------------------------------------
# Deterministic parameter construction (channels-first (out, in) weights,
# per-channel vectors pre-reshaped to (c, 1); shapes follow FNO2d.__init__).
# ---------------------------------------------------------------------------
def init_params(key, *, modes1, modes2, width, layers):
    def uniform(k, shape, lo=-0.1, hi=0.1):
        return jax.random.uniform(k, shape, jnp.float32, lo, hi)

    keys = iter(jax.random.split(key, 16 + 8 * layers))
    scale = 1.0 / (width * width)
    params = {
        "fc0_w": uniform(next(keys), (width, 3)),
        "fc0_b": uniform(next(keys), (width, 1)),
        "fc0_ln_g": jnp.ones((width, 1), jnp.float32),
        "fc0_ln_b": jnp.zeros((width, 1), jnp.float32),
        "spec_w1": [], "spec_w2": [],
        "w_w": [], "w_b": [], "ln_g": [], "ln_b": [],
        "fc1_w": uniform(next(keys), (128, width)),
        "fc1_b": uniform(next(keys), (128, 1)),
        "fc2_w": uniform(next(keys), (64, 128)),
        "fc2_b": uniform(next(keys), (64, 1)),
        "fc3_w": uniform(next(keys), (1, 64)),
        "fc3_b": uniform(next(keys), (1, 1)),
    }
    for _ in range(layers):
        # complex spectral weights stored as (real, imag) pairs of (Cin, Cout, m1, m2)
        def rand_cplx():
            wr = scale * jax.random.uniform(next(keys), (width, width, modes1, modes2),
                                            jnp.float32)
            wi = scale * jax.random.uniform(next(keys), (width, width, modes1, modes2),
                                            jnp.float32)
            return (wr, wi)
        params["spec_w1"].append(rand_cplx())
        params["spec_w2"].append(rand_cplx())
        params["w_w"].append(uniform(next(keys), (width, width)))   # Conv2d 1x1 (out,in)
        params["w_b"].append(uniform(next(keys), (width, 1)))
        params["ln_g"].append(jnp.ones((width, 1), jnp.float32))
        params["ln_b"].append(jnp.zeros((width, 1), jnp.float32))
    return params


if __name__ == "__main__":
    B, H, W = 2, 16, 16
    MODES1, MODES2, WIDTH, LAYERS = 4, 4, 8, 4

    key = jax.random.PRNGKey(0)
    k_x, k_p = jax.random.split(key)
    x = jax.random.normal(k_x, (B, H, W, 3), jnp.float32)
    params = init_params(k_p, modes1=MODES1, modes2=MODES2, width=WIDTH, layers=LAYERS)

    fwd = jax.jit(
        functools.partial(
            fno2d_forward, modes1=MODES1, modes2=MODES2, width=WIDTH, layers=LAYERS
        )
    )
    out = fwd(x, params)
    jax.block_until_ready(out)
    assert out.shape == (B, H, W), out.shape
    assert bool(jnp.all(jnp.isfinite(out))), "non-finite output"
    print("KERNEL_OK")
</pallas_src>

<mosaic_0001>
module attributes {stable_mosaic.version = 11 : i64} {
  func.func @kernel(%arg0: i32, %arg1: memref<3x256xf32, #tpu.memory_space<vmem>>, %arg2: memref<8x3xf32, #tpu.memory_space<vmem>>, %arg3: memref<8x1xf32, #tpu.memory_space<vmem>>, %arg4: memref<8x1xf32, #tpu.memory_space<vmem>>, %arg5: memref<8x1xf32, #tpu.memory_space<vmem>>, %arg6: memref<8x256xf32, #tpu.memory_space<vmem>>) attributes {dimension_semantics = [#tpu.dimension_semantics<parallel>], iteration_bounds = array<i64: 2>, scalar_prefetch = 0 : i64, scratch_operands = 0 : i64, tpu.core_type = #tpu.core_type<tc>, window_params = [{transform_indices = @transform_0, window_bounds = array<i64: 3, 256>}, {pipeline_mode = #tpu.pipeline_mode<synchronous>, transform_indices = @transform_1, window_bounds = array<i64: 8, 3>}, {pipeline_mode = #tpu.pipeline_mode<synchronous>, transform_indices = @transform_2, window_bounds = array<i64: 8, 1>}, {pipeline_mode = #tpu.pipeline_mode<synchronous>, transform_indices = @transform_3, window_bounds = array<i64: 8, 1>}, {pipeline_mode = #tpu.pipeline_mode<synchronous>, transform_indices = @transform_4, window_bounds = array<i64: 8, 1>}, {transform_indices = @transform_5, window_bounds = array<i64: 8, 256>}]} {
    %c0 = arith.constant 0 : index
    %c0_0 = arith.constant 0 : index
    %0 = vector.load %arg1[%c0, %c0_0] : memref<3x256xf32, #tpu.memory_space<vmem>>, vector<3x256xf32>
    %c0_1 = arith.constant 0 : index
    %c0_2 = arith.constant 0 : index
    %1 = vector.load %arg2[%c0_1, %c0_2] : memref<8x3xf32, #tpu.memory_space<vmem>>, vector<8x3xf32>
    %2 = vector.extract_strided_slice %1 {offsets = [0, 0], sizes = [8, 1], strides = [1, 1]} : vector<8x3xf32> to vector<8x1xf32>
    %3 = vector.extract_strided_slice %0 {offsets = [0, 0], sizes = [1, 256], strides = [1, 1]} : vector<3x256xf32> to vector<1x256xf32>
    %4 = vector.broadcast %2 : vector<8x1xf32> to vector<8x256xf32>
    %5 = vector.broadcast %3 : vector<1x256xf32> to vector<8x256xf32>
    %6 = arith.mulf %4, %5 : vector<8x256xf32>
    %7 = vector.extract_strided_slice %1 {offsets = [0, 1], sizes = [8, 1], strides = [1, 1]} : vector<8x3xf32> to vector<8x1xf32>
    %8 = vector.extract_strided_slice %0 {offsets = [1, 0], sizes = [1, 256], strides = [1, 1]} : vector<3x256xf32> to vector<1x256xf32>
    %9 = vector.broadcast %7 : vector<8x1xf32> to vector<8x256xf32>
    %10 = vector.broadcast %8 : vector<1x256xf32> to vector<8x256xf32>
    %11 = arith.mulf %9, %10 : vector<8x256xf32>
    %12 = arith.addf %6, %11 : vector<8x256xf32>
    %13 = vector.extract_strided_slice %1 {offsets = [0, 2], sizes = [8, 1], strides = [1, 1]} : vector<8x3xf32> to vector<8x1xf32>
    %14 = vector.extract_strided_slice %0 {offsets = [2, 0], sizes = [1, 256], strides = [1, 1]} : vector<3x256xf32> to vector<1x256xf32>
    %15 = vector.broadcast %13 : vector<8x1xf32> to vector<8x256xf32>
    %16 = vector.broadcast %14 : vector<1x256xf32> to vector<8x256xf32>
    %17 = arith.mulf %15, %16 : vector<8x256xf32>
    %18 = arith.addf %12, %17 : vector<8x256xf32>
    %c0_3 = arith.constant 0 : index
    %c0_4 = arith.constant 0 : index
    %19 = vector.load %arg3[%c0_3, %c0_4] : memref<8x1xf32, #tpu.memory_space<vmem>>, vector<8x1xf32>
    %20 = vector.broadcast %19 : vector<8x1xf32> to vector<8x256xf32>
    %21 = arith.addf %18, %20 : vector<8x256xf32>
    %c0_5 = arith.constant 0 : index
    %c0_6 = arith.constant 0 : index
    %22 = vector.load %arg4[%c0_5, %c0_6] : memref<8x1xf32, #tpu.memory_space<vmem>>, vector<8x1xf32>
    %c0_7 = arith.constant 0 : index
    %c0_8 = arith.constant 0 : index
    %23 = vector.load %arg5[%c0_7, %c0_8] : memref<8x1xf32, #tpu.memory_space<vmem>>, vector<8x1xf32>
    %cst = arith.constant dense<0.000000e+00> : vector<256xf32>
    %24 = vector.multi_reduction <add>, %21, %cst [0] : vector<8x256xf32> to vector<256xf32>
    %25 = vector.shape_cast %24 : vector<256xf32> to vector<1x256xf32>
    %cst_9 = arith.constant 8.000000e+00 : f32
    %26 = vector.broadcast %cst_9 : f32 to vector<1x256xf32>
    %27 = arith.divf %25, %26 : vector<1x256xf32>
    %28 = vector.broadcast %27 : vector<1x256xf32> to vector<8x256xf32>
    %29 = arith.subf %21, %28 : vector<8x256xf32>
    %30 = arith.mulf %29, %29 : vector<8x256xf32>
    %cst_10 = arith.constant dense<0.000000e+00> : vector<256xf32>
    %31 = vector.multi_reduction <add>, %30, %cst_10 [0] : vector<8x256xf32> to vector<256xf32>
    %32 = vector.shape_cast %31 : vector<256xf32> to vector<1x256xf32>
    %cst_11 = arith.constant 8.000000e+00 : f32
    %33 = vector.broadcast %cst_11 : f32 to vector<1x256xf32>
    %34 = arith.divf %32, %33 : vector<1x256xf32>
    %35 = vector.broadcast %27 : vector<1x256xf32> to vector<8x256xf32>
    %36 = arith.subf %21, %35 : vector<8x256xf32>
    %cst_12 = arith.constant 9.99999974E-6 : f32
    %37 = vector.broadcast %cst_12 : f32 to vector<1x256xf32>
    %38 = arith.addf %34, %37 : vector<1x256xf32>
    %39 = math.rsqrt %38 : vector<1x256xf32>
    %40 = vector.broadcast %39 : vector<1x256xf32> to vector<8x256xf32>
    %41 = arith.mulf %36, %40 : vector<8x256xf32>
    %42 = vector.broadcast %22 : vector<8x1xf32> to vector<8x256xf32>
    %43 = arith.mulf %41, %42 : vector<8x256xf32>
    %44 = vector.broadcast %23 : vector<8x1xf32> to vector<8x256xf32>
    %45 = arith.addf %43, %44 : vector<8x256xf32>
    %c0_13 = arith.constant 0 : index
    %c0_14 = arith.constant 0 : index
    %46 = vector.load %arg6[%c0_13, %c0_14] : memref<8x256xf32, #tpu.memory_space<vmem>>, vector<8x256xf32>
    tpu.vector_store %arg6[%c0_13, %c0_14], %45 {strides = array<i32>} : memref<8x256xf32, #tpu.memory_space<vmem>>, vector<8x256xf32>,
    return
  }
  func.func @transform_0(%arg0: i32) -> (i32, i32) {
    %c0_i32 = arith.constant 0 : i32
    %c0_i32_0 = arith.constant 0 : i32
    return %c0_i32, %arg0 : i32, i32
  }
  func.func @transform_1(%arg0: i32) -> (i32, i32) {
    %c0_i32 = arith.constant 0 : i32
    %c0_i32_0 = arith.constant 0 : i32
    %c0_i32_1 = arith.constant 0 : i32
    return %c0_i32, %c0_i32_0 : i32, i32
  }
  func.func @transform_2(%arg0: i32) -> (i32, i32) {
    %c0_i32 = arith.constant 0 : i32
    %c0_i32_0 = arith.constant 0 : i32
    %c0_i32_1 = arith.constant 0 : i32
    return %c0_i32, %c0_i32_0 : i32, i32
  }
  func.func @transform_3(%arg0: i32) -> (i32, i32) {
    %c0_i32 = arith.constant 0 : i32
    %c0_i32_0 = arith.constant 0 : i32
    %c0_i32_1 = arith.constant 0 : i32
    return %c0_i32, %c0_i32_0 : i32, i32
  }
  func.func @transform_4(%arg0: i32) -> (i32, i32) {
    %c0_i32 = arith.constant 0 : i32
    %c0_i32_0 = arith.constant 0 : i32
    %c0_i32_1 = arith.constant 0 : i32
    return %c0_i32, %c0_i32_0 : i32, i32
  }
  func.func @transform_5(%arg0: i32) -> (i32, i32) {
    %c0_i32 = arith.constant 0 : i32
    %c0_i32_0 = arith.constant 0 : i32
    return %c0_i32, %arg0 : i32, i32
  }
}

module attributes {stable_mosaic.version = 11 : i64} {
  func.func @kernel(%arg0: i32, %arg1: memref<8x256xf32, #tpu.memory_space<vmem>>, %arg2: memref<8x256xf32, #tpu.memory_space<vmem>>, %arg3: memref<8x8xf32, #tpu.memory_space<vmem>>, %arg4: memref<8x1xf32, #tpu.memory_space<vmem>>, %arg5: memref<8x1xf32, #tpu.memory_space<vmem>>, %arg6: memref<8x1xf32, #tpu.memory_space<vmem>>, %arg7: memref<8x256xf32, #tpu.memory_space<vmem>>) attributes {dimension_semantics = [#tpu.dimension_semantics<parallel>], iteration_bounds = array<i64: 2>, scalar_prefetch = 0 : i64, scratch_operands = 0 : i64, tpu.core_type = #tpu.core_type<tc>, window_params = [{transform_indices = @transform_0, window_bounds = array<i64: 8, 256>}, {transform_indices = @transform_1, window_bounds = array<i64: 8, 256>}, {pipeline_mode = #tpu.pipeline_mode<synchronous>, transform_indices = @transform_2, window_bounds = array<i64: 8, 8>}, {pipeline_mode = #tpu.pipeline_mode<synchronous>, transform_indices = @transform_3, window_bounds = array<i64: 8, 1>}, {pipeline_mode = #tpu.pipeline_mode<synchronous>, transform_indices = @transform_4, window_bounds = array<i64: 8, 1>}, {pipeline_mode = #tpu.pipeline_mode<synchronous>, transform_indices = @transform_5, window_bounds = array<i64: 8, 1>}, {transform_indices = @transform_6, window_bounds = array<i64: 8, 256>}]} {
    %c0 = arith.constant 0 : index
    %c0_0 = arith.constant 0 : index
    %0 = vector.load %arg3[%c0, %c0_0] : memref<8x8xf32, #tpu.memory_space<vmem>>, vector<8x8xf32>
    %c0_1 = arith.constant 0 : index
    %c0_2 = arith.constant 0 : index
    %1 = vector.load %arg2[%c0_1, %c0_2] : memref<8x256xf32, #tpu.memory_space<vmem>>, vector<8x256xf32>
    %cst = arith.constant dense<0.000000e+00> : vector<8x256xf32>
    %2 = tpu.matmul %0, %1, %cst {dimension_numbers = #tpu.dot_dimension_numbers<[1], [0], [0], [1], [0, 0, 1, 1], [], []>} : vector<8x8xf32>, vector<8x256xf32>, vector<8x256xf32> -> vector<8x256xf32>
    %c0_3 = arith.constant 0 : index
    %c0_4 = arith.constant 0 : index
    %3 = vector.load %arg1[%c0_3, %c0_4] : memref<8x256xf32, #tpu.memory_space<vmem>>, vector<8x256xf32>
    %4 = arith.addf %3, %2 : vector<8x256xf32>
    %c0_5 = arith.constant 0 : index
    %c0_6 = arith.constant 0 : index
    %5 = vector.load %arg4[%c0_5, %c0_6] : memref<8x1xf32, #tpu.memory_space<vmem>>, vector<8x1xf32>
    %6 = vector.broadcast %5 : vector<8x1xf32> to vector<8x256xf32>
    %7 = arith.addf %4, %6 : vector<8x256xf32>
    %c0_7 = arith.constant 0 : index
    %c0_8 = arith.constant 0 : index
    %8 = vector.load %arg5[%c0_7, %c0_8] : memref<8x1xf32, #tpu.memory_space<vmem>>, vector<8x1xf32>
    %c0_9 = arith.constant 0 : index
    %c0_10 = arith.constant 0 : index
    %9 = vector.load %arg6[%c0_9, %c0_10] : memref<8x1xf32, #tpu.memory_space<vmem>>, vector<8x1xf32>
    %cst_11 = arith.constant dense<0.000000e+00> : vector<256xf32>
    %10 = vector.multi_reduction <add>, %7, %cst_11 [0] : vector<8x256xf32> to vector<256xf32>
    %11 = vector.shape_cast %10 : vector<256xf32> to vector<1x256xf32>
    %cst_12 = arith.constant 8.000000e+00 : f32
    %12 = vector.broadcast %cst_12 : f32 to vector<1x256xf32>
    %13 = arith.divf %11, %12 : vector<1x256xf32>
    %14 = vector.broadcast %13 : vector<1x256xf32> to vector<8x256xf32>
    %15 = arith.subf %7, %14 : vector<8x256xf32>
    %16 = arith.mulf %15, %15 : vector<8x256xf32>
    %cst_13 = arith.constant dense<0.000000e+00> : vector<256xf32>
    %17 = vector.multi_reduction <add>, %16, %cst_13 [0] : vector<8x256xf32> to vector<256xf32>
    %18 = vector.shape_cast %17 : vector<256xf32> to vector<1x256xf32>
    %cst_14 = arith.constant 8.000000e+00 : f32
    %19 = vector.broadcast %cst_14 : f32 to vector<1x256xf32>
    %20 = arith.divf %18, %19 : vector<1x256xf32>
    %21 = vector.broadcast %13 : vector<1x256xf32> to vector<8x256xf32>
    %22 = arith.subf %7, %21 : vector<8x256xf32>
    %cst_15 = arith.constant 9.99999974E-6 : f32
    %23 = vector.broadcast %cst_15 : f32 to vector<1x256xf32>
    %24 = arith.addf %20, %23 : vector<1x256xf32>
    %25 = math.rsqrt %24 : vector<1x256xf32>
    %26 = vector.broadcast %25 : vector<1x256xf32> to vector<8x256xf32>
    %27 = arith.mulf %22, %26 : vector<8x256xf32>
    %28 = vector.broadcast %8 : vector<8x1xf32> to vector<8x256xf32>
    %29 = arith.mulf %27, %28 : vector<8x256xf32>
    %30 = vector.broadcast %9 : vector<8x1xf32> to vector<8x256xf32>
    %31 = arith.addf %29, %30 : vector<8x256xf32>
    %cst_16 = arith.constant 5.000000e-01 : f32
    %32 = vector.broadcast %cst_16 : f32 to vector<8x256xf32>
    %33 = arith.mulf %32, %31 : vector<8x256xf32>
    %cst_17 = arith.constant 2.000000e+00 : f32
    %34 = math.sqrt %cst_17 : f32
    %35 = vector.broadcast %34 : f32 to vector<8x256xf32>
    %36 = arith.divf %31, %35 : vector<8x256xf32>
    %37 = math.erf %36 : vector<8x256xf32>
    %cst_18 = arith.constant 1.000000e+00 : f32
    %38 = vector.broadcast %cst_18 : f32 to vector<8x256xf32>
    %39 = arith.addf %38, %37 : vector<8x256xf32>
    %40 = arith.mulf %33, %39 : vector<8x256xf32>
    %c0_19 = arith.constant 0 : index
    %c0_20 = arith.constant 0 : index
    %41 = vector.load %arg7[%c0_19, %c0_20] : memref<8x256xf32, #tpu.memory_space<vmem>>, vector<8x256xf32>
    tpu.vector_store %arg7[%c0_19, %c0_20], %40 {strides = array<i32>} : memref<8x256xf32, #tpu.memory_space<vmem>>, vector<8x256xf32>,
    return
  }
  func.func @transform_0(%arg0: i32) -> (i32, i32) {
    %c0_i32 = arith.constant 0 : i32
    %c0_i32_0 = arith.constant 0 : i32
    return %c0_i32, %arg0 : i32, i32
  }
  func.func @transform_1(%arg0: i32) -> (i32, i32) {
    %c0_i32 = arith.constant 0 : i32
    %c0_i32_0 = arith.constant 0 : i32
    return %c0_i32, %arg0 : i32, i32
  }
  func.func @transform_2(%arg0: i32) -> (i32, i32) {
    %c0_i32 = arith.constant 0 : i32
    %c0_i32_0 = arith.constant 0 : i32
    %c0_i32_1 = arith.constant 0 : i32
    return %c0_i32, %c0_i32_0 : i32, i32
  }
  func.func @transform_3(%arg0: i32) -> (i32, i32) {
    %c0_i32 = arith.constant 0 : i32
    %c0_i32_0 = arith.constant 0 : i32
    %c0_i32_1 = arith.constant 0 : i32
    return %c0_i32, %c0_i32_0 : i32, i32
  }
  func.func @transform_4(%arg0: i32) -> (i32, i32) {
    %c0_i32 = arith.constant 0 : i32
    %c0_i32_0 = arith.constant 0 : i32
    %c0_i32_1 = arith.constant 0 : i32
    return %c0_i32, %c0_i32_0 : i32, i32
  }
  func.func @transform_5(%arg0: i32) -> (i32, i32) {
    %c0_i32 = arith.constant 0 : i32
    %c0_i32_0 = arith.constant 0 : i32
    %c0_i32_1 = arith.constant 0 : i32
    return %c0_i32, %c0_i32_0 : i32, i32
  }
  func.func @transform_6(%arg0: i32) -> (i32, i32) {
    %c0_i32 = arith.constant 0 : i32
    %c0_i32_0 = arith.constant 0 : i32
    return %c0_i32, %arg0 : i32, i32
  }
}

module attributes {stable_mosaic.version = 11 : i64} {
  func.func @kernel(%arg0: i32, %arg1: memref<8x256xf32, #tpu.memory_space<vmem>>, %arg2: memref<8x256xf32, #tpu.memory_space<vmem>>, %arg3: memref<8x8xf32, #tpu.memory_space<vmem>>, %arg4: memref<8x1xf32, #tpu.memory_space<vmem>>, %arg5: memref<8x1xf32, #tpu.memory_space<vmem>>, %arg6: memref<8x1xf32, #tpu.memory_space<vmem>>, %arg7: memref<8x256xf32, #tpu.memory_space<vmem>>) attributes {dimension_semantics = [#tpu.dimension_semantics<parallel>], iteration_bounds = array<i64: 2>, scalar_prefetch = 0 : i64, scratch_operands = 0 : i64, tpu.core_type = #tpu.core_type<tc>, window_params = [{transform_indices = @transform_0, window_bounds = array<i64: 8, 256>}, {transform_indices = @transform_1, window_bounds = array<i64: 8, 256>}, {pipeline_mode = #tpu.pipeline_mode<synchronous>, transform_indices = @transform_2, window_bounds = array<i64: 8, 8>}, {pipeline_mode = #tpu.pipeline_mode<synchronous>, transform_indices = @transform_3, window_bounds = array<i64: 8, 1>}, {pipeline_mode = #tpu.pipeline_mode<synchronous>, transform_indices = @transform_4, window_bounds = array<i64: 8, 1>}, {pipeline_mode = #tpu.pipeline_mode<synchronous>, transform_indices = @transform_5, window_bounds = array<i64: 8, 1>}, {transform_indices = @transform_6, window_bounds = array<i64: 8, 256>}]} {
    %c0 = arith.constant 0 : index
    %c0_0 = arith.constant 0 : index
    %0 = vector.load %arg3[%c0, %c0_0] : memref<8x8xf32, #tpu.memory_space<vmem>>, vector<8x8xf32>
    %c0_1 = arith.constant 0 : index
    %c0_2 = arith.constant 0 : index
    %1 = vector.load %arg2[%c0_1, %c0_2] : memref<8x256xf32, #tpu.memory_space<vmem>>, vector<8x256xf32>
    %cst = arith.constant dense<0.000000e+00> : vector<8x256xf32>
    %2 = tpu.matmul %0, %1, %cst {dimension_numbers = #tpu.dot_dimension_numbers<[1], [0], [0], [1], [0, 0, 1, 1], [], []>} : vector<8x8xf32>, vector<8x256xf32>, vector<8x256xf32> -> vector<8x256xf32>
    %c0_3 = arith.constant 0 : index
    %c0_4 = arith.constant 0 : index
    %3 = vector.load %arg1[%c0_3, %c0_4] : memref<8x256xf32, #tpu.memory_space<vmem>>, vector<8x256xf32>
    %4 = arith.addf %3, %2 : vector<8x256xf32>
    %c0_5 = arith.constant 0 : index
    %c0_6 = arith.constant 0 : index
    %5 = vector.load %arg4[%c0_5, %c0_6] : memref<8x1xf32, #tpu.memory_space<vmem>>, vector<8x1xf32>
    %6 = vector.broadcast %5 : vector<8x1xf32> to vector<8x256xf32>
    %7 = arith.addf %4, %6 : vector<8x256xf32>
    %c0_7 = arith.constant 0 : index
    %c0_8 = arith.constant 0 : index
    %8 = vector.load %arg5[%c0_7, %c0_8] : memref<8x1xf32, #tpu.memory_space<vmem>>, vector<8x1xf32>
    %c0_9 = arith.constant 0 : index
    %c0_10 = arith.constant 0 : index
    %9 = vector.load %arg6[%c0_9, %c0_10] : memref<8x1xf32, #tpu.memory_space<vmem>>, vector<8x1xf32>
    %cst_11 = arith.constant dense<0.000000e+00> : vector<256xf32>
    %10 = vector.multi_reduction <add>, %7, %cst_11 [0] : vector<8x256xf32> to vector<256xf32>
    %11 = vector.shape_cast %10 : vector<256xf32> to vector<1x256xf32>
    %cst_12 = arith.constant 8.000000e+00 : f32
    %12 = vector.broadcast %cst_12 : f32 to vector<1x256xf32>
    %13 = arith.divf %11, %12 : vector<1x256xf32>
    %14 = vector.broadcast %13 : vector<1x256xf32> to vector<8x256xf32>
    %15 = arith.subf %7, %14 : vector<8x256xf32>
    %16 = arith.mulf %15, %15 : vector<8x256xf32>
    %cst_13 = arith.constant dense<0.000000e+00> : vector<256xf32>
    %17 = vector.multi_reduction <add>, %16, %cst_13 [0] : vector<8x256xf32> to vector<256xf32>
    %18 = vector.shape_cast %17 : vector<256xf32> to vector<1x256xf32>
    %cst_14 = arith.constant 8.000000e+00 : f32
    %19 = vector.broadcast %cst_14 : f32 to vector<1x256xf32>
    %20 = arith.divf %18, %19 : vector<1x256xf32>
    %21 = vector.broadcast %13 : vector<1x256xf32> to vector<8x256xf32>
    %22 = arith.subf %7, %21 : vector<8x256xf32>
    %cst_15 = arith.constant 9.99999974E-6 : f32
    %23 = vector.broadcast %cst_15 : f32 to vector<1x256xf32>
    %24 = arith.addf %20, %23 : vector<1x256xf32>
    %25 = math.rsqrt %24 : vector<1x256xf32>
    %26 = vector.broadcast %25 : vector<1x256xf32> to vector<8x256xf32>
    %27 = arith.mulf %22, %26 : vector<8x256xf32>
    %28 = vector.broadcast %8 : vector<8x1xf32> to vector<8x256xf32>
    %29 = arith.mulf %27, %28 : vector<8x256xf32>
    %30 = vector.broadcast %9 : vector<8x1xf32> to vector<8x256xf32>
    %31 = arith.addf %29, %30 : vector<8x256xf32>
    %c0_16 = arith.constant 0 : index
    %c0_17 = arith.constant 0 : index
    %32 = vector.load %arg7[%c0_16, %c0_17] : memref<8x256xf32, #tpu.memory_space<vmem>>, vector<8x256xf32>
    tpu.vector_store %arg7[%c0_16, %c0_17], %31 {strides = array<i32>} : memref<8x256xf32, #tpu.memory_space<vmem>>, vector<8x256xf32>,
    return
  }
  func.func @transform_0(%arg0: i32) -> (i32, i32) {
    %c0_i32 = arith.constant 0 : i32
    %c0_i32_0 = arith.constant 0 : i32
    return %c0_i32, %arg0 : i32, i32
  }
  func.func @transform_1(%arg0: i32) -> (i32, i32) {
    %c0_i32 = arith.constant 0 : i32
    %c0_i32_0 = arith.constant 0 : i32
    return %c0_i32, %arg0 : i32, i32
  }
  func.func @transform_2(%arg0: i32) -> (i32, i32) {
    %c0_i32 = arith.constant 0 : i32
    %c0_i32_0 = arith.constant 0 : i32
    %c0_i32_1 = arith.constant 0 : i32
    return %c0_i32, %c0_i32_0 : i32, i32
  }
  func.func @transform_3(%arg0: i32) -> (i32, i32) {
    %c0_i32 = arith.constant 0 : i32
    %c0_i32_0 = arith.constant 0 : i32
    %c0_i32_1 = arith.constant 0 : i32
    return %c0_i32, %c0_i32_0 : i32, i32
  }
  func.func @transform_4(%arg0: i32) -> (i32, i32) {
    %c0_i32 = arith.constant 0 : i32
    %c0_i32_0 = arith.constant 0 : i32
    %c0_i32_1 = arith.constant 0 : i32
    return %c0_i32, %c0_i32_0 : i32, i32
  }
  func.func @transform_5(%arg0: i32) -> (i32, i32) {
    %c0_i32 = arith.constant 0 : i32
    %c0_i32_0 = arith.constant 0 : i32
    %c0_i32_1 = arith.constant 0 : i32
    return %c0_i32, %c0_i32_0 : i32, i32
  }
  func.func @transform_6(%arg0: i32) -> (i32, i32) {
    %c0_i32 = arith.constant 0 : i32
    %c0_i32_0 = arith.constant 0 : i32
    return %c0_i32, %arg0 : i32, i32
  }
}

module attributes {stable_mosaic.version = 11 : i64} {
  func.func @_head_kernel(%arg0: i32, %arg1: memref<8x256xf32, #tpu.memory_space<vmem>>, %arg2: memref<128x8xf32, #tpu.memory_space<vmem>>, %arg3: memref<128x1xf32, #tpu.memory_space<vmem>>, %arg4: memref<64x128xf32, #tpu.memory_space<vmem>>, %arg5: memref<64x1xf32, #tpu.memory_space<vmem>>, %arg6: memref<1x64xf32, #tpu.memory_space<vmem>>, %arg7: memref<1x1xf32, #tpu.memory_space<vmem>>, %arg8: memref<1x256xf32, #tpu.memory_space<vmem>>) attributes {dimension_semantics = [#tpu.dimension_semantics<parallel>], iteration_bounds = array<i64: 2>, scalar_prefetch = 0 : i64, scratch_operands = 0 : i64, tpu.core_type = #tpu.core_type<tc>, window_params = [{transform_indices = @transform_0, window_bounds = array<i64: 8, 256>}, {pipeline_mode = #tpu.pipeline_mode<synchronous>, transform_indices = @transform_1, window_bounds = array<i64: 128, 8>}, {pipeline_mode = #tpu.pipeline_mode<synchronous>, transform_indices = @transform_2, window_bounds = array<i64: 128, 1>}, {pipeline_mode = #tpu.pipeline_mode<synchronous>, transform_indices = @transform_3, window_bounds = array<i64: 64, 128>}, {pipeline_mode = #tpu.pipeline_mode<synchronous>, transform_indices = @transform_4, window_bounds = array<i64: 64, 1>}, {pipeline_mode = #tpu.pipeline_mode<synchronous>, transform_indices = @transform_5, window_bounds = array<i64: 1, 64>}, {pipeline_mode = #tpu.pipeline_mode<synchronous>, transform_indices = @transform_6, window_bounds = array<i64: 1, 1>}, {transform_indices = @transform_7, window_bounds = array<i64: 1, 256>}]} {
    %c0 = arith.constant 0 : index
    %c0_0 = arith.constant 0 : index
    %0 = vector.load %arg2[%c0, %c0_0] : memref<128x8xf32, #tpu.memory_space<vmem>>, vector<128x8xf32>
    %c0_1 = arith.constant 0 : index
    %c0_2 = arith.constant 0 : index
    %1 = vector.load %arg1[%c0_1, %c0_2] : memref<8x256xf32, #tpu.memory_space<vmem>>, vector<8x256xf32>
    %cst = arith.constant dense<0.000000e+00> : vector<128x256xf32>
    %2 = tpu.matmul %0, %1, %cst {dimension_numbers = #tpu.dot_dimension_numbers<[1], [0], [0], [1], [0, 0, 1, 1], [], []>} : vector<128x8xf32>, vector<8x256xf32>, vector<128x256xf32> -> vector<128x256xf32>
    %c0_3 = arith.constant 0 : index
    %c0_4 = arith.constant 0 : index
    %3 = vector.load %arg3[%c0_3, %c0_4] : memref<128x1xf32, #tpu.memory_space<vmem>>, vector<128x1xf32>
    %4 = vector.broadcast %3 : vector<128x1xf32> to vector<128x256xf32>
    %5 = arith.addf %2, %4 : vector<128x256xf32>
    %cst_5 = arith.constant 5.000000e-01 : f32
    %6 = vector.broadcast %cst_5 : f32 to vector<128x256xf32>
    %7 = arith.mulf %6, %5 : vector<128x256xf32>
    %cst_6 = arith.constant 2.000000e+00 : f32
    %8 = math.sqrt %cst_6 : f32
    %9 = vector.broadcast %8 : f32 to vector<128x256xf32>
    %10 = arith.divf %5, %9 : vector<128x256xf32>
    %11 = math.erf %10 : vector<128x256xf32>
    %cst_7 = arith.constant 1.000000e+00 : f32
    %12 = vector.broadcast %cst_7 : f32 to vector<128x256xf32>
    %13 = arith.addf %12, %11 : vector<128x256xf32>
    %14 = arith.mulf %7, %13 : vector<128x256xf32>
    %c0_8 = arith.constant 0 : index
    %c0_9 = arith.constant 0 : index
    %15 = vector.load %arg4[%c0_8, %c0_9] : memref<64x128xf32, #tpu.memory_space<vmem>>, vector<64x128xf32>
    %cst_10 = arith.constant dense<0.000000e+00> : vector<64x256xf32>
    %16 = tpu.matmul %15, %14, %cst_10 {dimension_numbers = #tpu.dot_dimension_numbers<[1], [0], [0], [1], [0, 0, 1, 1], [], []>} : vector<64x128xf32>, vector<128x256xf32>, vector<64x256xf32> -> vector<64x256xf32>
    %c0_11 = arith.constant 0 : index
    %c0_12 = arith.constant 0 : index
    %17 = vector.load %arg5[%c0_11, %c0_12] : memref<64x1xf32, #tpu.memory_space<vmem>>, vector<64x1xf32>
    %18 = vector.broadcast %17 : vector<64x1xf32> to vector<64x256xf32>
    %19 = arith.addf %16, %18 : vector<64x256xf32>
    %cst_13 = arith.constant 5.000000e-01 : f32
    %20 = vector.broadcast %cst_13 : f32 to vector<64x256xf32>
    %21 = arith.mulf %20, %19 : vector<64x256xf32>
    %cst_14 = arith.constant 2.000000e+00 : f32
    %22 = math.sqrt %cst_14 : f32
    %23 = vector.broadcast %22 : f32 to vector<64x256xf32>
    %24 = arith.divf %19, %23 : vector<64x256xf32>
    %25 = math.erf %24 : vector<64x256xf32>
    %cst_15 = arith.constant 1.000000e+00 : f32
    %26 = vector.broadcast %cst_15 : f32 to vector<64x256xf32>
    %27 = arith.addf %26, %25 : vector<64x256xf32>
    %28 = arith.mulf %21, %27 : vector<64x256xf32>
    %c0_16 = arith.constant 0 : index
    %c0_17 = arith.constant 0 : index
    %29 = vector.load %arg6[%c0_16, %c0_17] : memref<1x64xf32, #tpu.memory_space<vmem>>, vector<1x64xf32>
    %cst_18 = arith.constant dense<0.000000e+00> : vector<1x256xf32>
    %30 = tpu.matmul %29, %28, %cst_18 {dimension_numbers = #tpu.dot_dimension_numbers<[1], [0], [0], [1], [0, 0, 1, 1], [], []>} : vector<1x64xf32>, vector<64x256xf32>, vector<1x256xf32> -> vector<1x256xf32>
    %c0_19 = arith.constant 0 : index
    %c0_20 = arith.constant 0 : index
    %31 = vector.load %arg7[%c0_19, %c0_20] : memref<1x1xf32, #tpu.memory_space<vmem>>, vector<1x1xf32>
    %32 = vector.broadcast %31 : vector<1x1xf32> to vector<1x256xf32>
    %33 = arith.addf %30, %32 : vector<1x256xf32>
    %c0_21 = arith.constant 0 : index
    %c0_22 = arith.constant 0 : index
    %34 = vector.load %arg8[%c0_21, %c0_22] : memref<1x256xf32, #tpu.memory_space<vmem>>, vector<1x256xf32>
    tpu.vector_store %arg8[%c0_21, %c0_22], %33 {strides = array<i32>} : memref<1x256xf32, #tpu.memory_space<vmem>>, vector<1x256xf32>,
    return
  }
  func.func @transform_0(%arg0: i32) -> (i32, i32) {
    %c0_i32 = arith.constant 0 : i32
    %c0_i32_0 = arith.constant 0 : i32
    return %c0_i32, %arg0 : i32, i32
  }
  func.func @transform_1(%arg0: i32) -> (i32, i32) {
    %c0_i32 = arith.constant 0 : i32
    %c0_i32_0 = arith.constant 0 : i32
    %c0_i32_1 = arith.constant 0 : i32
    return %c0_i32, %c0_i32_0 : i32, i32
  }
  func.func @transform_2(%arg0: i32) -> (i32, i32) {
    %c0_i32 = arith.constant 0 : i32
    %c0_i32_0 = arith.constant 0 : i32
    %c0_i32_1 = arith.constant 0 : i32
    return %c0_i32, %c0_i32_0 : i32, i32
  }
  func.func @transform_3(%arg0: i32) -> (i32, i32) {
    %c0_i32 = arith.constant 0 : i32
    %c0_i32_0 = arith.constant 0 : i32
    %c0_i32_1 = arith.constant 0 : i32
    return %c0_i32, %c0_i32_0 : i32, i32
  }
  func.func @transform_4(%arg0: i32) -> (i32, i32) {
    %c0_i32 = arith.constant 0 : i32
    %c0_i32_0 = arith.constant 0 : i32
    %c0_i32_1 = arith.constant 0 : i32
    return %c0_i32, %c0_i32_0 : i32, i32
  }
  func.func @transform_5(%arg0: i32) -> (i32, i32) {
    %c0_i32 = arith.constant 0 : i32
    %c0_i32_0 = arith.constant 0 : i32
    %c0_i32_1 = arith.constant 0 : i32
    return %c0_i32, %c0_i32_0 : i32, i32
  }
  func.func @transform_6(%arg0: i32) -> (i32, i32) {
    %c0_i32 = arith.constant 0 : i32
    %c0_i32_0 = arith.constant 0 : i32
    %c0_i32_1 = arith.constant 0 : i32
    return %c0_i32, %c0_i32_0 : i32, i32
  }
  func.func @transform_7(%arg0: i32) -> (i32, i32) {
    %c0_i32 = arith.constant 0 : i32
    %c0_i32_0 = arith.constant 0 : i32
    return %c0_i32, %arg0 : i32, i32
  }
}

</mosaic_0001>

<bundles_post_ra>
// kernel: fno2d_forward.6
= control target key start
LH: loop header
LB: loop body
LE: loop exit
PB: predicated region body
PF: predicated region fallthrough
CT: control target
= control target key end

     0   :  { %s494_s18 = smov 0   ;;  %s527_s0 = inlined_call_operand.vmem [shape: f32[3,512], index: 0, kind: input, shape index: {}]   ;;  %s528_s1 = inlined_call_operand.vmem [shape: f32[8,3], index: 1, kind: input, shape index: {}]   ;;  %s529_s2 = inlined_call_operand.vmem [shape: f32[8,1], index: 2, kind: input, shape index: {}]   ;;  %s530_s3 = inlined_call_operand.vmem [shape: f32[8,1], index: 3, kind: input, shape index: {}]   ;;  %s531_s4 = inlined_call_operand.vmem [shape: f32[8,1], index: 4, kind: input, shape index: {}]   ;;  %s532_s5 = inlined_call_operand.vmem [shape: f32[8,512], index: 5, kind: output, shape index: {}]  }
   0x1 LB: > { %s417_s19 = sadd.s32 4294967295, %s458_s18   ;;  %p421_p0 = scmp.ge.s32.totalorder %s458_s18, 1  ;;  %s458_s18 = sphi %s494_s18, %s15_s18  }
   0x2   : > { %p188_p1 = scmp.lt.s32.totalorder %s458_s18, 3 }
   0x4   : > { %p189_p2 = pnand %p421_p0, %p188_p1 }
   0x5   : > { %s422_s28 = sshll.u32 (!%p189_p2), %s417_s19, 1 }
   0x6   : > { %192 = sbr.rel (%p189_p2) target bundleno = 205 (0xcd), region = 40  ;;  %p217_p3 = scmp.lt.s32.totalorder (!%p189_p2), %s422_s28, 3 }
   0xb   : > { %v229_v0 = vld [vmem:[%s528_s1] sm:$0xff]  ;;  %v460_v1 = vmov 0   ;;  %v461_v2 = vmov 2   ;;  %v462_v6 = vmov 1   ;;  %s534_s28 = smov (!%p217_p3, %s422_s28), 3  ;;  %v463_v13 = vmov 8.0  }
   0xc   : > { %440 = vset.pattern.permute.xlu0 %v460_v1  ;;  %442 = vset.pattern.permute.xlu1 %v461_v2  ;;  %v280_v3 = vld [vmem:[%s530_s3] sm:$0xff]  ;;  %s423_s29 = sshll.u32 %s534_s28, 2  ;;  %446 = vrcp.f32 %v463_v13  ;;  %s425_s8 = sshll.u32 %s534_s28, 3 }
   0xd   : > { %232 = vperm.xlu0 %440, %v229_v0   ;;  %259 = vperm.xlu1 %442, %v229_v0   ;;  %v272_v4 = vld [vmem:[%s529_s2] sm:$0xff]  ;;  %s220_s7 = scalar_lea.vmem %s527_s0, %s423_s29  ;;  %s226_s11 = scalar_lea.vmem %s532_s5, %s425_s8 }
   0xe   : > { %444 = vset.pattern.permute.xlu2 %v460_v1  ;;  %v281_v5 = vld [vmem:[%s531_s4] sm:$0xff] }
   0xf   : > { %347 = vperm.xlu2 %444, %v280_v3   ;;  %v228_v7 = vld [vmem:[%s220_s7] sm:$0x77] }
  0x10   : > { %v236_v9 = vperm.slane %v228_v7, 0  ;;  %v237_v10 = vperm.slane %v228_v7, 4  ;;  %v248_v11 = vperm.slane %v228_v7, 1  ;;  %v249_v12 = vperm.slane %v228_v7, 5 }
  0x11   : > { %v262_v15 = vperm.slane %v228_v7, 2  ;;  %v263_v16 = vperm.slane %v228_v7, 6 }
  0x12   : > { %v240_v17 = vperm.slane %v236_v9, 0  ;;  %v241_v18 = vperm.slane %v237_v10, 0  ;;  %v252_v19 = vperm.slane %v248_v11, 1  ;;  %v253_v20 = vperm.slane %v249_v12, 1  ;;  %v447_v21 = vpop.eup %446 }
  0x13   : > { %v266_v22 = vperm.slane %v262_v15, 2  ;;  %v267_v23 = vperm.slane %v263_v16, 2  ;;  %v295_v29 = vmul.f32 8.0, %v447_v21  ;;  %vm299_vm0 = vweird.f32 %v447_v21 }
  0x15   : > { %441 = vset.pattern.permute.xlu0 %v462_v6  ;;  %443 = vset.pattern.permute.xlu1 %v460_v1  ;;  %v296_v37 = vsub.f32 1.0, %v295_v29 }
  0x16   : > { %245 = vperm.xlu0 %441, %v229_v0   ;;  %275 = vperm.xlu1 %443, %v272_v4  }
  0x17   : > { %354 = vperm.xlu2 %444, %v281_v5   ;;  %v297_v42 = vmul.f32 %v447_v21, %v296_v37 }
  0x19   : > { %v298_v47 = vadd.f32 %v447_v21, %v297_v42 }
  0x1b   : > { %v300_v52 = vsel %vm299_vm0, %v447_v21, %v298_v47 }
  0x1e   : > { %445 = vset.pattern.permute.xlu0 %v460_v1 }
  0x7f   : > { %v233_v8 = vpop.permute.xlu0 %232  ;;  %v260_v14 = vpop.permute.xlu1 %259 }
  0x80   : > { %v242_v25 = vmul.f32 %v240_v17, %v233_v8  ;;  %v243_v26 = vmul.f32 %v241_v18, %v233_v8  ;;  %v268_v30 = vmul.f32 %v266_v22, %v260_v14  ;;  %v269_v31 = vmul.f32 %v267_v23, %v260_v14 }
  0x88   : > { %v246_v24 = vpop.permute.xlu0 %245  ;;  %v276_v34 = vpop.permute.xlu1 %275 }
  0x89   : > { %v254_v27 = vmul.f32 %v252_v19, %v246_v24  ;;  %v255_v28 = vmul.f32 %v253_v20, %v246_v24  ;;  %v348_v19 = vpop.permute.xlu2 %347 }
  0x8b   : > { %v256_v32 = vadd.f32 %v254_v27, %v242_v25  ;;  %v257_v33 = vadd.f32 %v255_v28, %v243_v26 }
  0x8d   : > { %v270_v35 = vadd.f32 %v268_v30, %v256_v32  ;;  %v271_v36 = vadd.f32 %v269_v31, %v257_v33 }
  0x8f   : > { %v278_v38 = vadd.f32 %v276_v34, %v270_v35  ;;  %v279_v39 = vadd.f32 %v276_v34, %v271_v36 }
  0x91   : > { %v282_v40 = vrot.slane %v278_v38, 4  ;;  %v288_v41 = vrot.slane %v279_v39, 4  ;;  %v355_v32 = vpop.permute.xlu2 %354 }
  0x93   : > { %v283_v43 = vadd.f32 %v282_v40, %v278_v38  ;;  %v289_v44 = vadd.f32 %v288_v41, %v279_v39 }
  0x95   : > { %v284_v45 = vrot.slane %v283_v43, 2  ;;  %v290_v46 = vrot.slane %v289_v44, 2 }
  0x97   : > { %v285_v48 = vadd.f32 %v284_v45, %v283_v43  ;;  %v291_v49 = vadd.f32 %v290_v46, %v289_v44 }
  0x99   : > { %v286_v50 = vrot.slane %v285_v48, 1  ;;  %v292_v51 = vrot.slane %v291_v49, 1 }
  0x9b   : > { %v287_v53 = vadd.f32 %v286_v50, %v285_v48  ;;  %v293_v54 = vadd.f32 %v292_v51, %v291_v49 }
  0x9d   : > { %v301_v55 = vmul.f32 %v300_v52, %v287_v53  ;;  %v302_v56 = vmul.f32 %v300_v52, %v293_v54 }
  0x9f   : > { %v303_v57 = vsub.f32 %v278_v38, %v301_v55  ;;  %v304_v58 = vsub.f32 %v279_v39, %v302_v56 }
  0xa1   : > { %v305_v59 = vmul.f32 %v303_v57, %v303_v57  ;;  %v306_v60 = vmul.f32 %v304_v58, %v304_v58 }
  0xa3   : > { %v307_v61 = vrot.slane %v305_v59, 4  ;;  %v313_v62 = vrot.slane %v306_v60, 4 }
  0xa5   : > { %v308_v63 = vadd.f32 %v307_v61, %v305_v59  ;;  %v314_v0 = vadd.f32 %v313_v62, %v306_v60 }
  0xa7   : > { %v309_v1 = vrot.slane %v308_v63, 2  ;;  %v315_v2 = vrot.slane %v314_v0, 2 }
  0xa9   : > { %v310_v3 = vadd.f32 %v309_v1, %v308_v63  ;;  %v316_v4 = vadd.f32 %v315_v2, %v314_v0 }
  0xab   : > { %v311_v5 = vrot.slane %v310_v3, 1  ;;  %v317_v6 = vrot.slane %v316_v4, 1 }
  0xad   : > { %v312_v7 = vadd.f32 %v311_v5, %v310_v3  ;;  %v318_v8 = vadd.f32 %v317_v6, %v316_v4 }
  0xaf   : > { %v319_v9 = vmul.f32 %v312_v7, %v300_v52  ;;  %v320_v10 = vmul.f32 %v318_v8, %v300_v52 }
  0xb1   : > { %v321_v11 = vadd.f32 1e-05, %v319_v9  ;;  %v322_v12 = vadd.f32 1e-05, %v320_v10 }
  0xb3   : > { %448 = vrsqrt.f32 %v321_v11  ;;  %vm329_vm3 = vweird.f32 %v321_v11  ;;  %vm339_vm5 = vweird.f32 %v322_v12 }
  0xb4   : > { %450 = vrsqrt.f32 %v322_v12 }
  0xb9   : > { %v449_v13 = vpop.eup %448 }
  0xba   : > { %v451_v14 = vpop.eup %450  ;;  %v324_v15 = vmul.f32 %v449_v13, %v321_v11  ;;  %vm330_vm1 = vweird.f32 %v449_v13 }
  0xbb   : > { %v334_v16 = vmul.f32 %v451_v14, %v322_v12  ;;  %vm340_vm2 = vweird.f32 %v451_v14  ;;  %vm331_vm4 = vmor %vm329_vm3, %vm330_vm1 }
  0xbc   : > { %v325_v17 = vmul.f32 %v449_v13, %v324_v15  ;;  %vm341_vm6 = vmor %vm339_vm5, %vm340_vm2 }
  0xbd   : > { %v335_v18 = vmul.f32 %v451_v14, %v334_v16 }
  0xbe   : > { %v326_v20 = vmul.f32 0.5, %v325_v17 }
  0xbf   : > { %v336_v21 = vmul.f32 0.5, %v335_v18 }
  0xc0   : > { %v327_v22 = vsub.f32 1.5, %v326_v20 }
  0xc1   : > { %v337_v23 = vsub.f32 1.5, %v336_v21 }
  0xc2   : > { %v328_v24 = vmul.f32 %v449_v13, %v327_v22 }
  0xc3   : > { %v338_v25 = vmul.f32 %v451_v14, %v337_v23 }
  0xc4   : > { %v332_v26 = vsel %vm331_vm4, %v449_v13, %v328_v24 }
  0xc5   : > { %v342_v27 = vsel %vm341_vm6, %v451_v14, %v338_v25  ;;  %v343_v28 = vmul.f32 %v332_v26, %v303_v57 }
  0xc6   : > { %v344_v29 = vmul.f32 %v342_v27, %v304_v58 }
  0xc7   : > { %v350_v30 = vmul.f32 %v348_v19, %v343_v28 }
  0xc8   : > { %v351_v31 = vmul.f32 %v348_v19, %v344_v29 }
  0xc9   : > { %v357_v33 = vadd.f32 %v355_v32, %v350_v30 }
  0xca   : > { %v358_v34 = vadd.f32 %v355_v32, %v351_v31 }
  0xcb   : > { %359 = vst [vmem:[%s226_s11] sm:$0xff] %v357_v33 }
  0xcc   : > { %360 = vst [vmem:[%s226_s11 + $0x8] sm:$0xff] %v358_v34 }
  0xcd PF: > { %s15_s18 = sadd.s32 1, %s458_s18  }
  0xce   : > { %p12_p4 = scmp.ge.s32.totalorder %s15_s18, 4  }
  0xd0   :  { %14 = sbr.rel (!%p12_p4) target bundleno = 1 (0x1), region = 70 }

// kernel: reverse.9
= control target key start
LH: loop header
LB: loop body
LE: loop exit
PB: predicated region body
PF: predicated region fallthrough
CT: control target
= control target key end

     0   :  { %v104_v10 = vlaneseq  ;;  %v97_v14 = vld [vmem:[#allocation0 + $0x7] ss:$-1 sm:$0xff]  ;;  %v111_v19 = vld [vmem:[#allocation0 + $0x17] ss:$-1 sm:$0xff]  ;;  %s606_s0 = inlined_call_operand.vmem [shape: f32[8,2,16,7], index: 0, kind: input, shape index: {}]   ;;  %s607_s1 = inlined_call_operand.vmem [shape: f32[8,2,16,7], index: 1, kind: output, shape index: {}]  }
   0x1   :  { %v61_v0 = vld [vmem:[%s606_s0] sm:$0xff]  ;;  %v63_v1 = vld [vmem:[%s606_s0 + $0x8] sm:$0xff]  ;;  %v65_v2 = vld [vmem:[%s606_s0 + $0x10] sm:$0xff]  ;;  %v98_v21 = vrot.slane %v97_v14, 1  ;;  %v112_v25 = vrot.slane %v111_v19, 1 }
   0x2   :  { %62 = vst [vmem:[#allocation0 + $0x8] sm:$0xff] %v61_v0  ;;  %v67_v3 = vld [vmem:[%s606_s0 + $0x18] sm:$0xff]  ;;  %v69_v4 = vld [vmem:[%s606_s0 + $0x20] sm:$0xff]  ;;  %v71_v5 = vld [vmem:[%s606_s0 + $0x28] sm:$0xff]  ;;  %v517_v17 = vshrl.u32 %v104_v10, 7 }
   0x3   :  { %64 = vst [vmem:[#allocation0 + $0x18] sm:$0xff] %v63_v1  ;;  %v73_v6 = vld [vmem:[%s606_s0 + $0x30] sm:$0xff]  ;;  %v75_v7 = vld [vmem:[%s606_s0 + $0x38] sm:$0xff]  ;;  %v77_v8 = vld [vmem:[%s606_s0 + $0x40] sm:$0xff] }
   0x4   :  { %66 = vst [vmem:[#allocation0 + $0x28] sm:$0xff] %v65_v2  ;;  %v79_v9 = vld [vmem:[%s606_s0 + $0x48] sm:$0xff]  ;;  %v81_v11 = vld [vmem:[%s606_s0 + $0x50] sm:$0xff]  ;;  %v83_v12 = vld [vmem:[%s606_s0 + $0x58] sm:$0xff]  ;;  %vm106_vm0 = vcmp.lt.s32.totalorder %v517_v17, 7 }
   0x5   :  { %68 = vst [vmem:[#allocation0 + $0x38] sm:$0xff] %v67_v3  ;;  %v85_v13 = vld [vmem:[%s606_s0 + $0x60] sm:$0xff]  ;;  %v87_v15 = vld [vmem:[%s606_s0 + $0x68] sm:$0xff]  ;;  %v89_v18 = vld [vmem:[%s606_s0 + $0x70] sm:$0xff] }
   0x6   :  { %70 = vst [vmem:[#allocation0 + $0x48] sm:$0xff] %v69_v4  ;;  %v91_v20 = vld [vmem:[%s606_s0 + $0x78] sm:$0xff]  ;;  %v125_v24 = vld [vmem:[#allocation0 + $0x27] ss:$-1 sm:$0xff]  ;;  %v139_v28 = vld [vmem:[#allocation0 + $0x37] ss:$-1 sm:$0xff] }
   0x7   :  { %72 = vst [vmem:[#allocation0 + $0x58] sm:$0xff] %v71_v5  ;;  %v126_v29 = vrot.slane %v125_v24, 1  ;;  %v153_v32 = vld [vmem:[#allocation0 + $0x47] ss:$-1 sm:$0xff]  ;;  %v140_v33 = vrot.slane %v139_v28, 1 }
   0x8   :  { %74 = vst [vmem:[#allocation0 + $0x68] sm:$0xff] %v73_v6  ;;  %v167_v36 = vld [vmem:[#allocation0 + $0x57] ss:$-1 sm:$0xff]  ;;  %v154_v37 = vrot.slane %v153_v32, 1  ;;  %v181_v40 = vld [vmem:[#allocation0 + $0x67] ss:$-1 sm:$0xff] }
   0x9   :  { %76 = vst [vmem:[#allocation0 + $0x78] sm:$0xff] %v75_v7  ;;  %v102_v16 = vld [vmem:[#allocation0 + $0xf] ss:$-1 sm:$0xff]  ;;  %v168_v41 = vrot.slane %v167_v36, 1  ;;  %v195_v44 = vld [vmem:[#allocation0 + $0x77] ss:$-1 sm:$0xff] }
   0xa   :  { %78 = vst [vmem:[#allocation0 + $0x88] sm:$0xff] %v77_v8  ;;  %v116_v22 = vld [vmem:[#allocation0 + $0x1f] ss:$-1 sm:$0xff]  ;;  %v103_v23 = vrot.slane %v102_v16, 1  ;;  %v182_v45 = vrot.slane %v181_v40, 1  ;;  %v196_v49 = vrot.slane %v195_v44, 1 }
   0xb   :  { %80 = vst [vmem:[#allocation0 + $0x98] sm:$0xff] %v79_v9  ;;  %v130_v26 = vld [vmem:[#allocation0 + $0x2f] ss:$-1 sm:$0xff]  ;;  %v117_v27 = vrot.slane %v116_v22, 1  ;;  %v209_v48 = vld [vmem:[#allocation0 + $0x87] ss:$-1 sm:$0xff] }
   0xc   :  { %82 = vst [vmem:[#allocation0 + $0xa8] sm:$0xff] %v81_v11  ;;  %v144_v30 = vld [vmem:[#allocation0 + $0x3f] ss:$-1 sm:$0xff]  ;;  %v131_v31 = vrot.slane %v130_v26, 1  ;;  %v223_v52 = vld [vmem:[#allocation0 + $0x97] ss:$-1 sm:$0xff] }
   0xd   :  { %84 = vst [vmem:[#allocation0 + $0xb8] sm:$0xff] %v83_v12  ;;  %v158_v34 = vld [vmem:[#allocation0 + $0x4f] ss:$-1 sm:$0xff]  ;;  %v145_v35 = vrot.slane %v144_v30, 1  ;;  %v210_v53 = vrot.slane %v209_v48, 1  ;;  %v224_v57 = vrot.slane %v223_v52, 1 }
   0xe   :  { %86 = vst [vmem:[#allocation0 + $0xc8] sm:$0xff] %v85_v13  ;;  %v172_v38 = vld [vmem:[#allocation0 + $0x5f] ss:$-1 sm:$0xff]  ;;  %v159_v39 = vrot.slane %v158_v34, 1  ;;  %v237_v56 = vld [vmem:[#allocation0 + $0xa7] ss:$-1 sm:$0xff] }
   0xf   :  { %88 = vst [vmem:[#allocation0 + $0xd8] sm:$0xff] %v87_v15  ;;  %v186_v42 = vld [vmem:[#allocation0 + $0x6f] ss:$-1 sm:$0xff]  ;;  %v173_v43 = vrot.slane %v172_v38, 1  ;;  %v251_v60 = vld [vmem:[#allocation0 + $0xb7] ss:$-1 sm:$0xff] }
  0x10   :  { %90 = vst [vmem:[#allocation0 + $0xe8] sm:$0xff] %v89_v18  ;;  %v200_v46 = vld [vmem:[#allocation0 + $0x7f] ss:$-1 sm:$0xff]  ;;  %v187_v47 = vrot.slane %v186_v42, 1  ;;  %v238_v61 = vrot.slane %v237_v56, 1  ;;  %v252_v1 = vrot.slane %v251_v60, 1 }
  0x11   :  { %92 = vst [vmem:[#allocation0 + $0xf8] sm:$0xff] %v91_v20  ;;  %v214_v50 = vld [vmem:[#allocation0 + $0x8f] ss:$-1 sm:$0xff]  ;;  %v201_v51 = vrot.slane %v200_v46, 1  ;;  %v265_v0 = vld [vmem:[#allocation0 + $0xc7] ss:$-1 sm:$0xff] }
  0x12   :  { %99 = vst [vmem:[#allocation1] sm:$0xff] %v98_v21  ;;  %v228_v54 = vld [vmem:[#allocation0 + $0x9f] ss:$-1 sm:$0xff]  ;;  %v215_v55 = vrot.slane %v214_v50, 1  ;;  %v279_v4 = vld [vmem:[#allocation0 + $0xd7] ss:$-1 sm:$0xff] }
  0x13   :  { %107 = vst.msk [vmem:[#allocation1] sm:$0xff] %vm106_vm0, %v103_v23  ;;  %v242_v58 = vld [vmem:[#allocation0 + $0xaf] ss:$-1 sm:$0xff]  ;;  %v229_v59 = vrot.slane %v228_v54, 1  ;;  %v266_v5 = vrot.slane %v265_v0, 1  ;;  %v280_v9 = vrot.slane %v279_v4, 1 }
  0x14   :  { %113 = vst [vmem:[#allocation1 + $0x8] sm:$0xff] %v112_v25  ;;  %v256_v62 = vld [vmem:[#allocation0 + $0xbf] ss:$-1 sm:$0xff]  ;;  %v243_v63 = vrot.slane %v242_v58, 1  ;;  %v293_v8 = vld [vmem:[#allocation0 + $0xe7] ss:$-1 sm:$0xff] }
  0x15   :  { %121 = vst.msk [vmem:[#allocation1 + $0x8] sm:$0xff] %vm106_vm0, %v117_v27  ;;  %v270_v2 = vld [vmem:[#allocation0 + $0xcf] ss:$-1 sm:$0xff]  ;;  %v257_v3 = vrot.slane %v256_v62, 1  ;;  %v307_v12 = vld [vmem:[#allocation0 + $0xf7] ss:$-1 sm:$0xff] }
  0x16   :  { %127 = vst [vmem:[#allocation1 + $0x10] sm:$0xff] %v126_v29  ;;  %v284_v6 = vld [vmem:[#allocation0 + $0xdf] ss:$-1 sm:$0xff]  ;;  %v271_v7 = vrot.slane %v270_v2, 1  ;;  %v294_v13 = vrot.slane %v293_v8, 1  ;;  %v308_v16 = vrot.slane %v307_v12, 1 }
  0x17   :  { %135 = vst.msk [vmem:[#allocation1 + $0x10] sm:$0xff] %vm106_vm0, %v131_v31  ;;  %v298_v10 = vld [vmem:[#allocation0 + $0xef] ss:$-1 sm:$0xff]  ;;  %v285_v11 = vrot.slane %v284_v6, 1 }
  0x18   :  { %141 = vst [vmem:[#allocation1 + $0x18] sm:$0xff] %v140_v33  ;;  %v312_v14 = vld [vmem:[#allocation0 + $0xff] ss:$-1 sm:$0xff]  ;;  %v299_v15 = vrot.slane %v298_v10, 1 }
  0x19   :  { %149 = vst.msk [vmem:[#allocation1 + $0x18] sm:$0xff] %vm106_vm0, %v145_v35  ;;  %v313_v18 = vrot.slane %v312_v14, 1 }
  0x1a   :  { %155 = vst [vmem:[#allocation1 + $0x20] sm:$0xff] %v154_v37  ;;  %v376_v19 = vld [vmem:[#allocation1] sm:$0xff] }
  0x1b   :  { %163 = vst.msk [vmem:[#allocation1 + $0x20] sm:$0xff] %vm106_vm0, %v159_v39 }
  0x1c   :  { %169 = vst [vmem:[#allocation1 + $0x28] sm:$0xff] %v168_v41  ;;  %v378_v20 = vld [vmem:[#allocation1 + $0x8] sm:$0xff] }
  0x1d   :  { %177 = vst.msk [vmem:[#allocation1 + $0x28] sm:$0xff] %vm106_vm0, %v173_v43 }
  0x1e   :  { %183 = vst [vmem:[#allocation1 + $0x30] sm:$0xff] %v182_v45  ;;  %v380_v17 = vld [vmem:[#allocation1 + $0x10] sm:$0xff] }
  0x1f   :  { %191 = vst.msk [vmem:[#allocation1 + $0x30] sm:$0xff] %vm106_vm0, %v187_v47 }
  0x20   :  { %197 = vst [vmem:[#allocation1 + $0x38] sm:$0xff] %v196_v49  ;;  %v382_v21 = vld [vmem:[#allocation1 + $0x18] sm:$0xff] }
  0x21   :  { %205 = vst.msk [vmem:[#allocation1 + $0x38] sm:$0xff] %vm106_vm0, %v201_v51 }
  0x22   :  { %211 = vst [vmem:[#allocation1 + $0x40] sm:$0xff] %v210_v53  ;;  %v384_v22 = vld [vmem:[#allocation1 + $0x20] sm:$0xff] }
  0x23   :  { %219 = vst.msk [vmem:[#allocation1 + $0x40] sm:$0xff] %vm106_vm0, %v215_v55 }
  0x24   :  { %225 = vst [vmem:[#allocation1 + $0x48] sm:$0xff] %v224_v57  ;;  %v386_v23 = vld [vmem:[#allocation1 + $0x28] sm:$0xff] }
  0x25   :  { %233 = vst.msk [vmem:[#allocation1 + $0x48] sm:$0xff] %vm106_vm0, %v229_v59 }
  0x26   :  { %239 = vst [vmem:[#allocation1 + $0x50] sm:$0xff] %v238_v61  ;;  %v388_v24 = vld [vmem:[#allocation1 + $0x30] sm:$0xff] }
  0x27   :  { %247 = vst.msk [vmem:[#allocation1 + $0x50] sm:$0xff] %vm106_vm0, %v243_v63 }
  0x28   :  { %253 = vst [vmem:[#allocation1 + $0x58] sm:$0xff] %v252_v1  ;;  %v390_v25 = vld [vmem:[#allocation1 + $0x38] sm:$0xff] }
  0x29   :  { %261 = vst.msk [vmem:[#allocation1 + $0x58] sm:$0xff] %vm106_vm0, %v257_v3 }
  0x2a   :  { %267 = vst [vmem:[#allocation1 + $0x60] sm:$0xff] %v266_v5  ;;  %v392_v26 = vld [vmem:[#allocation1 + $0x40] sm:$0xff] }
  0x2b   :  { %275 = vst.msk [vmem:[#allocation1 + $0x60] sm:$0xff] %vm106_vm0, %v271_v7 }
  0x2c   :  { %281 = vst [vmem:[#allocation1 + $0x68] sm:$0xff] %v280_v9  ;;  %v394_v27 = vld [vmem:[#allocation1 + $0x48] sm:$0xff] }
  0x2d   :  { %289 = vst.msk [vmem:[#allocation1 + $0x68] sm:$0xff] %vm106_vm0, %v285_v11 }
  0x2e   :  { %295 = vst [vmem:[#allocation1 + $0x70] sm:$0xff] %v294_v13  ;;  %v396_v28 = vld [vmem:[#allocation1 + $0x50] sm:$0xff] }
  0x2f   :  { %303 = vst.msk [vmem:[#allocation1 + $0x70] sm:$0xff] %vm106_vm0, %v299_v15 }
  0x30   :  { %309 = vst [vmem:[#allocation1 + $0x78] sm:$0xff] %v308_v16  ;;  %v398_v29 = vld [vmem:[#allocation1 + $0x58] sm:$0xff] }
  0x31   :  { %317 = vst.msk [vmem:[#allocation1 + $0x78] sm:$0xff] %vm106_vm0, %v313_v18 }
  0x32   :  { %377 = vst [vmem:[%s607_s1] sm:$0xff] %v376_v19  ;;  %v400_v30 = vld [vmem:[#allocation1 + $0x60] sm:$0xff] }
  0x33   :  { %379 = vst [vmem:[%s607_s1 + $0x8] sm:$0xff] %v378_v20 }
  0x34   :  { %381 = vst [vmem:[%s607_s1 + $0x10] sm:$0xff] %v380_v17  ;;  %v402_v31 = vld [vmem:[#allocation1 + $0x68] sm:$0xff] }
  0x35   :  { %383 = vst [vmem:[%s607_s1 + $0x18] sm:$0xff] %v382_v21 }
  0x36   :  { %385 = vst [vmem:[%s607_s1 + $0x20] sm:$0xff] %v384_v22  ;;  %v404_v32 = vld [vmem:[#allocation1 + $0x70] sm:$0xff] }
  0x37   :  { %387 = vst [vmem:[%s607_s1 + $0x28] sm:$0xff] %v386_v23 }
  0x38   :  { %389 = vst [vmem:[%s607_s1 + $0x30] sm:$0xff] %v388_v24  ;;  %v406_v33 = vld [vmem:[#allocation1 + $0x78] sm:$0xff] }
  0x39   :  { %391 = vst [vmem:[%s607_s1 + $0x38] sm:$0xff] %v390_v25 }
  0x3a   :  { %393 = vst [vmem:[%s607_s1 + $0x40] sm:$0xff] %v392_v26 }
  0x3b   :  { %395 = vst [vmem:[%s607_s1 + $0x48] sm:$0xff] %v394_v27 }
  0x3c   :  { %397 = vst [vmem:[%s607_s1 + $0x50] sm:$0xff] %v396_v28 }
  0x3d   :  { %399 = vst [vmem:[%s607_s1 + $0x58] sm:$0xff] %v398_v29 }
  0x3e   :  { %401 = vst [vmem:[%s607_s1 + $0x60] sm:$0xff] %v400_v30 }
  0x3f   :  { %403 = vst [vmem:[%s607_s1 + $0x68] sm:$0xff] %v402_v31 }
  0x40   :  { %405 = vst [vmem:[%s607_s1 + $0x70] sm:$0xff] %v404_v32 }
  0x41   :  { %407 = vst [vmem:[%s607_s1 + $0x78] sm:$0xff] %v406_v33 }

// kernel: fno2d_forward.7
= control target key start
LH: loop header
LB: loop body
LE: loop exit
PB: predicated region body
PF: predicated region fallthrough
CT: control target
= control target key end

     0   :  { %s668_s21 = smov 0   ;;  %s723_s0 = inlined_call_operand.vmem [shape: f32[8,512], index: 0, kind: input, shape index: {}]   ;;  %s724_s1 = inlined_call_operand.vmem [shape: f32[8,512], index: 1, kind: input, shape index: {}]   ;;  %s725_s2 = inlined_call_operand.vmem [shape: f32[8,8], index: 2, kind: input, shape index: {}]   ;;  %s726_s3 = inlined_call_operand.vmem [shape: f32[8,1], index: 3, kind: input, shape index: {}]   ;;  %s727_s4 = inlined_call_operand.vmem [shape: f32[8,1], index: 4, kind: input, shape index: {}]   ;;  %s728_s5 = inlined_call_operand.vmem [shape: f32[8,1], index: 5, kind: input, shape index: {}]   ;;  %s729_s6 = inlined_call_operand.vmem [shape: f32[8,512], index: 6, kind: output, shape index: {}]  }
   0x1 LB: > { %s580_s22 = sadd.s32 4294967295, %s628_s21   ;;  %p584_p0 = scmp.ge.s32.totalorder %s628_s21, 1  ;;  %s628_s21 = sphi %s668_s21, %s16_s21  }
   0x2   : > { %p224_p1 = scmp.lt.s32.totalorder %s628_s21, 3 }
   0x4   : > { %p225_p2 = pnand %p584_p0, %p224_p1 }
   0x5   : > { %s585_s23 = sshll.u32 (!%p225_p2), %s580_s22, 1 }
   0x6   : > { %228 = sbr.rel (%p225_p2) target bundleno = 257 (0x101), region = 44  ;;  %p260_p3 = scmp.lt.s32.totalorder (!%p225_p2), %s585_s23, 3 }
   0xb   : > { %v328_v0 = vld [vmem:[%s726_s3] sm:$0xff]  ;;  %v630_v1 = vmov 0   ;;  %s731_s23 = smov (!%p260_p3, %s585_s23), 3  ;;  %vm280_vm0 = vcmask 64512   ;;  %v631_v7 = vmov 8.0  }
   0xc   : > { %608 = vset.pattern.permute.xlu0 %v630_v1  ;;  %609 = vset.pattern.permute.xlu1 %v630_v1  ;;  %v337_v2 = vld [vmem:[%s728_s5] sm:$0xff]  ;;  %s682_s28 = sshll.u32 %s731_s23, 3  ;;  %610 = vrcp.f32 %v631_v7  ;;  %v632_v55 = vmov 1.4142135  }
   0xd   : > { %331 = vperm.xlu0 %608, %v328_v0   ;;  %410 = vperm.xlu1 %609, %v337_v2   ;;  %s269_s7 = scalar_lea.vmem %s724_s1, %s682_s28  ;;  %v277_v3 = vld [vmem:[%s725_s2] sm:$0xff]  ;;  %s263_s14 = scalar_lea.vmem %s723_s0, %s682_s28  ;;  %612 = vrcp.f32 %v632_v55 }
   0xe   : > { %v278_v4 = vld [vmem:[%s269_s7] sm:$0xff]  ;;  %v279_v5 = vld [vmem:[%s269_s7 + $0x8] sm:$0xff]  ;;  %s275_s17 = scalar_lea.vmem %s729_s6, %s682_s28 }
   0xf   : > { %v336_v6 = vld [vmem:[%s727_s4] sm:$0xff]  ;;  %299 = vmatpush.msra.mxu0 %v278_v4  ;;  %319 = vmatpush.msra.mxu1 %v279_v5  ;;  %v325_v10 = vld [vmem:[%s263_s14 + $0x8] sm:$0xff] }
  0x10   : > { %591 = vmatmul.msk.f32.vlgmr.msra.gmra.mxu0 %vm280_vm0, %v277_v3  ;;  %592 = vmatmul.msk.f32.vlgmr.msra.gmra.mxu1 %vm280_vm0, %v277_v3  ;;  %v324_v9 = vld [vmem:[%s263_s14] sm:$0xff] }
  0x12   : > { %v611_v8 = vpop.eup %610 }
  0x13   : > { %v351_v11 = vmul.f32 8.0, %v611_v8  ;;  %vm355_vm1 = vweird.f32 %v611_v8  ;;  %v613_v58 = vpop.eup %612 }
  0x14   : > { %v418_v59 = vmul.f32 1.4142135, %v613_v58  ;;  %vm422_vm8 = vweird.f32 %v613_v58 }
  0x15   : > { %403 = vperm.xlu0 %608, %v336_v6   ;;  %v352_v17 = vsub.f32 1.0, %v351_v11 }
  0x16   : > { %v419_v1 = vsub.f32 1.0, %v418_v59 }
  0x17   : > { %v353_v22 = vmul.f32 %v611_v8, %v352_v17 }
  0x18   : > { %v420_v6 = vmul.f32 %v613_v58, %v419_v1 }
  0x19   : > { %v354_v27 = vadd.f32 %v611_v8, %v353_v22 }
  0x1a   : > { %v421_v11 = vadd.f32 %v613_v58, %v420_v6 }
  0x1b   : > { %v356_v32 = vsel %vm355_vm1, %v611_v8, %v354_v27 }
  0x7f   : > { %v332_v16 = vpop.permute.xlu0 %331 }
  0x8d   : > { %v301_v12 = vpop.f32.mrf.mxu0  ;;  %v321_v13 = vpop.f32.mrf.mxu1 }
  0x8e   : > { %v326_v14 = vadd.f32 %v324_v9, %v301_v12  ;;  %v327_v15 = vadd.f32 %v325_v10, %v321_v13 }
  0x90   : > { %v334_v18 = vadd.f32 %v332_v16, %v326_v14  ;;  %v335_v19 = vadd.f32 %v332_v16, %v327_v15  ;;  %v404_v14 = vpop.permute.xlu0 %403  ;;  %v411_v16 = vpop.permute.xlu1 %410 }
  0x92   : > { %v338_v20 = vrot.slane %v334_v18, 4  ;;  %v344_v21 = vrot.slane %v335_v19, 4 }
  0x94   : > { %v339_v23 = vadd.f32 %v338_v20, %v334_v18  ;;  %v345_v24 = vadd.f32 %v344_v21, %v335_v19 }
  0x96   : > { %v340_v25 = vrot.slane %v339_v23, 2  ;;  %v346_v26 = vrot.slane %v345_v24, 2 }
  0x98   : > { %v341_v28 = vadd.f32 %v340_v25, %v339_v23  ;;  %v347_v29 = vadd.f32 %v346_v26, %v345_v24 }
  0x9a   : > { %v342_v30 = vrot.slane %v341_v28, 1  ;;  %v348_v31 = vrot.slane %v347_v29, 1 }
  0x9c   : > { %v343_v33 = vadd.f32 %v342_v30, %v341_v28  ;;  %v349_v34 = vadd.f32 %v348_v31, %v347_v29 }
  0x9e   : > { %v357_v35 = vmul.f32 %v356_v32, %v343_v33  ;;  %v358_v36 = vmul.f32 %v356_v32, %v349_v34 }
  0xa0   : > { %v359_v37 = vsub.f32 %v334_v18, %v357_v35  ;;  %v360_v38 = vsub.f32 %v335_v19, %v358_v36  ;;  %v423_v19 = vsel %vm422_vm8, %v613_v58, %v421_v11 }
  0xa2   : > { %v361_v39 = vmul.f32 %v359_v37, %v359_v37  ;;  %v362_v40 = vmul.f32 %v360_v38, %v360_v38 }
  0xa4   : > { %v363_v41 = vrot.slane %v361_v39, 4  ;;  %v369_v42 = vrot.slane %v362_v40, 4 }
  0xa6   : > { %v364_v43 = vadd.f32 %v363_v41, %v361_v39  ;;  %v370_v44 = vadd.f32 %v369_v42, %v362_v40 }
  0xa8   : > { %v365_v45 = vrot.slane %v364_v43, 2  ;;  %v371_v46 = vrot.slane %v370_v44, 2 }
  0xaa   : > { %v366_v47 = vadd.f32 %v365_v45, %v364_v43  ;;  %v372_v48 = vadd.f32 %v371_v46, %v370_v44 }
  0xac   : > { %v367_v49 = vrot.slane %v366_v47, 1  ;;  %v373_v50 = vrot.slane %v372_v48, 1 }
  0xae   : > { %v368_v51 = vadd.f32 %v367_v49, %v366_v47  ;;  %v374_v52 = vadd.f32 %v373_v50, %v372_v48 }
  0xb0   : > { %v375_v53 = vmul.f32 %v368_v51, %v356_v32  ;;  %v376_v54 = vmul.f32 %v374_v52, %v356_v32 }
  0xb2   : > { %v377_v56 = vadd.f32 1e-05, %v375_v53  ;;  %v378_v57 = vadd.f32 1e-05, %v376_v54 }
  0xb4   : > { %614 = vrsqrt.f32 %v377_v56  ;;  %vm385_vm4 = vweird.f32 %v377_v56  ;;  %vm395_vm6 = vweird.f32 %v378_v57 }
  0xb5   : > { %616 = vrsqrt.f32 %v378_v57 }
  0xba   : > { %v615_v60 = vpop.eup %614 }
  0xbb   : > { %v617_v61 = vpop.eup %616  ;;  %v380_v62 = vmul.f32 %v615_v60, %v377_v56  ;;  %vm386_vm2 = vweird.f32 %v615_v60 }
  0xbc   : > { %v390_v63 = vmul.f32 %v617_v61, %v378_v57  ;;  %vm396_vm3 = vweird.f32 %v617_v61  ;;  %vm387_vm5 = vmor %vm385_vm4, %vm386_vm2 }
  0xbd   : > { %v381_v0 = vmul.f32 %v615_v60, %v380_v62  ;;  %vm397_vm7 = vmor %vm395_vm6, %vm396_vm3 }
  0xbe   : > { %v391_v2 = vmul.f32 %v617_v61, %v390_v63 }
  0xbf   : > { %v382_v3 = vmul.f32 0.5, %v381_v0 }
  0xc0   : > { %v392_v4 = vmul.f32 0.5, %v391_v2 }
  0xc1   : > { %v383_v5 = vsub.f32 1.5, %v382_v3 }
  0xc2   : > { %v393_v7 = vsub.f32 1.5, %v392_v4 }
  0xc3   : > { %v384_v8 = vmul.f32 %v615_v60, %v383_v5 }
  0xc4   : > { %v394_v9 = vmul.f32 %v617_v61, %v393_v7 }
  0xc5   : > { %v388_v10 = vsel %vm387_vm5, %v615_v60, %v384_v8 }
  0xc6   : > { %v398_v12 = vsel %vm397_vm7, %v617_v61, %v394_v9  ;;  %v399_v13 = vmul.f32 %v388_v10, %v359_v37 }
  0xc7   : > { %v400_v15 = vmul.f32 %v398_v12, %v360_v38 }
  0xc8   : > { %v406_v17 = vmul.f32 %v404_v14, %v399_v13 }
  0xc9   : > { %v407_v18 = vmul.f32 %v404_v14, %v400_v15 }
  0xca   : > { %v698_v20 = vadd.f32 %v411_v16, %v406_v17 }
  0xcb   : > { %v700_v21 = vadd.f32 %v411_v16, %v407_v18 }
  0xcc   : > { %v703_v22 = vmul.f32 %v423_v19, %v698_v20 }
  0xcd   : > { %v706_v23 = vmul.f32 %v423_v19, %v700_v21 }
  0xce   : > { %v426_v24 = vmul.f32 %v703_v22, %v703_v22 }
  0xcf   : > { %v466_v25 = vmul.f32 %v706_v23, %v706_v23 }
  0xd0   : > { %v427_v26 = vmin.f32 %v426_v24, 16.0 }
  0xd1   : > { %v467_v27 = vmin.f32 %v466_v25, 16.0 }
  0xd2   : > { %v428_v28 = vmul.f32 2.1237322e-06, %v427_v26  ;;  %v439_v29 = vmul.f32 3.8918573e-05, %v427_v26 }
  0xd3   : > { %v468_v30 = vmul.f32 2.1237322e-06, %v467_v27  ;;  %v479_v31 = vmul.f32 3.8918573e-05, %v467_v27 }
  0xd4   : > { %v429_v32 = vadd.f32 0.00028619796, %v428_v28  ;;  %v440_v33 = vadd.f32 0.001143296, %v439_v29 }
  0xd5   : > { %v469_v34 = vadd.f32 0.00028619796, %v468_v30  ;;  %v480_v35 = vadd.f32 0.001143296, %v479_v31 }
  0xd6   : > { %v430_v36 = vmul.f32 %v429_v32, %v427_v26  ;;  %v441_v37 = vmul.f32 %v440_v33, %v427_v26 }
  0xd7   : > { %v470_v38 = vmul.f32 %v469_v34, %v467_v27  ;;  %v481_v39 = vmul.f32 %v480_v35, %v467_v27  ;;  %v415_v34 = vmul.f32 0.5, %v698_v20 }
  0xd8   : > { %v431_v40 = vadd.f32 0.0036580483, %v430_v36  ;;  %v442_v41 = vadd.f32 0.014752088, %v441_v37 }
  0xd9   : > { %v482_v42 = vadd.f32 0.014752088, %v481_v39  ;;  %v471_v44 = vadd.f32 0.0036580483, %v470_v38 }
  0xda   : > { %v443_v43 = vmul.f32 %v442_v41, %v427_v26  ;;  %v432_v46 = vmul.f32 %v431_v40, %v427_v26 }
  0xdb   : > { %v483_v45 = vmul.f32 %v482_v42, %v467_v27  ;;  %v472_v50 = vmul.f32 %v471_v44, %v467_v27 }
  0xdc   : > { %v444_v47 = vadd.f32 0.112945676, %v443_v43  ;;  %v433_v52 = vadd.f32 0.05243302, %v432_v46 }
  0xdd   : > { %v484_v48 = vadd.f32 0.112945676, %v483_v45  ;;  %v473_v56 = vadd.f32 0.05243302, %v472_v50 }
  0xde   : > { %v445_v49 = vmul.f32 %v444_v47, %v427_v26  ;;  %v434_v58 = vmul.f32 %v433_v52, %v427_v26 }
  0xdf   : > { %v485_v51 = vmul.f32 %v484_v48, %v467_v27  ;;  %v474_v61 = vmul.f32 %v473_v56, %v467_v27 }
  0xe0   : > { %v446_v53 = vadd.f32 0.4994258, %v445_v49  ;;  %v435_v62 = vadd.f32 0.18741608, %v434_v58 }
  0xe1   : > { %v486_v54 = vadd.f32 0.4994258, %v485_v51  ;;  %v475_v63 = vadd.f32 0.18741608, %v474_v61 }
  0xe2   : > { %v447_v55 = vmul.f32 %v446_v53, %v427_v26  ;;  %v436_v1 = vmul.f32 %v435_v62, %v427_v26 }
  0xe3   : > { %v487_v57 = vmul.f32 %v486_v54, %v467_v27  ;;  %v476_v4 = vmul.f32 %v475_v63, %v467_v27 }
  0xe4   : > { %v448_v59 = vadd.f32 1.0, %v447_v55  ;;  %v437_v7 = vadd.f32 1.1283791, %v436_v1 }
  0xe5   : > { %v488_v60 = vadd.f32 1.0, %v487_v57  ;;  %v477_v13 = vadd.f32 1.1283791, %v476_v4 }
  0xe6   : > { %618 = vrcp.f32 %v448_v59  ;;  %v460_v8 = vand.u32 2147483648, %v448_v59  ;;  %v458_v11 = vand.u32 2147483647, %v448_v59  ;;  %vm454_vm11 = vweird.f32 %v448_v59 }
  0xe7   : > { %620 = vrcp.f32 %v488_v60  ;;  %v500_v12 = vand.u32 2147483648, %v488_v60  ;;  %v498_v15 = vand.u32 2147483647, %v488_v60  ;;  %vm494_vm13 = vweird.f32 %v488_v60 }
  0xe8   : > { %v461_v17 = vor.u32 1.1754944e-38, %v460_v8  ;;  %v438_v19 = vmul.f32 %v437_v7, %v703_v22  ;;  %vm459_vm14 = vcmp.eq.f32.partialorder %v458_v11, 8.507059e+37  ;;  %v478_v27 = vmul.f32 %v477_v13, %v706_v23 }
  0xe9   : > { %v501_v25 = vor.u32 1.1754944e-38, %v500_v12  ;;  %vm499_vm0 = vcmp.eq.f32.partialorder %v498_v15, 8.507059e+37  ;;  %v416_v22 = vmul.f32 0.5, %v700_v21 }
  0xec   : > { %v619_v0 = vpop.eup %618 }
  0xed   : > { %v621_v2 = vpop.eup %620  ;;  %v450_v3 = vmul.f32 %v619_v0, %v448_v59  ;;  %vm455_vm9 = vweird.f32 %v619_v0 }
  0xee   : > { %v490_v5 = vmul.f32 %v621_v2, %v488_v60  ;;  %vm495_vm10 = vweird.f32 %v621_v2  ;;  %vm456_vm12 = vmor %vm454_vm11, %vm455_vm9 }
  0xef   : > { %v451_v6 = vsub.f32 1.0, %v450_v3  ;;  %vm496_vm15 = vmor %vm494_vm13, %vm495_vm10 }
  0xf0   : > { %v491_v9 = vsub.f32 1.0, %v490_v5 }
  0xf1   : > { %v452_v10 = vmul.f32 %v619_v0, %v451_v6 }
  0xf2   : > { %v492_v14 = vmul.f32 %v621_v2, %v491_v9 }
  0xf3   : > { %v453_v16 = vadd.f32 %v619_v0, %v452_v10 }
  0xf4   : > { %v493_v18 = vadd.f32 %v621_v2, %v492_v14 }
  0xf5   : > { %v457_v24 = vsel %vm456_vm12, %v619_v0, %v453_v16 }
  0xf6   : > { %v462_v26 = vsel %vm459_vm14, %v461_v17, %v457_v24  ;;  %v497_v28 = vsel %vm496_vm15, %v621_v2, %v493_v18 }
  0xf7   : > { %v463_v29 = vmul.f32 %v462_v26, %v438_v19  ;;  %v502_v30 = vsel %vm499_vm0, %v501_v25, %v497_v28 }
  0xf8   : > { %v503_v31 = vmul.f32 %v502_v30, %v478_v27 }
  0xf9   : > { %v593_v32 = vclamps-f32 %v463_v29, 1.0 }
  0xfa   : > { %v594_v33 = vclamps-f32 %v503_v31, 1.0 }
  0xfb   : > { %v506_v35 = vadd.f32 1.0, %v593_v32 }
  0xfc   : > { %v507_v36 = vadd.f32 1.0, %v594_v33 }
  0xfd   : > { %v508_v37 = vmul.f32 %v506_v35, %v415_v34 }
  0xfe   : > { %v509_v38 = vmul.f32 %v507_v36, %v416_v22 }
  0xff   : > { %510 = vst [vmem:[%s275_s17] sm:$0xff] %v508_v37 }
 0x100   : > { %511 = vst [vmem:[%s275_s17 + $0x8] sm:$0xff] %v509_v38 }
 0x101 PF: > { %s16_s21 = sadd.s32 1, %s628_s21  }
 0x102   : > { %p13_p4 = scmp.ge.s32.totalorder %s16_s21, 4  }
 0x104   :  { %15 = sbr.rel (!%p13_p4) target bundleno = 1 (0x1), region = 77 }

// kernel: fno2d_forward.10
= control target key start
LH: loop header
LB: loop body
LE: loop exit
PB: predicated region body
PF: predicated region fallthrough
CT: control target
= control target key end

     0   :  { %s563_s21 = smov 0   ;;  %s600_s0 = inlined_call_operand.vmem [shape: f32[8,512], index: 0, kind: input, shape index: {}]   ;;  %s601_s1 = inlined_call_operand.vmem [shape: f32[8,512], index: 1, kind: input, shape index: {}]   ;;  %s602_s2 = inlined_call_operand.vmem [shape: f32[8,8], index: 2, kind: input, shape index: {}]   ;;  %s603_s3 = inlined_call_operand.vmem [shape: f32[8,1], index: 3, kind: input, shape index: {}]   ;;  %s604_s4 = inlined_call_operand.vmem [shape: f32[8,1], index: 4, kind: input, shape index: {}]   ;;  %s605_s5 = inlined_call_operand.vmem [shape: f32[8,1], index: 5, kind: input, shape index: {}]   ;;  %s606_s6 = inlined_call_operand.vmem [shape: f32[8,512], index: 6, kind: output, shape index: {}]  }
   0x1 LB: > { %s485_s22 = sadd.s32 4294967295, %s524_s21   ;;  %p489_p0 = scmp.ge.s32.totalorder %s524_s21, 1  ;;  %s524_s21 = sphi %s563_s21, %s16_s21  }
   0x2   : > { %p224_p1 = scmp.lt.s32.totalorder %s524_s21, 3 }
   0x4   : > { %p225_p2 = pnand %p489_p0, %p224_p1 }
   0x5   : > { %s490_s23 = sshll.u32 (!%p225_p2), %s485_s22, 1 }
   0x6   : > { %228 = sbr.rel (%p225_p2) target bundleno = 206 (0xce), region = 44  ;;  %p260_p3 = scmp.lt.s32.totalorder (!%p225_p2), %s490_s23, 3 }
   0xb   : > { %v328_v0 = vld [vmem:[%s603_s3] sm:$0xff]  ;;  %v526_v1 = vmov 0   ;;  %s608_s23 = smov (!%p260_p3, %s490_s23), 3  ;;  %vm280_vm0 = vcmask 64512   ;;  %v527_v7 = vmov 8.0  }
   0xc   : > { %510 = vset.pattern.permute.xlu0 %v526_v1  ;;  %511 = vset.pattern.permute.xlu1 %v526_v1  ;;  %v337_v2 = vld [vmem:[%s605_s5] sm:$0xff]  ;;  %s577_s28 = sshll.u32 %s608_s23, 3  ;;  %512 = vrcp.f32 %v527_v7 }
   0xd   : > { %331 = vperm.xlu0 %510, %v328_v0   ;;  %410 = vperm.xlu1 %511, %v337_v2   ;;  %s269_s7 = scalar_lea.vmem %s601_s1, %s577_s28  ;;  %v277_v3 = vld [vmem:[%s602_s2] sm:$0xff]  ;;  %s263_s14 = scalar_lea.vmem %s600_s0, %s577_s28 }
   0xe   : > { %v278_v4 = vld [vmem:[%s269_s7] sm:$0xff]  ;;  %v279_v5 = vld [vmem:[%s269_s7 + $0x8] sm:$0xff]  ;;  %s275_s17 = scalar_lea.vmem %s606_s6, %s577_s28 }
   0xf   : > { %v336_v6 = vld [vmem:[%s604_s4] sm:$0xff]  ;;  %299 = vmatpush.msra.mxu0 %v278_v4  ;;  %319 = vmatpush.msra.mxu1 %v279_v5  ;;  %v325_v10 = vld [vmem:[%s263_s14 + $0x8] sm:$0xff] }
  0x10   : > { %496 = vmatmul.msk.f32.vlgmr.msra.gmra.mxu0 %vm280_vm0, %v277_v3  ;;  %497 = vmatmul.msk.f32.vlgmr.msra.gmra.mxu1 %vm280_vm0, %v277_v3  ;;  %v324_v9 = vld [vmem:[%s263_s14] sm:$0xff] }
  0x12   : > { %v513_v8 = vpop.eup %512 }
  0x13   : > { %v351_v11 = vmul.f32 8.0, %v513_v8  ;;  %vm355_vm1 = vweird.f32 %v513_v8 }
  0x15   : > { %403 = vperm.xlu0 %510, %v336_v6   ;;  %v352_v17 = vsub.f32 1.0, %v351_v11 }
  0x17   : > { %v353_v22 = vmul.f32 %v513_v8, %v352_v17 }
  0x19   : > { %v354_v27 = vadd.f32 %v513_v8, %v353_v22 }
  0x1b   : > { %v356_v32 = vsel %vm355_vm1, %v513_v8, %v354_v27 }
  0x7f   : > { %v332_v16 = vpop.permute.xlu0 %331 }
  0x87   : > { %v404_v8 = vpop.permute.xlu0 %403 }
  0x8d   : > { %v301_v12 = vpop.f32.mrf.mxu0  ;;  %v321_v13 = vpop.f32.mrf.mxu1 }
  0x8e   : > { %v326_v14 = vadd.f32 %v324_v9, %v301_v12  ;;  %v327_v15 = vadd.f32 %v325_v10, %v321_v13  ;;  %v411_v10 = vpop.permute.xlu1 %410 }
  0x90   : > { %v334_v18 = vadd.f32 %v332_v16, %v326_v14  ;;  %v335_v19 = vadd.f32 %v332_v16, %v327_v15 }
  0x92   : > { %v338_v20 = vrot.slane %v334_v18, 4  ;;  %v344_v21 = vrot.slane %v335_v19, 4 }
  0x94   : > { %v339_v23 = vadd.f32 %v338_v20, %v334_v18  ;;  %v345_v24 = vadd.f32 %v344_v21, %v335_v19 }
  0x96   : > { %v340_v25 = vrot.slane %v339_v23, 2  ;;  %v346_v26 = vrot.slane %v345_v24, 2 }
  0x98   : > { %v341_v28 = vadd.f32 %v340_v25, %v339_v23  ;;  %v347_v29 = vadd.f32 %v346_v26, %v345_v24 }
  0x9a   : > { %v342_v30 = vrot.slane %v341_v28, 1  ;;  %v348_v31 = vrot.slane %v347_v29, 1 }
  0x9c   : > { %v343_v33 = vadd.f32 %v342_v30, %v341_v28  ;;  %v349_v34 = vadd.f32 %v348_v31, %v347_v29 }
  0x9e   : > { %v357_v35 = vmul.f32 %v356_v32, %v343_v33  ;;  %v358_v36 = vmul.f32 %v356_v32, %v349_v34 }
  0xa0   : > { %v359_v37 = vsub.f32 %v334_v18, %v357_v35  ;;  %v360_v38 = vsub.f32 %v335_v19, %v358_v36 }
  0xa2   : > { %v361_v39 = vmul.f32 %v359_v37, %v359_v37  ;;  %v362_v40 = vmul.f32 %v360_v38, %v360_v38 }
  0xa4   : > { %v363_v41 = vrot.slane %v361_v39, 4  ;;  %v369_v42 = vrot.slane %v362_v40, 4 }
  0xa6   : > { %v364_v43 = vadd.f32 %v363_v41, %v361_v39  ;;  %v370_v44 = vadd.f32 %v369_v42, %v362_v40 }
  0xa8   : > { %v365_v45 = vrot.slane %v364_v43, 2  ;;  %v371_v46 = vrot.slane %v370_v44, 2 }
  0xaa   : > { %v366_v47 = vadd.f32 %v365_v45, %v364_v43  ;;  %v372_v48 = vadd.f32 %v371_v46, %v370_v44 }
  0xac   : > { %v367_v49 = vrot.slane %v366_v47, 1  ;;  %v373_v50 = vrot.slane %v372_v48, 1 }
  0xae   : > { %v368_v51 = vadd.f32 %v367_v49, %v366_v47  ;;  %v374_v52 = vadd.f32 %v373_v50, %v372_v48 }
  0xb0   : > { %v375_v53 = vmul.f32 %v368_v51, %v356_v32  ;;  %v376_v54 = vmul.f32 %v374_v52, %v356_v32 }
  0xb2   : > { %v377_v55 = vadd.f32 1e-05, %v375_v53  ;;  %v378_v56 = vadd.f32 1e-05, %v376_v54 }
  0xb4   : > { %514 = vrsqrt.f32 %v377_v55  ;;  %vm385_vm4 = vweird.f32 %v377_v55  ;;  %vm395_vm6 = vweird.f32 %v378_v56 }
  0xb5   : > { %516 = vrsqrt.f32 %v378_v56 }
  0xba   : > { %v515_v57 = vpop.eup %514 }
  0xbb   : > { %v517_v58 = vpop.eup %516  ;;  %v380_v59 = vmul.f32 %v515_v57, %v377_v55  ;;  %vm386_vm2 = vweird.f32 %v515_v57 }
  0xbc   : > { %v390_v60 = vmul.f32 %v517_v58, %v378_v56  ;;  %vm396_vm3 = vweird.f32 %v517_v58  ;;  %vm387_vm5 = vmor %vm385_vm4, %vm386_vm2 }
  0xbd   : > { %v381_v61 = vmul.f32 %v515_v57, %v380_v59  ;;  %vm397_vm7 = vmor %vm395_vm6, %vm396_vm3 }
  0xbe   : > { %v391_v62 = vmul.f32 %v517_v58, %v390_v60 }
  0xbf   : > { %v382_v63 = vmul.f32 0.5, %v381_v61 }
  0xc0   : > { %v392_v0 = vmul.f32 0.5, %v391_v62 }
  0xc1   : > { %v383_v1 = vsub.f32 1.5, %v382_v63 }
  0xc2   : > { %v393_v2 = vsub.f32 1.5, %v392_v0 }
  0xc3   : > { %v384_v3 = vmul.f32 %v515_v57, %v383_v1 }
  0xc4   : > { %v394_v4 = vmul.f32 %v517_v58, %v393_v2 }
  0xc5   : > { %v388_v5 = vsel %vm387_vm5, %v515_v57, %v384_v3 }
  0xc6   : > { %v398_v6 = vsel %vm397_vm7, %v517_v58, %v394_v4  ;;  %v399_v7 = vmul.f32 %v388_v5, %v359_v37 }
  0xc7   : > { %v400_v9 = vmul.f32 %v398_v6, %v360_v38 }
  0xc8   : > { %v406_v11 = vmul.f32 %v404_v8, %v399_v7 }
  0xc9   : > { %v407_v12 = vmul.f32 %v404_v8, %v400_v9 }
  0xca   : > { %v413_v13 = vadd.f32 %v411_v10, %v406_v11 }
  0xcb   : > { %v414_v14 = vadd.f32 %v411_v10, %v407_v12 }
  0xcc   : > { %415 = vst [vmem:[%s275_s17] sm:$0xff] %v413_v13 }
  0xcd   : > { %416 = vst [vmem:[%s275_s17 + $0x8] sm:$0xff] %v414_v14 }
  0xce PF: > { %s16_s21 = sadd.s32 1, %s524_s21  }
  0xcf   : > { %p13_p4 = scmp.ge.s32.totalorder %s16_s21, 4  }
  0xd1   :  { %15 = sbr.rel (!%p13_p4) target bundleno = 1 (0x1), region = 77 }

// kernel: squeeze.1
= control target key start
LH: loop header
LB: loop body
LE: loop exit
PB: predicated region body
PF: predicated region fallthrough
CT: control target
= control target key end

     0   :  { %s130_s0 = inlined_call_operand.vmem [shape: f32[512], index: 0, kind: input, shape index: {}]   ;;  %s131_s1 = inlined_call_operand.hbm [shape: f32[2,16,16], index: 1, kind: output, shape index: {}]  }
   0x1   :  { %v5_v0 = vld [vmem:[%s130_s0] sm:$0xf] }
   0x2   :  { %6 = vst [vmem:[#allocation2] sm:$0xf] %v5_v0 }
   0x3   :  { %2 = vsyncpa [#allocation1], 0  ;;  %s98_s0 = smov 112   ;;  %s99_s8 = smov 80   ;;  %vm8_vm0 = vcmask 130048  }
   0x4   :  { %s100_s9 = smov 48   ;;  %s101_s10 = smov 96  }
   0x5   :  { %s102_s11 = smov 64   ;;  %s103_s12 = smov 32  }
   0x6   :  { %s104_s13 = smov 16   ;;  %s105_s14 = smov [#allocation0]  }
   0x7   :  { %s55_s15 = sshll.u32 %s105_s14, 4  ;;  %s57_s1 = sshll.u32 %s131_s1, 4  ;;  %s56_s15 = int_to_ptr.vmem [resolvable:$true] %s55_s15  ;;  %s58_s1 = int_to_ptr.hbm [resolvable:$true] %s57_s1 }
   0x9   :  { %v10_v1 = vld [vmem:[#allocation2] sm:$0xf]  }
   0xa   :  { %v22_v2 = vld [vmem:[#allocation2] sm:$0xf]   ;;  %11 = vrot.lane.b32.xlu0 %v10_v1, %s98_s0 }
   0xb   :  { %23 = vrot.lane.b32.xlu1 %v22_v2, %s99_s8  ;;  %v34_v3 = vld [vmem:[#allocation2] sm:$0xf]  }
   0xc   :  { %35 = vrot.lane.b32.xlu2 %v34_v3, %s100_s9  ;;  %v16_v4 = vld [vmem:[#allocation2] sm:$0xf]  }
   0xd   :  { %v28_v5 = vld [vmem:[#allocation2] sm:$0xf]  }
   0xe   :  { %v40_v6 = vld [vmem:[#allocation2] sm:$0xf]  }
   0xf   :  { %v46_v7 = vld [vmem:[#allocation2] sm:$0xf]  }
  0x10   :  { %v7_v9 = vld [vmem:[#allocation2] sm:$0xf]  }
  0x11   :  { %9 = vst.msk [vmem:[#allocation0] ss:$8 sm:$0xf] %vm8_vm0, %v7_v9  }
  0x12   :  { %17 = vrot.lane.b32.xlu0 %v16_v4, %s101_s10 }
  0x13   :  { %29 = vrot.lane.b32.xlu1 %v28_v5, %s102_s11 }
  0x14   :  { %41 = vrot.lane.b32.xlu2 %v40_v6, %s103_s12 }
  0x1a   :  { %47 = vrot.lane.b32.xlu0 %v46_v7, %s104_s13 }
  0x66   :  { %v36_v8 = vpop.permute.xlu2 %35  }
  0x67   :  { %39 = vst.msk [vmem:[#allocation0 + $0x5] ss:$8 sm:$0xf] %vm8_vm0, %v36_v8  }
  0x6e   :  { %v42_v10 = vpop.permute.xlu2 %41  }
  0x6f   :  { %45 = vst.msk [vmem:[#allocation0 + $0x6] ss:$8 sm:$0xf] %vm8_vm0, %v42_v10  }
  0x7c   :  { %v12_v11 = vpop.permute.xlu0 %11  }
  0x7d   :  { %v24_v12 = vpop.permute.xlu1 %23   ;;  %15 = vst.msk [vmem:[#allocation0 + $0x1] ss:$8 sm:$0xf] %vm8_vm0, %v12_v11  }
  0x7e   :  { %27 = vst.msk [vmem:[#allocation0 + $0x3] ss:$8 sm:$0xf] %vm8_vm0, %v24_v12  }
  0x84   :  { %v18_v13 = vpop.permute.xlu0 %17  }
  0x85   :  { %v30_v14 = vpop.permute.xlu1 %29   ;;  %21 = vst.msk [vmem:[#allocation0 + $0x2] ss:$8 sm:$0xf] %vm8_vm0, %v18_v13  }
  0x86   :  { %33 = vst.msk [vmem:[#allocation0 + $0x4] ss:$8 sm:$0xf] %vm8_vm0, %v30_v14  }
  0x8c   :  { %v48_v15 = vpop.permute.xlu0 %47  }
  0x8d   :  { %51 = vst.msk [vmem:[#allocation0 + $0x7] ss:$8 sm:$0xf] %vm8_vm0, %v48_v15  }
  0x8e   :  { %60 = dma.vmem_to_hbm [thread:$0]  %s56_s15, 512, %s58_s1, [#allocation1]  }
  0x8f   :  { %96 = dma.done.wait [#allocation1], 512  }
  0x90   :  { %97 = vsyncadd [#allocation1], 4294966784 }
  0x91   :  { %63 = vsyncpa [#allocation1], 1 }

// kernel: fno2d_forward.11
= control target key start
LH: loop header
LB: loop body
LE: loop exit
PB: predicated region body
PF: predicated region fallthrough
CT: control target
= control target key end

     0   :  { %s3201_s26 = smov 0   ;;  %s5316_s0 = inlined_call_operand.vmem [shape: f32[8,512], index: 0, kind: input, shape index: {}]   ;;  %s5317_s1 = inlined_call_operand.vmem [shape: f32[128,8], index: 1, kind: input, shape index: {}]   ;;  %s5318_s2 = inlined_call_operand.vmem [shape: f32[128,1], index: 2, kind: input, shape index: {}]   ;;  %s5319_s3 = inlined_call_operand.vmem [shape: f32[64,128], index: 3, kind: input, shape index: {}]   ;;  %s5320_s4 = inlined_call_operand.vmem [shape: f32[64,1], index: 4, kind: input, shape index: {}]   ;;  %s5321_s5 = inlined_call_operand.vmem [shape: f32[1,64], index: 5, kind: input, shape index: {}]   ;;  %s5322_s6 = inlined_call_operand.<no memory space> [shape: f32[1,1], index: 6, kind: input, shape index: {}]   ;;  %s5323_s7 = inlined_call_operand.vmem [shape: f32[1,512], index: 7, kind: output, shape index: {}]  }
   0x1   :  { %v12_v0 = vstv %s5322_s6 }
   0x2   :  { %13 = vst [vmem:[#allocation2] sm:$0x1] %v12_v0 }
   0x3 LB: > { %s2945_s27 = sadd.s32 4294967295, %s3154_s26   ;;  %p2949_p0 = scmp.ge.s32.totalorder %s3154_s26, 1  ;;  %s3154_s26 = sphi %s3201_s26, %s19_s26  }
   0x4   : > { %p240_p1 = scmp.lt.s32.totalorder %s3154_s26, 3 }
   0x6   : > { %p241_p2 = pnand %p2949_p0, %p240_p1 }
   0x8   : > { %244 = sbr.rel (%p241_p2) target bundleno = 1018 (0x3fa), region = 48 }
   0xd   : > { %v315_v1 = vld [vmem:[%s5318_s2 + $0x78] sm:$0xff]  ;;  %v313_v2 = vld [vmem:[%s5318_s2 + $0x68] sm:$0xff]  ;;  %s2950_s8 = sshll.u32 %s2945_s27, 1  ;;  %v3156_v3 = vmov 0   ;;  %v282_v5 = vld [vmem:[%s5317_s1] sm:$0xff]  ;;  %vm396_vm0 = vcmask 64512  }
   0xe   : > { %3047 = vset.pattern.permute.xlu0 %v3156_v3  ;;  %3048 = vset.pattern.permute.xlu1 %v3156_v3  ;;  %p272_p3 = scmp.lt.s32.totalorder %s2950_s8, 3  ;;  %v311_v4 = vld [vmem:[%s5318_s2 + $0x58] sm:$0xff]  ;;  %v314_v6 = vld [vmem:[%s5318_s2 + $0x70] sm:$0xff]  ;;  %v312_v9 = vld [vmem:[%s5318_s2 + $0x60] sm:$0xff]  ;;  %v3157_v45 = vmov 1.4142135  }
   0xf   : > { %393 = vperm.xlu0 %3047, %v315_v1   ;;  %383 = vperm.xlu1 %3048, %v313_v2   ;;  %v310_v10 = vld [vmem:[%s5318_s2 + $0x50] sm:$0xff]  ;;  %v283_v11 = vld [vmem:[%s5317_s1 + $0x8] sm:$0xff]  ;;  %v308_v13 = vld [vmem:[%s5318_s2 + $0x40] sm:$0xff]  ;;  %3050 = vrcp.f32 %v3157_v45 }
  0x10   : > { %s5629_s8 = smov (!%p272_p3, %s2950_s8), 3  ;;  %3049 = vset.pattern.permute.xlu2 %v3156_v3  ;;  %v309_v12 = vld [vmem:[%s5318_s2 + $0x48] sm:$0xff]  ;;  %v307_v14 = vld [vmem:[%s5318_s2 + $0x38] sm:$0xff]  ;;  %v284_v15 = vld [vmem:[%s5317_s1 + $0x10] sm:$0xff] }
  0x11   : > { %373 = vperm.xlu2 %3049, %v311_v4   ;;  %s2951_s11 = sshll.u32 %s5629_s8, 3  ;;  %v306_v16 = vld [vmem:[%s5318_s2 + $0x30] sm:$0xff]  ;;  %v305_v17 = vld [vmem:[%s5318_s2 + $0x28] sm:$0xff]  ;;  %v304_v18 = vld [vmem:[%s5318_s2 + $0x20] sm:$0xff]  ;;  %s280_s21 = scalar_lea.vmem %s5323_s7, %s5629_s8 }
  0x12   : > { %s275_s14 = scalar_lea.vmem %s5316_s0, %s2951_s11  ;;  %v285_v19 = vld [vmem:[%s5317_s1 + $0x18] sm:$0xff]  ;;  %v302_v21 = vld [vmem:[%s5318_s2 + $0x10] sm:$0xff]  ;;  %v301_v22 = vld [vmem:[%s5318_s2 + $0x8] sm:$0xff] }
  0x13   : > { %v298_v7 = vld [vmem:[%s275_s14] sm:$0xff]  ;;  %v299_v8 = vld [vmem:[%s275_s14 + $0x8] sm:$0xff]  ;;  %v303_v20 = vld [vmem:[%s5318_s2 + $0x18] sm:$0xff] }
  0x14   : > { %460 = vmatpush.msra.mxu0 %v298_v7  ;;  %525 = vmatpush.msra.mxu1 %v299_v8  ;;  %v286_v23 = vld [vmem:[%s5317_s1 + $0x20] sm:$0xff]  ;;  %v287_v25 = vld [vmem:[%s5317_s1 + $0x28] sm:$0xff]  ;;  %v288_v26 = vld [vmem:[%s5317_s1 + $0x30] sm:$0xff] }
  0x15   : > { %2953 = vmatmul.msk.f32.vlgmr.msra.gmra.mxu0 %vm396_vm0, %v282_v5  ;;  %2969 = vmatmul.msk.f32.vlgmr.msra.gmra.mxu1 %vm396_vm0, %v282_v5  ;;  %v300_v24 = vld [vmem:[%s5318_s2] sm:$0xff]  ;;  %v289_v27 = vld [vmem:[%s5317_s1 + $0x38] sm:$0xff]  ;;  %v291_v29 = vld [vmem:[%s5317_s1 + $0x48] sm:$0xff]  ;;  %v3051_v49 = vpop.eup %3050 }
  0x16   : > { %v290_v28 = vld [vmem:[%s5317_s1 + $0x40] sm:$0xff]  ;;  %v2003_v30 = vld [vmem:[%s5320_s4 + $0x28] sm:$0xff]  ;;  %v2005_v31 = vld [vmem:[%s5320_s4 + $0x38] sm:$0xff]  ;;  %v608_v53 = vmul.f32 1.4142135, %v3051_v49  ;;  %vm612_vm1 = vweird.f32 %v3051_v49 }
  0x17   : > { %388 = vperm.xlu0 %3047, %v314_v6   ;;  %378 = vperm.xlu1 %3048, %v312_v9   ;;  %v292_v32 = vld [vmem:[%s5317_s1 + $0x50] sm:$0xff]  ;;  %v2002_v34 = vld [vmem:[%s5320_s4 + $0x20] sm:$0xff]  ;;  %v293_v35 = vld [vmem:[%s5317_s1 + $0x58] sm:$0xff] }
  0x18   : > { %v2000_v33 = vld [vmem:[%s5320_s4 + $0x10] sm:$0xff]  ;;  %v2833_v36 = vld [vmem:[#allocation2] sm:$0x1]  ;;  %v1999_v38 = vld [vmem:[%s5320_s4 + $0x8] sm:$0xff]  ;;  %v609_v55 = vsub.f32 1.0, %v608_v53 }
  0x19   : > { %368 = vperm.xlu2 %3049, %v310_v10   ;;  %v294_v39 = vld [vmem:[%s5317_s1 + $0x60] sm:$0xff]  ;;  %v295_v41 = vld [vmem:[%s5317_s1 + $0x68] sm:$0xff]  ;;  %v2004_v42 = vld [vmem:[%s5320_s4 + $0x30] sm:$0xff] }
  0x1a   : > { %v296_v46 = vld [vmem:[%s5317_s1 + $0x70] sm:$0xff]  ;;  %v2001_v48 = vld [vmem:[%s5320_s4 + $0x18] sm:$0xff]  ;;  %v1998_v58 = vld [vmem:[%s5320_s4] sm:$0xff]  ;;  %v610_v61 = vmul.f32 %v3051_v49, %v609_v55 }
  0x1b   : > { %v297_v52 = vld [vmem:[%s5317_s1 + $0x78] sm:$0xff] }
  0x1c   : > { %v611_v62 = vadd.f32 %v3051_v49, %v610_v61 }
  0x1d   : > { %2954 = vmatmul.msk.f32.gmra.mxu0 %vm396_vm0, %v283_v11  ;;  %2970 = vmatmul.msk.f32.gmra.mxu1 %vm396_vm0, %v283_v11 }
  0x1e   : > { %v3391_v3 = vsel %vm612_vm1, %v3051_v49, %v611_v62 }
  0x1f   : > { %363 = vperm.xlu0 %3047, %v309_v12   ;;  %358 = vperm.xlu1 %3048, %v308_v13   ;;  %5390 = vst [vmem:[#allocation3_spill] sm:$0xff] %v3391_v3 }
  0x21   : > { %353 = vperm.xlu2 %3049, %v307_v14  }
  0x25   : > { %2955 = vmatmul.msk.f32.gmra.mxu0 %vm396_vm0, %v284_v15  ;;  %2971 = vmatmul.msk.f32.gmra.mxu1 %vm396_vm0, %v284_v15 }
  0x27   : > { %348 = vperm.xlu0 %3047, %v306_v16   ;;  %343 = vperm.xlu1 %3048, %v305_v17  }
  0x29   : > { %338 = vperm.xlu2 %3049, %v304_v18  }
  0x2d   : > { %2956 = vmatmul.msk.f32.gmra.mxu0 %vm396_vm0, %v285_v19  ;;  %2972 = vmatmul.msk.f32.gmra.mxu1 %vm396_vm0, %v285_v19 }
  0x2f   : > { %333 = vperm.xlu0 %3047, %v303_v20   ;;  %328 = vperm.xlu1 %3048, %v302_v21  }
  0x31   : > { %323 = vperm.xlu2 %3049, %v301_v22  }
  0x35   : > { %2957 = vmatmul.msk.f32.gmra.mxu0 %vm396_vm0, %v286_v23  ;;  %2973 = vmatmul.msk.f32.gmra.mxu1 %vm396_vm0, %v286_v23 }
  0x37   : > { %318 = vperm.xlu0 %3047, %v300_v24   ;;  %2043 = vperm.xlu1 %3048, %v2005_v31  }
  0x39   : > { %2038 = vperm.xlu2 %3049, %v2004_v42  }
  0x3d   : > { %2958 = vmatmul.msk.f32.gmra.mxu0 %vm396_vm0, %v287_v25  ;;  %2974 = vmatmul.msk.f32.gmra.mxu1 %vm396_vm0, %v287_v25 }
  0x3f   : > { %2033 = vperm.xlu0 %3047, %v2003_v30   ;;  %2028 = vperm.xlu1 %3048, %v2002_v34  }
  0x41   : > { %2023 = vperm.xlu2 %3049, %v2001_v48  }
  0x45   : > { %2959 = vmatmul.msk.f32.gmra.mxu0 %vm396_vm0, %v288_v26  ;;  %2975 = vmatmul.msk.f32.gmra.mxu1 %vm396_vm0, %v288_v26 }
  0x47   : > { %2018 = vperm.xlu0 %3047, %v2000_v33   ;;  %2013 = vperm.xlu1 %3048, %v1999_v38  }
  0x49   : > { %2008 = vperm.xlu2 %3049, %v1998_v58  }
  0x4d   : > { %2960 = vmatmul.msk.f32.gmra.mxu0 %vm396_vm0, %v289_v27  ;;  %2976 = vmatmul.msk.f32.gmra.mxu1 %vm396_vm0, %v289_v27 }
  0x4f   : > { %2836 = vperm.xlu0 %3047, %v2833_v36  }
  0x55   : > { %2961 = vmatmul.msk.f32.gmra.mxu0 %vm396_vm0, %v290_v28  ;;  %2977 = vmatmul.msk.f32.gmra.mxu1 %vm396_vm0, %v290_v28 }
  0x5d   : > { %2962 = vmatmul.msk.f32.gmra.mxu0 %vm396_vm0, %v291_v29  ;;  %2978 = vmatmul.msk.f32.gmra.mxu1 %vm396_vm0, %v291_v29 }
  0x65   : > { %2963 = vmatmul.msk.f32.gmra.mxu0 %vm396_vm0, %v292_v32  ;;  %2979 = vmatmul.msk.f32.gmra.mxu1 %vm396_vm0, %v292_v32 }
  0x6b   : > { %v3335_v37 = vpop.permute.xlu2 %373 }
  0x6d   : > { %2964 = vmatmul.msk.f32.gmra.mxu0 %vm396_vm0, %v293_v35  ;;  %2980 = vmatmul.msk.f32.gmra.mxu1 %vm396_vm0, %v293_v35 }
  0x73   : > { %v3345_v40 = vpop.permute.xlu2 %368 }
  0x75   : > { %2965 = vmatmul.msk.f32.gmra.mxu0 %vm396_vm0, %v294_v39  ;;  %2981 = vmatmul.msk.f32.gmra.mxu1 %vm396_vm0, %v294_v39 }
  0x7b   : > { %v3362_v47 = vpop.permute.xlu2 %353 }
  0x7d   : > { %2966 = vmatmul.msk.f32.gmra.mxu0 %vm396_vm0, %v295_v41  ;;  %2982 = vmatmul.msk.f32.gmra.mxu1 %vm396_vm0, %v295_v41 }
  0x81   : > { %v3355_v43 = vpop.permute.xlu0 %393  ;;  %v3357_v44 = vpop.permute.xlu1 %383 }
  0x83   : > { %v3378_v54 = vpop.permute.xlu2 %338 }
  0x85   : > { %2967 = vmatmul.msk.f32.gmra.mxu0 %vm396_vm0, %v296_v46  ;;  %2983 = vmatmul.msk.f32.gmra.mxu1 %vm396_vm0, %v296_v46 }
  0x89   : > { %v3369_v50 = vpop.permute.xlu0 %388  ;;  %v3371_v51 = vpop.permute.xlu1 %378 }
  0x8b   : > { %v324_v63 = vpop.permute.xlu2 %323 }
  0x8d   : > { %2968 = vmatmul.msk.f32.gmra.mxu0 %vm396_vm0, %v297_v52  ;;  %2984 = vmatmul.msk.f32.gmra.mxu1 %vm396_vm0, %v297_v52 }
  0x91   : > { %v3380_v56 = vpop.permute.xlu0 %363  ;;  %v3382_v57 = vpop.permute.xlu1 %358 }
  0x92   : > { %v462_v59 = vpop.f32.mrf.mxu0  ;;  %v527_v60 = vpop.f32.mrf.mxu1 }
  0x99   : > { %v3387_v0 = vpop.permute.xlu0 %348  ;;  %v3389_v1 = vpop.permute.xlu1 %343 }
  0x9a   : > { %v465_v2 = vpop.f32.mrf.mxu0  ;;  %v530_v4 = vpop.f32.mrf.mxu1 }
  0x9b   : > { %v3393_v5 = vadd.f32 %v465_v2, %v324_v63  ;;  %v3395_v6 = vadd.f32 %v530_v4, %v324_v63 }
  0x9d   : > { %5391 = vst [vmem:[#allocation4_spill] sm:$0xff] %v3393_v5  ;;  %v3399_v7 = vmul.f32 %v3391_v3, %v3393_v5  ;;  %v3403_v8 = vmul.f32 %v3391_v3, %v3395_v6 }
  0x9e   : > { %5392 = vst [vmem:[#allocation5_spill] sm:$0xff] %v3395_v6 }
  0x9f   : > { %5393 = vst [vmem:[#allocation6_spill] sm:$0xff] %v3399_v7  ;;  %v726_v9 = vmul.f32 %v3399_v7, %v3399_v7  ;;  %v766_v10 = vmul.f32 %v3403_v8, %v3403_v8 }
  0xa0   : > { %5394 = vst [vmem:[#allocation7_spill] sm:$0xff] %v3403_v8 }
  0xa1   : > { %v329_v11 = vpop.permute.xlu1 %328  ;;  %v3409_v12 = vmin.f32 %v726_v9, 16.0  ;;  %v3411_v13 = vmin.f32 %v766_v10, 16.0  ;;  %v334_v14 = vpop.permute.xlu0 %333 }
  0xa2   : > { %v468_v15 = vpop.f32.mrf.mxu0  ;;  %v533_v16 = vpop.f32.mrf.mxu1 }
  0xa3   : > { %5395 = vst [vmem:[#allocation8_spill] sm:$0xff] %v3409_v12  ;;  %v728_v17 = vmul.f32 2.1237322e-06, %v3409_v12  ;;  %v768_v18 = vmul.f32 2.1237322e-06, %v3411_v13  ;;  %v3415_v19 = vadd.f32 %v468_v15, %v329_v11  ;;  %v3417_v20 = vadd.f32 %v533_v16, %v329_v11 }
  0xa4   : > { %5396 = vst [vmem:[#allocation9_spill] sm:$0xff] %v3411_v13 }
  0xa5   : > { %v729_v21 = vadd.f32 0.00028619796, %v728_v17  ;;  %v3421_v22 = vmul.f32 %v3391_v3, %v3415_v19  ;;  %v769_v23 = vadd.f32 0.00028619796, %v768_v18  ;;  %v3427_v25 = vmul.f32 %v3391_v3, %v3417_v20 }
  0xa7   : > { %5397 = vst [vmem:[#allocation10_spill] sm:$0xff] %v3421_v22  ;;  %v806_v24 = vmul.f32 %v3421_v22, %v3421_v22  ;;  %v730_v26 = vmul.f32 %v729_v21, %v3409_v12  ;;  %v770_v27 = vmul.f32 %v769_v23, %v3411_v13  ;;  %v846_v32 = vmul.f32 %v3427_v25, %v3427_v25 }
  0xa8   : > { %5398 = vst [vmem:[#allocation11_spill] sm:$0xff] %v3427_v25 }
  0xa9   : > { %v319_v30 = vpop.permute.xlu0 %318  ;;  %v3431_v31 = vmin.f32 %v806_v24, 16.0  ;;  %v731_v34 = vadd.f32 0.0036580483, %v730_v26  ;;  %v771_v36 = vadd.f32 0.0036580483, %v770_v27  ;;  %v3448_v45 = vmin.f32 %v846_v32, 16.0 }
  0xaa   : > { %v471_v28 = vpop.f32.mrf.mxu0  ;;  %v536_v29 = vpop.f32.mrf.mxu1  ;;  %v3439_v38 = vadd.f32 %v462_v59, %v319_v30  ;;  %v3441_v39 = vadd.f32 %v527_v60, %v319_v30 }
  0xab   : > { %5399 = vst [vmem:[#allocation12_spill] sm:$0xff] %v3431_v31  ;;  %v3435_v33 = vadd.f32 %v471_v28, %v334_v14  ;;  %v3437_v35 = vadd.f32 %v536_v29, %v334_v14  ;;  %v808_v42 = vmul.f32 2.1237322e-06, %v3431_v31  ;;  %v732_v48 = vmul.f32 %v731_v34, %v3409_v12 }
  0xac   : > { %5400 = vst [vmem:[#allocation13_spill] sm:$0xff] %v3439_v38  ;;  %v772_v52 = vmul.f32 %v771_v36, %v3411_v13  ;;  %v3460_v53 = vmul.f32 %v3391_v3, %v3439_v38  ;;  %v3464_v55 = vmul.f32 %v3391_v3, %v3441_v39  ;;  %v848_v62 = vmul.f32 2.1237322e-06, %v3448_v45 }
  0xad   : > { %5401 = vst [vmem:[#allocation14_spill] sm:$0xff] %v3441_v39  ;;  %v3445_v41 = vmul.f32 %v3391_v3, %v3435_v33  ;;  %v3455_v49 = vmul.f32 %v3391_v3, %v3437_v35  ;;  %v809_v61 = vadd.f32 0.00028619796, %v808_v42  ;;  %v733_v2 = vadd.f32 0.05243302, %v732_v48 }
  0xae   : > { %5403 = vst [vmem:[#allocation16_spill] sm:$0xff] %v3448_v45  ;;  %v773_v9 = vadd.f32 0.05243302, %v772_v52  ;;  %v646_v10 = vmul.f32 %v3460_v53, %v3460_v53  ;;  %v686_v11 = vmul.f32 %v3464_v55, %v3464_v55  ;;  %v849_v17 = vadd.f32 0.00028619796, %v848_v62 }
  0xaf   : > { %5402 = vst [vmem:[#allocation15_spill] sm:$0xff] %v3445_v41  ;;  %v886_v46 = vmul.f32 %v3445_v41, %v3445_v41  ;;  %v926_v63 = vmul.f32 %v3455_v49, %v3455_v49  ;;  %v810_v16 = vmul.f32 %v809_v61, %v3431_v31  ;;  %v734_v18 = vmul.f32 %v733_v2, %v3409_v12 }
  0xb0   : > { %5404 = vst [vmem:[#allocation17_spill] sm:$0xff] %v3455_v49  ;;  %v774_v23 = vmul.f32 %v773_v9, %v3411_v13  ;;  %v3488_v24 = vmin.f32 %v646_v10, 16.0  ;;  %v3490_v26 = vmin.f32 %v686_v11, 16.0  ;;  %v850_v42 = vmul.f32 %v849_v17, %v3448_v45 }
  0xb1   : > { %5405 = vst [vmem:[#allocation18_spill] sm:$0xff] %v3460_v53  ;;  %v3466_v60 = vmin.f32 %v886_v46, 16.0  ;;  %v3479_v15 = vmin.f32 %v926_v63, 16.0  ;;  %v811_v36 = vadd.f32 0.0036580483, %v810_v16  ;;  %v3514_v10 = vmul.f32 0.5, %v3417_v20 }
  0xb2   : > { %5406 = vst [vmem:[#allocation19_spill] sm:$0xff] %v3464_v55  ;;  %v474_v58 = vpop.f32.mrf.mxu0  ;;  %v539_v59 = vpop.f32.mrf.mxu1  ;;  %v735_v46 = vadd.f32 0.18741608, %v734_v18  ;;  %v775_v52 = vadd.f32 0.18741608, %v774_v23 }
  0xb3   : > { %5407 = vst [vmem:[#allocation20_spill] sm:$0xff] %v3466_v60  ;;  %v3472_v4 = vadd.f32 %v474_v58, %v3378_v54  ;;  %v888_v14 = vmul.f32 2.1237322e-06, %v3466_v60  ;;  %v928_v30 = vmul.f32 2.1237322e-06, %v3479_v15  ;;  %v3496_v34 = vadd.f32 %v539_v59, %v3378_v54 }
  0xb4   : > { %5408 = vst [vmem:[#allocation21_spill] sm:$0xff] %v3479_v15  ;;  %v648_v58 = vmul.f32 2.1237322e-06, %v3488_v24  ;;  %v688_v61 = vmul.f32 2.1237322e-06, %v3490_v26  ;;  %v3510_v59 = vmul.f32 0.5, %v3415_v19  ;;  %v812_v9 = vmul.f32 %v811_v36, %v3431_v31 }
  0xb5   : > { %v3485_v21 = vmul.f32 %v3391_v3, %v3472_v4  ;;  %5409 = vst [vmem:[#allocation22_spill] sm:$0xff] %v3488_v24  ;;  %v889_v27 = vadd.f32 0.00028619796, %v888_v14  ;;  %v929_v63 = vadd.f32 0.00028619796, %v928_v30  ;;  %v3507_v54 = vmul.f32 %v3391_v3, %v3496_v34 }
  0xb6   : > { %5410 = vst [vmem:[#allocation23_spill] sm:$0xff] %v3490_v26  ;;  %v851_v11 = vadd.f32 0.0036580483, %v850_v42  ;;  %v736_v14 = vmul.f32 %v735_v46, %v3409_v12  ;;  %v776_v23 = vmul.f32 %v775_v52, %v3411_v13  ;;  %v689_v19 = vadd.f32 0.00028619796, %v688_v61 }
  0xb7   : > { %v966_v32 = vmul.f32 %v3485_v21, %v3485_v21  ;;  %5411 = vst [vmem:[#allocation24_spill] sm:$0xff] %v3496_v34  ;;  %v890_v62 = vmul.f32 %v889_v27, %v3466_v60  ;;  %v1006_v17 = vmul.f32 %v3507_v54, %v3507_v54  ;;  %v649_v27 = vadd.f32 0.00028619796, %v648_v58 }
  0xb8   : > { %5413 = vst [vmem:[#allocation26_spill] sm:$0xff] %v3507_v54  ;;  %v930_v20 = vmul.f32 %v929_v63, %v3479_v15  ;;  %v3534_v52 = vmul.f32 0.5, %v3437_v35  ;;  %v3540_v61 = vadd.f32 1.1283791, %v736_v14  ;;  %v3588_v8 = vmul.f32 0.5, %v3472_v4 }
  0xb9   : > { %v3499_v48 = vmin.f32 %v966_v32, 16.0  ;;  %5414 = vst [vmem:[#allocation27_spill] sm:$0xff] %v3510_v59  ;;  %v891_v30 = vadd.f32 0.0036580483, %v890_v62  ;;  %v3525_v39 = vmin.f32 %v1006_v17, 16.0  ;;  %v852_v62 = vmul.f32 %v851_v11, %v3448_v45 }
  0xba   : > { %v477_v28 = vpop.f32.mrf.mxu0  ;;  %v542_v29 = vpop.f32.mrf.mxu1  ;;  %5415 = vst [vmem:[#allocation28_spill] sm:$0xff] %v3514_v10  ;;  %v931_v17 = vadd.f32 0.0036580483, %v930_v20 }
  0xbb   : > { %5412 = vst [vmem:[#allocation25_spill] sm:$0xff] %v3499_v48  ;;  %v968_v2 = vmul.f32 2.1237322e-06, %v3499_v48  ;;  %v3520_v18 = vadd.f32 %v477_v28, %v3389_v1  ;;  %v3528_v46 = vadd.f32 %v542_v29, %v3389_v1  ;;  %v3531_v28 = vmul.f32 0.5, %v3435_v33 }
  0xbc   : > { %5416 = vst [vmem:[#allocation29_spill] sm:$0xff] %v3525_v39  ;;  %v3544_v1 = vadd.f32 1.1283791, %v776_v23  ;;  %v650_v29 = vmul.f32 %v649_v27, %v3488_v24  ;;  %v690_v33 = vmul.f32 %v689_v19, %v3490_v26  ;;  %v853_v19 = vadd.f32 0.05243302, %v852_v62 }
  0xbd   : > { %v969_v16 = vadd.f32 0.00028619796, %v968_v2  ;;  %v813_v2 = vadd.f32 0.05243302, %v812_v9  ;;  %5417 = vst [vmem:[#allocation30_spill] sm:$0xff] %v3531_v28  ;;  %v3538_v58 = vmul.f32 %v3391_v3, %v3520_v18  ;;  %v892_v9 = vmul.f32 %v891_v30, %v3466_v60 }
  0xbe   : > { %5418 = vst [vmem:[#allocation31_spill] sm:$0xff] %v3534_v52  ;;  %v3553_v14 = vmul.f32 %v3391_v3, %v3528_v46  ;;  %v3570_v53 = vadd.f32 0.0036580483, %v690_v33 }
  0xbf   : > { %v970_v42 = vmul.f32 %v969_v16, %v3499_v48  ;;  %5419 = vst [vmem:[#allocation32_spill] sm:$0xff] %v3540_v61  ;;  %v1008_v16 = vmul.f32 2.1237322e-06, %v3525_v39  ;;  %v1046_v35 = vmul.f32 %v3538_v58, %v3538_v58  ;;  %v814_v11 = vmul.f32 %v813_v2, %v3431_v31 }
  0xc0   : > { %5420 = vst [vmem:[#allocation33_spill] sm:$0xff] %v3544_v1  ;;  %v1086_v20 = vmul.f32 %v3553_v14, %v3553_v14  ;;  %v893_v62 = vadd.f32 0.05243302, %v892_v9  ;;  %v854_v1 = vmul.f32 %v853_v19, %v3448_v45 }
  0xc1   : > { %v971_v63 = vadd.f32 0.0036580483, %v970_v42  ;;  %v1009_v38 = vadd.f32 0.00028619796, %v1008_v16  ;;  %v3556_v42 = vmin.f32 %v1046_v35, 16.0  ;;  %5423 = vst [vmem:[#allocation36_spill] sm:$0xff] %v3570_v53 }
  0xc2   : > { %v480_v32 = vpop.f32.mrf.mxu0  ;;  %v545_v36 = vpop.f32.mrf.mxu1  ;;  %v3568_v16 = vadd.f32 0.0036580483, %v650_v29  ;;  %v815_v6 = vadd.f32 0.18741608, %v814_v11  ;;  %5426 = vst [vmem:[#allocation39_spill] sm:$0xff] %v3588_v8  ;;  %v894_v10 = vmul.f32 %v893_v62, %v3466_v60 }
  0xc3   : > { %5421 = vst [vmem:[#allocation34_spill] sm:$0xff] %v3556_v42  ;;  %v3559_v23 = vadd.f32 %v480_v32, %v3387_v0  ;;  %v3562_v27 = vadd.f32 %v545_v36, %v3387_v0  ;;  %v972_v55 = vmul.f32 %v971_v63, %v3499_v48  ;;  %v1010_v30 = vmul.f32 %v1009_v38, %v3525_v39 }
  0xc4   : > { %5422 = vst [vmem:[#allocation35_spill] sm:$0xff] %v3568_v16  ;;  %v1048_v2 = vmul.f32 2.1237322e-06, %v3556_v42  ;;  %v932_v63 = vmul.f32 %v931_v17, %v3479_v15  ;;  %v3578_v38 = vmin.f32 %v1086_v20, 16.0 }
  0xc5   : > { %v3575_v32 = vmul.f32 %v3391_v3, %v3559_v23  ;;  %v1011_v35 = vadd.f32 0.0036580483, %v1010_v30  ;;  %v3584_v33 = vmul.f32 %v3391_v3, %v3562_v27  ;;  %v973_v9 = vadd.f32 0.05243302, %v972_v55 }
  0xc6   : > { %5424 = vst [vmem:[#allocation37_spill] sm:$0xff] %v3578_v38  ;;  %v1049_v5 = vadd.f32 0.00028619796, %v1048_v2  ;;  %v1088_v17 = vmul.f32 2.1237322e-06, %v3578_v38  ;;  %v3666_v41 = vmul.f32 0.5, %v3559_v23 }
  0xc7   : > { %v1126_v29 = vmul.f32 %v3575_v32, %v3575_v32  ;;  %5425 = vst [vmem:[#allocation38_spill] sm:$0xff] %v3584_v33  ;;  %v1166_v11 = vmul.f32 %v3584_v33, %v3584_v33  ;;  %v933_v61 = vadd.f32 0.05243302, %v932_v63  ;;  %v1012_v19 = vmul.f32 %v1011_v35, %v3525_v39 }
  0xc8   : > { %v1050_v30 = vmul.f32 %v1049_v5, %v3556_v42  ;;  %v1089_v4 = vadd.f32 0.00028619796, %v1088_v17  ;;  %v974_v25 = vmul.f32 %v973_v9, %v3499_v48  ;;  %v3614_v63 = vmul.f32 %v815_v6, %v3431_v31  ;;  %5436 = vst [vmem:[#allocation49_spill] sm:$0xff] %v3666_v41 }
  0xc9   : > { %v3592_v20 = vmin.f32 %v1126_v29, 16.0  ;;  %v3602_v59 = vmin.f32 %v1166_v11, 16.0  ;;  %v855_v29 = vadd.f32 0.18741608, %v854_v1  ;;  %v934_v1 = vmul.f32 %v933_v61, %v3479_v15 }
  0xca   : > { %v483_v0 = vpop.f32.mrf.mxu0  ;;  %v548_v36 = vpop.f32.mrf.mxu1  ;;  %v1051_v7 = vadd.f32 0.0036580483, %v1050_v30  ;;  %5429 = vst [vmem:[#allocation42_spill] sm:$0xff] %v3614_v63  ;;  %v1013_v52 = vadd.f32 0.05243302, %v1012_v19 }
  0xcb   : > { %5427 = vst [vmem:[#allocation40_spill] sm:$0xff] %v3592_v20  ;;  %v3597_v2 = vadd.f32 %v483_v0, %v3362_v47  ;;  %v1128_v55 = vmul.f32 2.1237322e-06, %v3592_v20  ;;  %v3605_v5 = vadd.f32 %v548_v36, %v3362_v47  ;;  %v1090_v0 = vmul.f32 %v1089_v4, %v3578_v38 }
  0xcc   : > { %5428 = vst [vmem:[#allocation41_spill] sm:$0xff] %v3602_v59  ;;  %v1052_v35 = vmul.f32 %v1051_v7, %v3556_v42  ;;  %v1168_v30 = vmul.f32 2.1237322e-06, %v3602_v59  ;;  %v895_v36 = vadd.f32 0.18741608, %v894_v10 }
  0xcd   : > { %v3611_v62 = vmul.f32 %v3391_v3, %v3597_v2  ;;  %v1129_v17 = vadd.f32 0.00028619796, %v1128_v55  ;;  %v1091_v9 = vadd.f32 0.0036580483, %v1090_v0  ;;  %v3624_v6 = vmul.f32 %v3391_v3, %v3605_v5 }
  0xce   : > { %v1169_v22 = vadd.f32 0.00028619796, %v1168_v30  ;;  %v975_v7 = vadd.f32 0.18741608, %v974_v25  ;;  %v1053_v61 = vadd.f32 0.05243302, %v1052_v35 }
  0xcf   : > { %v1206_v4 = vmul.f32 %v3611_v62, %v3611_v62  ;;  %v1130_v53 = vmul.f32 %v1129_v17, %v3592_v20  ;;  %5430 = vst [vmem:[#allocation43_spill] sm:$0xff] %v3624_v6  ;;  %v1092_v55 = vmul.f32 %v1091_v9, %v3578_v38  ;;  %v1246_v19 = vmul.f32 %v3624_v6, %v3624_v6 }
  0xd0   : > { %v1170_v26 = vmul.f32 %v1169_v22, %v3602_v59  ;;  %v3636_v17 = vmul.f32 %v855_v29, %v3448_v45  ;;  %v896_v22 = vmul.f32 %v895_v36, %v3466_v60  ;;  %v976_v49 = vmul.f32 %v975_v7, %v3499_v48 }
  0xd1   : > { %v3627_v28 = vmin.f32 %v1206_v4, 16.0  ;;  %v1131_v0 = vadd.f32 0.0036580483, %v1130_v53  ;;  %v1093_v30 = vadd.f32 0.05243302, %v1092_v55  ;;  %v3645_v4 = vmin.f32 %v1246_v19, 16.0 }
  0xd2   : > { %v486_v11 = vpop.f32.mrf.mxu0  ;;  %v551_v47 = vpop.f32.mrf.mxu1  ;;  %5431 = vst [vmem:[#allocation44_spill] sm:$0xff] %v3636_v17  ;;  %v1171_v53 = vadd.f32 0.0036580483, %v1170_v26  ;;  %v3650_v29 = vmul.f32 0.5, %v3520_v18  ;;  %v935_v17 = vadd.f32 0.18741608, %v934_v1  ;;  %v1054_v34 = vmul.f32 %v1053_v61, %v3556_v42 }
  0xd3   : > { %v3630_v10 = vadd.f32 %v486_v11, %v3382_v57  ;;  %v1208_v25 = vmul.f32 2.1237322e-06, %v3627_v28  ;;  %v1014_v11 = vmul.f32 %v1013_v52, %v3525_v39  ;;  %v1132_v35 = vmul.f32 %v1131_v0, %v3592_v20  ;;  %5432 = vst [vmem:[#allocation45_spill] sm:$0xff] %v3645_v4 }
  0xd4   : > { %5433 = vst [vmem:[#allocation46_spill] sm:$0xff] %v3650_v29  ;;  %v1094_v16 = vmul.f32 %v1093_v30, %v3578_v38  ;;  %v1248_v52 = vmul.f32 2.1237322e-06, %v3645_v4  ;;  %v3656_v26 = vmul.f32 0.5, %v3528_v46  ;;  %v552_v18 = vadd.f32 %v551_v47, %v3382_v57 }
  0xd5   : > { %v3641_v9 = vmul.f32 %v3391_v3, %v3630_v10  ;;  %v1209_v55 = vadd.f32 0.00028619796, %v1208_v25  ;;  %v1015_v19 = vadd.f32 0.18741608, %v1014_v11  ;;  %v1133_v1 = vadd.f32 0.05243302, %v1132_v35 }
  0xd6   : > { %5434 = vst [vmem:[#allocation47_spill] sm:$0xff] %v3656_v26  ;;  %v1172_v61 = vmul.f32 %v1171_v53, %v3602_v59  ;;  %v1249_v25 = vadd.f32 0.00028619796, %v1248_v52  ;;  %v3663_v30 = vadd.f32 1.1283791, %v896_v22  ;;  %v3674_v57 = vmul.f32 0.5, %v3562_v27 }
  0xd7   : > { %v1210_v36 = vmul.f32 %v1209_v55, %v3627_v28  ;;  %v1286_v7 = vmul.f32 %v3641_v9, %v3641_v9  ;;  %v977_v63 = vadd.f32 1.1283791, %v976_v49  ;;  %v3671_v55 = vmul.f32 %v935_v17, %v3479_v15 }
  0xd8   : > { %5435 = vst [vmem:[#allocation48_spill] sm:$0xff] %v3663_v30  ;;  %v1055_v8 = vadd.f32 0.18741608, %v1054_v34  ;;  %v1095_v13 = vadd.f32 0.18741608, %v1094_v16  ;;  %v1250_v47 = vmul.f32 %v1249_v25, %v3645_v4  ;;  %v3679_v49 = vmul.f32 %v3391_v3, %v552_v18 }
  0xd9   : > { %v3668_v46 = vmin.f32 %v1286_v7, 16.0  ;;  %5437 = vst [vmem:[#allocation50_spill] sm:$0xff] %v3671_v55  ;;  %v1211_v26 = vadd.f32 0.0036580483, %v1210_v36  ;;  %v1016_v23 = vmul.f32 %v1015_v19, %v3525_v39  ;;  %v1134_v35 = vmul.f32 %v1133_v1, %v3592_v20 }
  0xda   : > { %v489_v24 = vpop.f32.mrf.mxu0  ;;  %v554_v0 = vpop.f32.mrf.mxu1  ;;  %5438 = vst [vmem:[#allocation51_spill] sm:$0xff] %v3674_v57  ;;  %v1173_v53 = vadd.f32 0.05243302, %v1172_v61  ;;  %v3685_v34 = vmul.f32 0.5, %v3597_v2  ;;  %v3688_v27 = vmul.f32 0.5, %v3605_v5  ;;  %v1326_v22 = vmul.f32 %v3679_v49, %v3679_v49 }
  0xdb   : > { %v1288_v11 = vmul.f32 2.1237322e-06, %v3668_v46  ;;  %v490_v17 = vadd.f32 %v489_v24, %v3380_v56  ;;  %v3693_v52 = vmul.f32 %v977_v63, %v3485_v21  ;;  %v1056_v36 = vmul.f32 %v1055_v8, %v3556_v42 }
  0xdc   : > { %5439 = vst [vmem:[#allocation52_spill] sm:$0xff] %v3685_v34  ;;  %v1096_v7 = vmul.f32 %v1095_v13, %v3578_v38  ;;  %v1212_v19 = vmul.f32 %v1211_v26, %v3627_v28  ;;  %v1251_v2 = vadd.f32 0.0036580483, %v1250_v47  ;;  %v3699_v5 = vmin.f32 %v1326_v22, 16.0 }
  0xdd   : > { %5440 = vst [vmem:[#allocation53_spill] sm:$0xff] %v3688_v27  ;;  %v1289_v16 = vadd.f32 0.00028619796, %v1288_v11  ;;  %v3702_v25 = vmul.f32 %v3391_v3, %v490_v17  ;;  %v3704_v11 = vadd.f32 1.1283791, %v1016_v23  ;;  %v1174_v63 = vmul.f32 %v1173_v53, %v3602_v59 }
  0xde   : > { %5441 = vst [vmem:[#allocation54_spill] sm:$0xff] %v3693_v52  ;;  %v1135_v21 = vadd.f32 0.18741608, %v1134_v35  ;;  %v3708_v8 = vadd.f32 %v554_v0, %v3380_v56  ;;  %v3711_v13 = vmul.f32 0.5, %v3630_v10  ;;  %v1328_v47 = vmul.f32 2.1237322e-06, %v3699_v5 }
  0xdf   : > { %v1290_v61 = vmul.f32 %v1289_v16, %v3668_v46  ;;  %5442 = vst [vmem:[#allocation55_spill] sm:$0xff] %v3704_v11  ;;  %v1366_v16 = vmul.f32 %v3702_v25, %v3702_v25  ;;  %v1057_v22 = vadd.f32 1.1283791, %v1056_v36  ;;  %v1097_v55 = vadd.f32 1.1283791, %v1096_v7 }
  0xe0   : > { %5443 = vst [vmem:[#allocation56_spill] sm:$0xff] %v3711_v13  ;;  %v3716_v30 = vmul.f32 0.5, %v552_v18  ;;  %v3720_v23 = vmul.f32 %v3391_v3, %v3708_v8  ;;  %v1213_v35 = vadd.f32 0.05243302, %v1212_v19  ;;  %v1252_v56 = vmul.f32 %v1251_v2, %v3645_v4 }
  0xe1   : > { %v1291_v26 = vadd.f32 0.0036580483, %v1290_v61  ;;  %v1329_v0 = vadd.f32 0.00028619796, %v1328_v47  ;;  %v3723_v10 = vmin.f32 %v1366_v16, 16.0  ;;  %v1136_v53 = vmul.f32 %v1135_v21, %v3592_v20 }
  0xe2   : > { %v492_v24 = vpop.f32.mrf.mxu0  ;;  %v557_v1 = vpop.f32.mrf.mxu1  ;;  %5444 = vst [vmem:[#allocation57_spill] sm:$0xff] %v3716_v30  ;;  %v1175_v61 = vadd.f32 0.18741608, %v1174_v63  ;;  %v1406_v52 = vmul.f32 %v3720_v23, %v3720_v23  ;;  %v3738_v47 = vmul.f32 %v1057_v22, %v3538_v58  ;;  %v3741_v21 = vmul.f32 %v1097_v55, %v3553_v14 }
  0xe3   : > { %5445 = vst [vmem:[#allocation58_spill] sm:$0xff] %v3720_v23  ;;  %v3729_v36 = vadd.f32 %v492_v24, %v3345_v40  ;;  %v1292_v18 = vmul.f32 %v1291_v26, %v3668_v46  ;;  %v1330_v7 = vmul.f32 %v1329_v0, %v3699_v5  ;;  %v1368_v19 = vmul.f32 2.1237322e-06, %v3723_v10 }
  0xe4   : > { %v3735_v2 = vadd.f32 %v557_v1, %v3345_v40  ;;  %5446 = vst [vmem:[#allocation59_spill] sm:$0xff] %v3738_v47  ;;  %v3743_v63 = vmin.f32 %v1406_v52, 16.0  ;;  %v1214_v0 = vmul.f32 %v1213_v35, %v3627_v28  ;;  %v1253_v12 = vadd.f32 0.05243302, %v1252_v56 }
  0xe5   : > { %5447 = vst [vmem:[#allocation60_spill] sm:$0xff] %v3741_v21  ;;  %v3747_v24 = vmul.f32 %v3391_v3, %v3729_v36  ;;  %v1331_v11 = vadd.f32 0.0036580483, %v1330_v7  ;;  %v1369_v40 = vadd.f32 0.00028619796, %v1368_v19  ;;  %v1176_v58 = vmul.f32 %v1175_v61, %v3602_v59 }
  0xe6   : > { %v1137_v1 = vadd.f32 1.1283791, %v1136_v53  ;;  %v1408_v22 = vmul.f32 2.1237322e-06, %v3743_v63  ;;  %v1293_v55 = vadd.f32 0.05243302, %v1292_v18  ;;  %v3758_v54 = vmul.f32 %v3391_v3, %v3735_v2 }
  0xe7   : > { %v1446_v14 = vmul.f32 %v3747_v24, %v3747_v24  ;;  %v1332_v52 = vmul.f32 %v1331_v11, %v3699_v5  ;;  %v1370_v21 = vmul.f32 %v1369_v40, %v3723_v10  ;;  %v3760_v35 = vmul.f32 0.5, %v490_v17 }
  0xe8   : > { %5448 = vst [vmem:[#allocation61_spill] sm:$0xff] %v3758_v54  ;;  %v1409_v56 = vadd.f32 0.00028619796, %v1408_v22  ;;  %v1215_v7 = vadd.f32 0.18741608, %v1214_v0  ;;  %v1254_v19 = vmul.f32 %v1253_v12, %v3645_v4  ;;  %v1486_v11 = vmul.f32 %v3758_v54, %v3758_v54 }
  0xe9   : > { %5449 = vst [vmem:[#allocation62_spill] sm:$0xff] %v3760_v35  ;;  %v3762_v53 = vmin.f32 %v1446_v14, 16.0  ;;  %v1371_v18 = vadd.f32 0.0036580483, %v1370_v21  ;;  %v1333_v40 = vadd.f32 0.05243302, %v1332_v52  ;;  %v3777_v22 = vmul.f32 %v1137_v1, %v3575_v32 }
  0xea   : > { %v495_v26 = vpop.f32.mrf.mxu0  ;;  %v560_v16 = vpop.f32.mrf.mxu1  ;;  %v1410_v29 = vmul.f32 %v1409_v56, %v3743_v63  ;;  %v3781_v21 = vmin.f32 %v1486_v11, 16.0  ;;  %v3786_v31 = vadd.f32 1.1283791, %v1176_v58  ;;  %v1216_v32 = vmul.f32 %v1215_v7, %v3627_v28 }
  0xeb   : > { %v3765_v61 = vadd.f32 %v495_v26, %v3335_v37  ;;  %v1448_v45 = vmul.f32 2.1237322e-06, %v3762_v53  ;;  %5450 = vst [vmem:[#allocation63_spill] sm:$0xff] %v3777_v22  ;;  %v1294_v26 = vmul.f32 %v1293_v55, %v3668_v46  ;;  %v1372_v12 = vmul.f32 %v1371_v18, %v3723_v10 }
  0xec   : > { %v1411_v0 = vadd.f32 0.0036580483, %v1410_v29  ;;  %v561_v56 = vadd.f32 %v560_v16, %v3335_v37  ;;  %5451 = vst [vmem:[#allocation64_spill] sm:$0xff] %v3786_v31  ;;  %v1488_v55 = vmul.f32 2.1237322e-06, %v3781_v21  ;;  %v1334_v18 = vmul.f32 %v1333_v40, %v3699_v5 }
  0xed   : > { %v3774_v17 = vmul.f32 %v3391_v3, %v3765_v61  ;;  %v1449_v14 = vadd.f32 0.00028619796, %v1448_v45  ;;  %v1373_v1 = vadd.f32 0.05243302, %v1372_v12  ;;  %v1255_v15 = vadd.f32 0.18741608, %v1254_v19 }
  0xee   : > { %v1295_v11 = vadd.f32 0.18741608, %v1294_v26  ;;  %v1412_v41 = vmul.f32 %v1411_v0, %v3743_v63  ;;  %v1489_v37 = vadd.f32 0.00028619796, %v1488_v55  ;;  %v3796_v16 = vmul.f32 %v3391_v3, %v561_v56 }
  0xef   : > { %v1526_v52 = vmul.f32 %v3774_v17, %v3774_v17  ;;  %v1450_v29 = vmul.f32 %v1449_v14, %v3762_v53  ;;  %v1374_v58 = vmul.f32 %v1373_v1, %v3723_v10  ;;  %v1217_v22 = vadd.f32 1.1283791, %v1216_v32 }
  0xf0   : > { %v3802_v40 = vmul.f32 0.5, %v3708_v8  ;;  %v1490_v14 = vmul.f32 %v1489_v37, %v3781_v21  ;;  %v1566_v26 = vmul.f32 %v3796_v16, %v3796_v16  ;;  %v1256_v0 = vmul.f32 %v1255_v15, %v3645_v4 }
  0xf1   : > { %v3792_v45 = vmin.f32 %v1526_v52, 16.0  ;;  %v1451_v7 = vadd.f32 0.0036580483, %v1450_v29  ;;  %v1335_v52 = vadd.f32 0.18741608, %v1334_v18  ;;  %v1296_v29 = vmul.f32 %v1295_v11, %v3668_v46 }
  0xf2   : > { %v498_v57 = vpop.f32.mrf.mxu0  ;;  %v563_v47 = vpop.f32.mrf.mxu1  ;;  %5452 = vst [vmem:[#allocation65_spill] sm:$0xff] %v3802_v40  ;;  %v1413_v27 = vadd.f32 0.05243302, %v1412_v41  ;;  %v1491_v60 = vadd.f32 0.0036580483, %v1490_v14  ;;  %v3817_v15 = vmul.f32 0.5, %v3729_v36 }
  0xf3   : > { %v1528_v12 = vmul.f32 2.1237322e-06, %v3792_v45  ;;  %v499_v19 = vadd.f32 %v498_v57, %v3371_v51  ;;  %v1452_v55 = vmul.f32 %v1451_v7, %v3762_v53  ;;  %v3810_v57 = vmin.f32 %v1566_v26, 16.0 }
  0xf4   : > { %v1375_v32 = vadd.f32 0.18741608, %v1374_v58  ;;  %5453 = vst [vmem:[#allocation66_spill] sm:$0xff] %v3817_v15  ;;  %v1492_v18 = vmul.f32 %v1491_v60, %v3781_v21  ;;  %v564_v41 = vadd.f32 %v563_v47, %v3371_v51  ;;  %v3822_v7 = vadd.f32 1.1283791, %v1256_v0 }
  0xf5   : > { %v1529_v1 = vadd.f32 0.00028619796, %v1528_v12  ;;  %v1453_v8 = vadd.f32 0.05243302, %v1452_v55  ;;  %v3814_v37 = vmul.f32 %v3391_v3, %v499_v19  ;;  %v1568_v11 = vmul.f32 2.1237322e-06, %v3810_v57 }
  0xf6   : > { %5454 = vst [vmem:[#allocation67_spill] sm:$0xff] %v3822_v7  ;;  %v3828_v26 = vmul.f32 %v1217_v22, %v3611_v62  ;;  %v1297_v55 = vadd.f32 1.1283791, %v1296_v29  ;;  %v3831_v36 = vmul.f32 0.5, %v3735_v2  ;;  %v1376_v51 = vmul.f32 %v1375_v32, %v3723_v10 }
  0xf7   : > { %v1530_v39 = vmul.f32 %v1529_v1, %v3792_v45  ;;  %v1454_v58 = vmul.f32 %v1453_v8, %v3762_v53  ;;  %v1606_v14 = vmul.f32 %v3814_v37, %v3814_v37  ;;  %v1569_v60 = vadd.f32 0.00028619796, %v1568_v11 }
  0xf8   : > { %5455 = vst [vmem:[#allocation68_spill] sm:$0xff] %v3828_v26  ;;  %v1336_v1 = vmul.f32 %v1335_v52, %v3699_v5  ;;  %v1414_v47 = vmul.f32 %v1413_v27, %v3743_v63  ;;  %v3840_v7 = vmul.f32 %v3391_v3, %v564_v41  ;;  %v3844_v2 = vmul.f32 0.5, %v3765_v61 }
  0xf9   : > { %v1531_v12 = vadd.f32 0.0036580483, %v1530_v39  ;;  %5456 = vst [vmem:[#allocation69_spill] sm:$0xff] %v3831_v36  ;;  %v3836_v0 = vmin.f32 %v1606_v14, 16.0  ;;  %v1493_v39 = vadd.f32 0.05243302, %v1492_v18  ;;  %v1570_v8 = vmul.f32 %v1569_v60, %v3810_v57 }
  0xfa   : > { %v501_v34 = vpop.f32.mrf.mxu0  ;;  %v566_v30 = vpop.f32.mrf.mxu1  ;;  %v1455_v22 = vadd.f32 0.18741608, %v1454_v58  ;;  %5457 = vst [vmem:[#allocation70_spill] sm:$0xff] %v3844_v2  ;;  %v3849_v27 = vmul.f32 %v1297_v55, %v3641_v9  ;;  %v3851_v32 = vmul.f32 0.5, %v561_v56  ;;  %v1646_v11 = vmul.f32 %v3840_v7, %v3840_v7 }
  0xfb   : > { %v502_v62 = vadd.f32 %v501_v34, %v3357_v44  ;;  %v1532_v52 = vmul.f32 %v1531_v12, %v3792_v45  ;;  %v1608_v29 = vmul.f32 2.1237322e-06, %v3836_v0  ;;  %v1571_v18 = vadd.f32 0.0036580483, %v1570_v8 }
  0xfc   : > { %5458 = vst [vmem:[#allocation71_spill] sm:$0xff] %v3849_v27  ;;  %v1337_v14 = vadd.f32 1.1283791, %v1336_v1  ;;  %v1415_v60 = vadd.f32 0.18741608, %v1414_v47  ;;  %v1494_v12 = vmul.f32 %v1493_v39, %v3781_v21  ;;  %v3859_v48 = vmin.f32 %v1646_v11, 16.0 }
  0xfd   : > { %5459 = vst [vmem:[#allocation72_spill] sm:$0xff] %v3851_v32  ;;  %v1609_v34 = vadd.f32 0.00028619796, %v1608_v29  ;;  %v3856_v58 = vmul.f32 %v3391_v3, %v502_v62  ;;  %v1377_v6 = vadd.f32 1.1283791, %v1376_v51  ;;  %v3862_v9 = vadd.f32 %v566_v30, %v3357_v44 }
  0xfe   : > { %v1456_v56 = vmul.f32 %v1455_v22, %v3762_v53  ;;  %v1533_v55 = vadd.f32 0.05243302, %v1532_v52  ;;  %v1572_v29 = vmul.f32 %v1571_v18, %v3810_v57  ;;  %v3869_v26 = vmul.f32 0.5, %v499_v19 }
  0xff   : > { %v1610_v8 = vmul.f32 %v1609_v34, %v3836_v0  ;;  %v1686_v1 = vmul.f32 %v3856_v58, %v3856_v58  ;;  %v1648_v51 = vmul.f32 2.1237322e-06, %v3859_v48  ;;  %v3874_v39 = vmul.f32 %v3391_v3, %v3862_v9 }
 0x100   : > { %v3877_v44 = vmul.f32 %v1337_v14, %v3679_v49  ;;  %v3880_v30 = vmul.f32 %v1415_v60, %v3743_v63  ;;  %v3885_v11 = vmul.f32 %v1377_v6, %v3702_v25  ;;  %v1495_v19 = vadd.f32 0.18741608, %v1494_v12 }
 0x101   : > { %v1611_v22 = vadd.f32 0.0036580483, %v1610_v8  ;;  %v3882_v52 = vmin.f32 %v1686_v1, 16.0  ;;  %v1649_v18 = vadd.f32 0.00028619796, %v1648_v51  ;;  %v1726_v34 = vmul.f32 %v3874_v39, %v3874_v39 }
 0x102   : > { %v504_v61 = vpop.f32.mrf.mxu0  ;;  %v569_v47 = vpop.f32.mrf.mxu1  ;;  %5460 = vst [vmem:[#allocation73_spill] sm:$0xff] %v3877_v44  ;;  %v1457_v31 = vadd.f32 1.1283791, %v1456_v56  ;;  %v1534_v33 = vmul.f32 %v1533_v55, %v3792_v45  ;;  %v1573_v60 = vadd.f32 0.05243302, %v1572_v29  ;;  %v3896_v12 = vmul.f32 0.5, %v564_v41 }
 0x103   : > { %5461 = vst [vmem:[#allocation74_spill] sm:$0xff] %v3880_v30  ;;  %v1612_v49 = vmul.f32 %v1611_v22, %v3836_v0  ;;  %v1688_v14 = vmul.f32 2.1237322e-06, %v3882_v52  ;;  %v1650_v8 = vmul.f32 %v1649_v18, %v3859_v48  ;;  %v3893_v1 = vmin.f32 %v1726_v34, 16.0 }
 0x104   : > { %5462 = vst [vmem:[#allocation75_spill] sm:$0xff] %v3885_v11  ;;  %v505_v6 = vadd.f32 %v504_v61, %v3369_v50  ;;  %v570_v13 = vadd.f32 %v569_v47, %v3369_v50  ;;  %v1496_v56 = vmul.f32 %v1495_v19, %v3781_v21  ;;  %v3900_v44 = vmul.f32 0.5, %v502_v62 }
 0x105   : > { %v1613_v25 = vadd.f32 0.05243302, %v1612_v49  ;;  %v1689_v51 = vadd.f32 0.00028619796, %v1688_v14  ;;  %v1651_v55 = vadd.f32 0.0036580483, %v1650_v8  ;;  %v3904_v18 = vmul.f32 %v1457_v31, %v3747_v24 }
 0x106   : > { %v1728_v22 = vmul.f32 2.1237322e-06, %v3893_v1  ;;  %v1535_v34 = vadd.f32 0.18741608, %v1534_v33  ;;  %v3908_v41 = vmul.f32 %v3391_v3, %v505_v6  ;;  %v1574_v49 = vmul.f32 %v1573_v60, %v3810_v57 }
 0x107   : > { %5463 = vst [vmem:[#allocation76_spill] sm:$0xff] %v3904_v18  ;;  %v1690_v61 = vmul.f32 %v1689_v51, %v3882_v52  ;;  %v1652_v50 = vmul.f32 %v1651_v55, %v3859_v48  ;;  %v3913_v62 = vmul.f32 %v3391_v3, %v570_v13  ;;  %v1614_v19 = vmul.f32 %v1613_v25, %v3836_v0 }
 0x108   : > { %v1729_v47 = vadd.f32 0.00028619796, %v1728_v22  ;;  %v1766_v31 = vmul.f32 %v3908_v41, %v3908_v41  ;;  %v3921_v8 = vadd.f32 1.1283791, %v1496_v56  ;;  %v1536_v22 = vmul.f32 %v1535_v34, %v3792_v45 }
 0x109   : > { %v1691_v14 = vadd.f32 0.0036580483, %v1690_v61  ;;  %v1653_v51 = vadd.f32 0.05243302, %v1652_v50  ;;  %v1806_v55 = vmul.f32 %v3913_v62, %v3913_v62  ;;  %v3958_v11 = vmul.f32 0.5, %v505_v6 }
 0x10a   : > { %v507_v29 = vpop.f32.mrf.mxu0  ;;  %v572_v24 = vpop.f32.mrf.mxu1  ;;  %5464 = vst [vmem:[#allocation77_spill] sm:$0xff] %v3921_v8  ;;  %v1730_v60 = vmul.f32 %v1729_v47, %v3893_v1  ;;  %v3928_v61 = vmin.f32 %v1766_v31, 16.0  ;;  %v1615_v47 = vadd.f32 0.18741608, %v1614_v19  ;;  %v3971_v20 = vmul.f32 0.5, %v570_v13 }
 0x10b   : > { %v3919_v33 = vadd.f32 %v507_v29, %v3355_v43  ;;  %v1692_v25 = vmul.f32 %v1691_v14, %v3882_v52  ;;  %v1575_v29 = vadd.f32 0.18741608, %v1574_v49  ;;  %v3934_v56 = vmin.f32 %v1806_v55, 16.0 }
 0x10c   : > { %v1731_v40 = vadd.f32 0.0036580483, %v1730_v60  ;;  %v3937_v50 = vadd.f32 %v572_v24, %v3355_v43  ;;  %v1654_v38 = vmul.f32 %v1653_v51, %v3859_v48  ;;  %v1768_v34 = vmul.f32 2.1237322e-06, %v3928_v61 }
 0x10d   : > { %v3932_v27 = vmul.f32 %v3391_v3, %v3919_v33  ;;  %v1693_v31 = vadd.f32 0.05243302, %v1692_v25  ;;  %v1808_v42 = vmul.f32 2.1237322e-06, %v3934_v56  ;;  %v1537_v60 = vadd.f32 1.1283791, %v1536_v22 }
 0x10e   : > { %v1732_v35 = vmul.f32 %v1731_v40, %v3893_v1  ;;  %v3947_v49 = vmul.f32 %v3391_v3, %v3937_v50  ;;  %v3950_v43 = vmul.f32 0.5, %v3862_v9  ;;  %v1769_v19 = vadd.f32 0.00028619796, %v1768_v34 }
 0x10f   : > { %v1846_v14 = vmul.f32 %v3932_v27, %v3932_v27  ;;  %v1576_v51 = vmul.f32 %v1575_v29, %v3810_v57  ;;  %v1809_v59 = vadd.f32 0.00028619796, %v1808_v42  ;;  %v1616_v25 = vmul.f32 %v1615_v47, %v3836_v0 }
 0x110   : > { %v1733_v55 = vadd.f32 0.05243302, %v1732_v35  ;;  %v1886_v40 = vmul.f32 %v3947_v49, %v3947_v49  ;;  %v1770_v3 = vmul.f32 %v1769_v19, %v3928_v61  ;;  %v1655_v9 = vadd.f32 0.18741608, %v1654_v38 }
 0x111   : > { %v3952_v24 = vmin.f32 %v1846_v14, 16.0  ;;  %v1694_v34 = vmul.f32 %v1693_v31, %v3882_v52  ;;  %v1810_v14 = vmul.f32 %v1809_v59, %v3934_v56  ;;  %v3967_v42 = vmul.f32 %v1537_v60, %v3774_v17 }
 0x112   : > { %v3964_v36 = vmin.f32 %v1886_v40, 16.0  ;;  %v1771_v35 = vadd.f32 0.0036580483, %v1770_v3  ;;  %v1734_v6 = vmul.f32 %v1733_v55, %v3893_v1  ;;  %v1577_v4 = vadd.f32 1.1283791, %v1576_v51 }
 0x113   : > { %v1848_v22 = vmul.f32 2.1237322e-06, %v3952_v24  ;;  %v1859_v47 = vmul.f32 3.8918573e-05, %v3952_v24  ;;  %v1811_v19 = vadd.f32 0.0036580483, %v1810_v14 }
 0x114   : > { %v1888_v38 = vmul.f32 2.1237322e-06, %v3964_v36  ;;  %v1772_v31 = vmul.f32 %v1771_v35, %v3928_v61  ;;  %v3976_v15 = vadd.f32 1.1283791, %v1616_v25  ;;  %v1695_v17 = vadd.f32 0.18741608, %v1694_v34 }
 0x115   : > { %v1849_v29 = vadd.f32 0.00028619796, %v1848_v22  ;;  %v1860_v40 = vadd.f32 0.001143296, %v1859_v47  ;;  %v1812_v3 = vmul.f32 %v1811_v19, %v3934_v56  ;;  %v1656_v22 = vmul.f32 %v1655_v9, %v3859_v48 }
 0x116   : > { %v1889_v60 = vadd.f32 0.00028619796, %v1888_v38  ;;  %v1773_v55 = vadd.f32 0.05243302, %v1772_v31  ;;  %v1735_v23 = vadd.f32 0.18741608, %v1734_v6  ;;  %v1696_v19 = vmul.f32 %v1695_v17, %v3882_v52 }
 0x117   : > { %v1850_v59 = vmul.f32 %v1849_v29, %v3952_v24  ;;  %v1861_v14 = vmul.f32 %v1860_v40, %v3952_v24  ;;  %v1813_v32 = vadd.f32 0.05243302, %v1812_v3  ;;  %v1899_v35 = vmul.f32 3.8918573e-05, %v3964_v36 }
 0x118   : > { %v1890_v51 = vmul.f32 %v1889_v60, %v3964_v36  ;;  %v1774_v29 = vmul.f32 %v1773_v55, %v3928_v61  ;;  %v1779_v47 = vmul.f32 3.8918573e-05, %v3928_v61  ;;  %v3988_v38 = vmul.f32 0.5, %v3919_v33 }
 0x119   : > { %v1851_v13 = vadd.f32 0.0036580483, %v1850_v59  ;;  %v1862_v34 = vadd.f32 0.014752088, %v1861_v14  ;;  %v1900_v31 = vadd.f32 0.001143296, %v1899_v35  ;;  %v1814_v6 = vmul.f32 %v1813_v32, %v3934_v56 }
 0x11a   : > { %v1891_v9 = vadd.f32 0.0036580483, %v1890_v51  ;;  %v1780_v3 = vadd.f32 0.001143296, %v1779_v47  ;;  %v1736_v60 = vmul.f32 %v1735_v23, %v3893_v1  ;;  %v1819_v14 = vmul.f32 3.8918573e-05, %v3934_v56 }
 0x11b   : > { %v1852_v25 = vmul.f32 %v1851_v13, %v3952_v24  ;;  %v1863_v40 = vmul.f32 %v1862_v34, %v3952_v24  ;;  %v1901_v13 = vmul.f32 %v1900_v31, %v3964_v36  ;;  %v1775_v17 = vadd.f32 0.18741608, %v1774_v29 }
 0x11c   : > { %v1892_v55 = vmul.f32 %v1891_v9, %v3964_v36  ;;  %v1781_v35 = vmul.f32 %v1780_v3, %v3928_v61  ;;  %v3999_v32 = vmul.f32 %v1577_v4, %v3796_v16  ;;  %v1820_v47 = vadd.f32 0.001143296, %v1819_v14 }
 0x11d   : > { %v1853_v59 = vadd.f32 0.05243302, %v1852_v25  ;;  %v1864_v33 = vadd.f32 0.112945676, %v1863_v40  ;;  %v1902_v34 = vadd.f32 0.014752088, %v1901_v13 }
 0x11e   : > { %5465 = vst [vmem:[#allocation78_spill] sm:$0xff] %v3999_v32  ;;  %v1893_v25 = vadd.f32 0.05243302, %v1892_v55  ;;  %v4001_v18 = vadd.f32 1.1283791, %v1656_v22  ;;  %v1821_v40 = vmul.f32 %v1820_v47, %v3934_v56  ;;  %v1776_v55 = vmul.f32 %v1775_v17, %v3928_v61 }
 0x11f   : > { %v1854_v51 = vmul.f32 %v1853_v59, %v3952_v24  ;;  %v1815_v23 = vadd.f32 0.18741608, %v1814_v6  ;;  %v1865_v9 = vmul.f32 %v1864_v33, %v3952_v24  ;;  %v1782_v31 = vadd.f32 0.014752088, %v1781_v35 }
 0x120   : > { %v1894_v29 = vmul.f32 %v1893_v25, %v3964_v36  ;;  %v1903_v59 = vmul.f32 %v1902_v34, %v3964_v36  ;;  %v1697_v3 = vadd.f32 1.1283791, %v1696_v19  ;;  %v1737_v54 = vadd.f32 1.1283791, %v1736_v60 }
 0x121   : > { %v1855_v8 = vadd.f32 0.18741608, %v1854_v51  ;;  %v1866_v4 = vadd.f32 0.4994258, %v1865_v9  ;;  %v1783_v16 = vmul.f32 %v1782_v31, %v3928_v61  ;;  %v1822_v6 = vadd.f32 0.014752088, %v1821_v40 }
 0x122   : > { %v1895_v22 = vadd.f32 0.18741608, %v1894_v29  ;;  %v1904_v13 = vadd.f32 0.112945676, %v1903_v59  ;;  %v1816_v14 = vmul.f32 %v1815_v23, %v3934_v56  ;;  %v1699_v35 = vmul.f32 3.8918573e-05, %v3882_v52 }
 0x123   : > { %v1867_v51 = vmul.f32 %v1866_v4, %v3952_v24  ;;  %v1784_v33 = vadd.f32 0.112945676, %v1783_v16  ;;  %v1856_v25 = vmul.f32 %v1855_v8, %v3952_v24  ;;  %v1823_v34 = vmul.f32 %v1822_v6, %v3934_v56 }
 0x124   : > { %v1896_v19 = vmul.f32 %v1895_v22, %v3964_v36  ;;  %v1905_v60 = vmul.f32 %v1904_v13, %v3964_v36  ;;  %v1700_v9 = vadd.f32 0.001143296, %v1699_v35  ;;  %v1739_v23 = vmul.f32 3.8918573e-05, %v3893_v1 }
 0x125   : > { %v4016_v47 = vadd.f32 1.0, %v1867_v51  ;;  %v1785_v17 = vmul.f32 %v1784_v33, %v3928_v61  ;;  %v4021_v31 = vmul.f32 %v1697_v3, %v3856_v58  ;;  %v4024_v29 = vmul.f32 0.5, %v3937_v50 }
 0x126   : > { %v1906_v8 = vadd.f32 0.4994258, %v1905_v60  ;;  %v1824_v24 = vadd.f32 0.112945676, %v1823_v34  ;;  %v4027_v59 = vmul.f32 %v1737_v54, %v3874_v39  ;;  %v1777_v40 = vadd.f32 1.1283791, %v1776_v55 }
 0x127   : > { %v1817_v4 = vadd.f32 1.1283791, %v1816_v14  ;;  %3052 = vrcp.f32 %v4016_v47  ;;  %v1857_v16 = vadd.f32 1.1283791, %v1856_v25  ;;  %v1786_v13 = vadd.f32 0.4994258, %v1785_v17 }
 0x128   : > { %v1907_v22 = vmul.f32 %v1906_v8, %v3964_v36  ;;  %v1825_v6 = vmul.f32 %v1824_v24, %v3934_v56  ;;  %v1897_v58 = vadd.f32 1.1283791, %v1896_v19  ;;  %v1878_v3 = vand.u32 2147483647, %v4016_v47 }
 0x129   : > { %v1701_v50 = vmul.f32 %v1700_v9, %v3882_v52  ;;  %v1740_v51 = vadd.f32 0.001143296, %v1739_v23  ;;  %v1880_v33 = vand.u32 2147483648, %v4016_v47  ;;  %v1787_v39 = vmul.f32 %v1786_v13, %v3928_v61 }
 0x12a   : > { %v4035_v54 = vadd.f32 1.0, %v1907_v22  ;;  %v1826_v55 = vadd.f32 0.4994258, %v1825_v6  ;;  %v4039_v14 = vmul.f32 %v1777_v40, %v3908_v41  ;;  %v4042_v36 = vmul.f32 %v1817_v4, %v3913_v62 }
 0x12b   : > { %v1702_v35 = vadd.f32 0.014752088, %v1701_v50  ;;  %v1741_v25 = vmul.f32 %v1740_v51, %v3893_v1  ;;  %v1858_v19 = vmul.f32 %v1857_v16, %v3932_v27  ;;  %vm1874_vm2 = vweird.f32 %v4016_v47 }
 0x12c   : > { %3054 = vrcp.f32 %v4035_v54  ;;  %v1619_v60 = vmul.f32 3.8918573e-05, %v3836_v0  ;;  %v4049_v61 = vadd.f32 1.0, %v1787_v39  ;;  %v1827_v41 = vmul.f32 %v1826_v55, %v3934_v56 }
 0x12d   : > { %v3053_v34 = vpop.eup %3052  ;;  %v1703_v17 = vmul.f32 %v1702_v35, %v3882_v52  ;;  %v1742_v62 = vadd.f32 0.014752088, %v1741_v25  ;;  %v4054_v9 = vmul.f32 %v1897_v58, %v3947_v49  ;;  %vm4057_vm3 = vcmp.eq.f32.partialorder %v1878_v3, 8.507059e+37 }
 0x12e   : > { %v1870_v23 = vmul.f32 %v3053_v34, %v4016_v47  ;;  %v1881_v8 = vor.u32 1.1754944e-38, %v1880_v33  ;;  %v1918_v24 = vand.u32 2147483647, %v4035_v54  ;;  %v1920_v40 = vand.u32 2147483648, %v4035_v54 }
 0x12f   : > { %3056 = vrcp.f32 %v4049_v61  ;;  %v1659_v56 = vmul.f32 3.8918573e-05, %v3859_v48  ;;  %v4065_v16 = vadd.f32 1.0, %v1827_v41  ;;  %v1704_v49 = vadd.f32 0.112945676, %v1703_v17 }
 0x130   : > { %v1871_v4 = vsub.f32 1.0, %v1870_v23  ;;  %v1743_v22 = vmul.f32 %v1742_v62, %v3893_v1  ;;  %vm1914_vm4 = vweird.f32 %v4035_v54  ;;  %v1800_v13 = vand.u32 2147483648, %v4049_v61 }
 0x131   : > { %v1620_v6 = vadd.f32 0.001143296, %v1619_v60  ;;  %v4071_v58 = vmul.f32 3.8918573e-05, %v3792_v45  ;;  %vm1875_vm5 = vweird.f32 %v3053_v34  ;;  %v1798_v51 = vand.u32 2147483647, %v4049_v61 }
 0x132   : > { %v3055_v3 = vpop.eup %3054  ;;  %v1872_v50 = vmul.f32 %v3053_v34, %v1871_v4  ;;  %3058 = vrcp.f32 %v4065_v16  ;;  %vm4076_vm6 = vcmp.eq.f32.partialorder %v1918_v24, 8.507059e+37  ;;  %v1921_v55 = vor.u32 1.1754944e-38, %v1920_v40  ;;  %vm1876_vm8 = vmor %vm1874_vm2, %vm1875_vm5 }
 0x133   : > { %v1910_v33 = vmul.f32 %v3055_v3, %v4035_v54  ;;  %v1705_v35 = vmul.f32 %v1704_v49, %v3882_v52  ;;  %vm1794_vm7 = vweird.f32 %v4049_v61  ;;  %v1744_v60 = vadd.f32 0.112945676, %v1743_v22 }
 0x134   : > { %v1873_v25 = vadd.f32 %v3053_v34, %v1872_v50  ;;  %v1621_v41 = vmul.f32 %v1620_v6, %v3836_v0  ;;  %v1801_v23 = vor.u32 1.1754944e-38, %v1800_v13  ;;  %v1660_v24 = vadd.f32 0.001143296, %v1659_v56 }
 0x135   : > { %v3057_v17 = vpop.eup %3056  ;;  %v1911_v62 = vsub.f32 1.0, %v1910_v33  ;;  %v1706_v4 = vadd.f32 0.4994258, %v1705_v35  ;;  %vm1915_vm9 = vweird.f32 %v3055_v3  ;;  %vm4086_vm10 = vcmp.eq.f32.partialorder %v1798_v51, 8.507059e+37 }
 0x136   : > { %v1877_v30 = vsel %vm1876_vm8, %v3053_v34, %v1873_v25  ;;  %v1790_v40 = vmul.f32 %v3057_v17, %v4049_v61  ;;  %v1745_v22 = vmul.f32 %v1744_v60, %v3893_v1  ;;  %v1622_v33 = vadd.f32 0.014752088, %v1621_v41  ;;  %vm1916_vm12 = vmor %vm1914_vm4, %vm1915_vm9 }
 0x137   : > { %v1882_v6 = vsel %vm4057_vm3, %v1881_v8, %v1877_v30  ;;  %v1912_v50 = vmul.f32 %v3055_v3, %v1911_v62  ;;  %v1707_v47 = vmul.f32 %v1706_v4, %v3882_v52  ;;  %v1838_v34 = vand.u32 2147483647, %v4065_v16 }
 0x138   : > { %v3059_v13 = vpop.eup %3058  ;;  %v1883_v35 = vmul.f32 %v1882_v6, %v1858_v19  ;;  %v1791_v56 = vsub.f32 1.0, %v1790_v40  ;;  %v1746_v25 = vadd.f32 0.4994258, %v1745_v22  ;;  %vm1795_vm11 = vweird.f32 %v3057_v17 }
 0x139   : > { %v1913_v2 = vadd.f32 %v3055_v3, %v1912_v50  ;;  %v1830_v51 = vmul.f32 %v3059_v13, %v4065_v16  ;;  %v4096_v32 = vadd.f32 1.0, %v1707_v47  ;;  %v1623_v19 = vmul.f32 %v1622_v33, %v3836_v0  ;;  %vm1796_vm13 = vmor %vm1794_vm7, %vm1795_vm11 }
 0x13a   : > { %v3015_v60 = vclamps-f32 %v1883_v35, 1.0  ;;  %v1792_v30 = vmul.f32 %v3057_v17, %v1791_v56  ;;  %v1747_v52 = vmul.f32 %v1746_v25, %v3893_v1  ;;  %v1840_v41 = vand.u32 2147483648, %v4065_v16 }
 0x13b   : > { %v1917_v27 = vsel %vm1916_vm12, %v3055_v3, %v1913_v2  ;;  %v1831_v8 = vsub.f32 1.0, %v1830_v51  ;;  %3060 = vrcp.f32 %v4096_v32  ;;  %v1661_v22 = vmul.f32 %v1660_v24, %v3859_v48 }
 0x13c   : > { %v1956_v62 = vadd.f32 1.0, %v3015_v60  ;;  %v1922_v4 = vsel %vm4076_vm6, %v1921_v55, %v1917_v27  ;;  %v1793_v40 = vadd.f32 %v3057_v17, %v1792_v30  ;;  %vm1835_vm14 = vweird.f32 %v3059_v13 }
 0x13d   : > { %v1923_v54 = vmul.f32 %v1922_v4, %v4054_v9  ;;  %v1832_v1 = vmul.f32 %v3059_v13, %v1831_v8  ;;  %v4112_v2 = vadd.f32 1.0, %v1747_v52  ;;  %vm1834_vm15 = vweird.f32 %v4065_v16 }
 0x13e   : > { %v1988_v3 = vmul.f32 %v1956_v62, %v3988_v38  ;;  %v1797_v6 = vsel %vm1796_vm13, %v3057_v17, %v1793_v40  ;;  %v1624_v39 = vadd.f32 0.112945676, %v1623_v19  ;;  %v1720_v9 = vand.u32 2147483648, %v4096_v32  ;;  %vm1836_vm0 = vmor %vm1834_vm15, %vm1835_vm14 }
 0x13f   : > { %v3016_v55 = vclamps-f32 %v1923_v54, 1.0  ;;  %v1802_v24 = vsel %vm4086_vm10, %v1801_v23, %v1797_v6  ;;  %v1833_v50 = vadd.f32 %v3059_v13, %v1832_v1  ;;  %v1841_v47 = vor.u32 1.1754944e-38, %v1840_v41 }
 0x140   : > { %2046 = vmatpush.msra.mxu2 %v1988_v3  ;;  %v1803_v61 = vmul.f32 %v1802_v24, %v4039_v14  ;;  %3062 = vrcp.f32 %v4112_v2  ;;  %v1662_v33 = vadd.f32 0.014752088, %v1661_v22  ;;  %vm1839_vm1 = vcmp.eq.f32.partialorder %v1838_v34, 8.507059e+37 }
 0x141   : > { %v3061_v38 = vpop.eup %3060  ;;  %v1957_v17 = vadd.f32 1.0, %v3016_v55  ;;  %v1837_v35 = vsel %vm1836_vm0, %v3059_v13, %v1833_v50  ;;  %v1625_v16 = vmul.f32 %v1624_v39, %v3836_v0  ;;  %vm1714_vm2 = vweird.f32 %v4096_v32 }
 0x142   : > { %v3013_v56 = vclamps-f32 %v1803_v61, 1.0  ;;  %v1842_v49 = vsel %vm1839_vm1, %v1841_v47, %v1837_v35  ;;  %v1710_v23 = vmul.f32 %v3061_v38, %v4096_v32  ;;  %v1718_v51 = vand.u32 2147483647, %v4096_v32 }
 0x143   : > { %v1989_v25 = vmul.f32 %v1957_v17, %v4024_v29  ;;  %v1843_v14 = vmul.f32 %v1842_v49, %v4042_v36  ;;  %v1721_v60 = vor.u32 1.1754944e-38, %v1720_v9  ;;  %v1626_v19 = vadd.f32 0.4994258, %v1625_v16 }
 0x144   : > { %v1954_v30 = vadd.f32 1.0, %v3013_v56  ;;  %v1711_v52 = vsub.f32 1.0, %v1710_v23  ;;  %v1663_v13 = vmul.f32 %v1662_v33, %v3859_v48  ;;  %vm1715_vm3 = vweird.f32 %v3061_v38 }
 0x145   : > { %2087 = vmatpush.msra.mxu3 %v1989_v25  ;;  %v3014_v34 = vclamps-f32 %v1843_v14, 1.0  ;;  %v1540_v27 = vadd.f32 0.001143296, %v4071_v58  ;;  %v1579_v8 = vmul.f32 3.8918573e-05, %v3810_v57  ;;  %v1627_v36 = vmul.f32 %v1626_v19, %v3836_v0  ;;  %vm1716_vm4 = vmor %vm1714_vm2, %vm1715_vm3 }
 0x146   : > { %v3063_v41 = vpop.eup %3062  ;;  %v1986_v29 = vmul.f32 %v1954_v30, %v3958_v11  ;;  %v1712_v62 = vmul.f32 %v3061_v38, %v1711_v52  ;;  %v1664_v4 = vadd.f32 0.112945676, %v1663_v13  ;;  %v1758_v54 = vand.u32 2147483647, %v4112_v2 }
 0x147   : > { %v1955_v40 = vadd.f32 1.0, %v3014_v34  ;;  %v1750_v22 = vmul.f32 %v3063_v41, %v4112_v2  ;;  %v1541_v1 = vmul.f32 %v1540_v27, %v3792_v45  ;;  %v4135_v6 = vadd.f32 1.0, %v1627_v36 }
 0x148   : > { %2047 = vmatpush.msra.mxu2 %v1986_v29  ;;  %v1713_v3 = vadd.f32 %v3061_v38, %v1712_v62  ;;  %v1665_v58 = vmul.f32 %v1664_v4, %v3859_v48  ;;  %v1580_v39 = vadd.f32 0.001143296, %v1579_v8  ;;  %v1459_v24 = vmul.f32 3.8918573e-05, %v3762_v53 }
 0x149   : > { %v1987_v11 = vmul.f32 %v1955_v40, %v3971_v20  ;;  %v1751_v0 = vsub.f32 1.0, %v1750_v22  ;;  %v1542_v55 = vadd.f32 0.014752088, %v1541_v1  ;;  %vm1719_vm5 = vcmp.eq.f32.partialorder %v1718_v51, 8.507059e+37 }
 0x14a   : > { %v1717_v50 = vsel %vm1716_vm4, %v3061_v38, %v1713_v3  ;;  %v1760_v9 = vand.u32 2147483648, %v4112_v2  ;;  %3064 = vrcp.f32 %v4135_v6  ;;  %vm1755_vm6 = vweird.f32 %v3063_v41 }
 0x14b   : > { %2088 = vmatpush.msra.mxu3 %v1987_v11  ;;  %v1722_v61 = vsel %vm1719_vm5, %v1721_v60, %v1717_v50  ;;  %v1752_v47 = vmul.f32 %v3063_v41, %v1751_v0  ;;  %v1666_v33 = vadd.f32 0.4994258, %v1665_v58  ;;  %vm1754_vm7 = vweird.f32 %v4112_v2 }
 0x14c   : > { %v1723_v20 = vmul.f32 %v1722_v61, %v4021_v31  ;;  %v1543_v32 = vmul.f32 %v1542_v55, %v3792_v45  ;;  %v1581_v17 = vmul.f32 %v1580_v39, %v3810_v57  ;;  %vm1759_vm8 = vcmp.eq.f32.partialorder %v1758_v54, 8.507059e+37  ;;  %vm1756_vm9 = vmor %vm1754_vm7, %vm1755_vm6 }
 0x14d   : > { %v1753_v35 = vadd.f32 %v3063_v41, %v1752_v47  ;;  %v1667_v38 = vmul.f32 %v1666_v33, %v3859_v48  ;;  %v1460_v16 = vadd.f32 0.001143296, %v1459_v24  ;;  %v1761_v49 = vor.u32 1.1754944e-38, %v1760_v9 }
 0x14e   : > { %v3011_v56 = vclamps-f32 %v1723_v20, 1.0  ;;  %v1544_v23 = vadd.f32 0.112945676, %v1543_v32  ;;  %v1582_v25 = vadd.f32 0.014752088, %v1581_v17  ;;  %v1618_v13 = vmul.f32 %v3976_v15, %v3814_v37 }
 0x14f   : > { %v1757_v14 = vsel %vm1756_vm9, %v3063_v41, %v1753_v35  ;;  %v4150_v51 = vadd.f32 1.0, %v1667_v38  ;;  %v1461_v31 = vmul.f32 %v1460_v16, %v3762_v53  ;;  %v1499_v2 = vmul.f32 3.8918573e-05, %v3781_v21 }
 0x150   : > { %v3065_v60 = vpop.eup %3064  ;;  %v1952_v30 = vadd.f32 1.0, %v3011_v56  ;;  %v1762_v52 = vsel %vm1759_vm8, %v1761_v49, %v1757_v14  ;;  %v1545_v19 = vmul.f32 %v1544_v23, %v3792_v45  ;;  %v1583_v48 = vmul.f32 %v1582_v25, %v3810_v57 }
 0x151   : > { %v1763_v34 = vmul.f32 %v1762_v52, %v4027_v59  ;;  %v1630_v27 = vmul.f32 %v3065_v60, %v4135_v6  ;;  %3066 = vrcp.f32 %v4150_v51  ;;  %v4163_v8 = vmul.f32 %v4001_v18, %v3840_v7 }
 0x152   : > { %v1984_v41 = vmul.f32 %v1952_v30, %v3900_v44  ;;  %vm1634_vm10 = vweird.f32 %v4135_v6  ;;  %v1638_v29 = vand.u32 2147483647, %v4135_v6  ;;  %v1546_v4 = vadd.f32 0.4994258, %v1545_v19 }
 0x153   : > { %v3012_v62 = vclamps-f32 %v1763_v34, 1.0  ;;  %v1631_v36 = vsub.f32 1.0, %v1630_v27  ;;  %v1584_v37 = vadd.f32 0.112945676, %v1583_v48  ;;  %vm1635_vm11 = vweird.f32 %v3065_v60 }
 0x154   : > { %2048 = vmatpush.msra.mxu2 %v1984_v41  ;;  %v1640_v15 = vand.u32 2147483648, %v4135_v6  ;;  %v1462_v59 = vadd.f32 0.014752088, %v1461_v31  ;;  %v1500_v40 = vadd.f32 0.001143296, %v1499_v2  ;;  %v1547_v7 = vmul.f32 %v1546_v4, %v3792_v45  ;;  %vm1636_vm13 = vmor %vm1634_vm10, %vm1635_vm11 }
 0x155   : > { %v1953_v22 = vadd.f32 1.0, %v3012_v62  ;;  %v1632_v54 = vmul.f32 %v3065_v60, %v1631_v36  ;;  %v1585_v44 = vmul.f32 %v1584_v37, %v3810_v57  ;;  %vm4171_vm12 = vcmp.eq.f32.partialorder %v1638_v29, 8.507059e+37  ;;  %v5483_v29 = vld [vmem:[#allocation70_spill] sm:$0xff] }
 0x156   : > { %v1678_v1 = vand.u32 2147483647, %v4150_v51  ;;  %v1463_v3 = vmul.f32 %v1462_v59, %v3762_v53  ;;  %v1501_v58 = vmul.f32 %v1500_v40, %v3781_v21  ;;  %v4179_v55 = vadd.f32 1.0, %v1547_v7 }
 0x157   : > { %v3067_v39 = vpop.eup %3066  ;;  %v1985_v11 = vmul.f32 %v1953_v22, %v3950_v43  ;;  %v1633_v0 = vadd.f32 %v3065_v60, %v1632_v54  ;;  %v1586_v24 = vadd.f32 0.4994258, %v1585_v44  ;;  %v1641_v45 = vor.u32 1.1754944e-38, %v1640_v15 }
 0x158   : > { %v1670_v50 = vmul.f32 %v3067_v39, %v4150_v51  ;;  %v1464_v9 = vadd.f32 0.112945676, %v1463_v3  ;;  %v1502_v61 = vadd.f32 0.014752088, %v1501_v58  ;;  %vm1674_vm14 = vweird.f32 %v4150_v51 }
 0x159   : > { %2089 = vmatpush.msra.mxu3 %v1985_v11  ;;  %v1637_v47 = vsel %vm1636_vm13, %v3065_v60, %v1633_v0  ;;  %v1680_v33 = vand.u32 2147483648, %v4150_v51  ;;  %3068 = vrcp.f32 %v4179_v55  ;;  %v1587_v6 = vmul.f32 %v1586_v24, %v3810_v57  ;;  %v5488_v24 = vld [vmem:[#allocation72_spill] sm:$0xff] }
 0x15a   : > { %v1642_v43 = vsel %vm4171_vm12, %v1641_v45, %v1637_v47  ;;  %v1671_v20 = vsub.f32 1.0, %v1670_v50  ;;  %v1379_v32 = vmul.f32 3.8918573e-05, %v3723_v10  ;;  %vm4192_vm15 = vcmp.eq.f32.partialorder %v1678_v1, 8.507059e+37 }
 0x15b   : > { %v1643_v17 = vmul.f32 %v1642_v43, %v1618_v13  ;;  %v1465_v38 = vmul.f32 %v1464_v9, %v3762_v53  ;;  %v1503_v16 = vmul.f32 %v1502_v61, %v3781_v21  ;;  %vm1675_vm0 = vweird.f32 %v3067_v39 }
 0x15c   : > { %v1672_v56 = vmul.f32 %v3067_v39, %v1671_v20  ;;  %v1558_v49 = vand.u32 2147483647, %v4179_v55  ;;  %v4199_v23 = vadd.f32 1.0, %v1587_v6  ;;  %v1560_v57 = vand.u32 2147483648, %v4179_v55  ;;  %vm1676_vm1 = vmor %vm1674_vm14, %vm1675_vm0 }
 0x15d   : > { %v3009_v25 = vclamps-f32 %v1643_v17, 1.0  ;;  %v1466_v14 = vadd.f32 0.4994258, %v1465_v38  ;;  %v1504_v31 = vadd.f32 0.112945676, %v1503_v16  ;;  %v1681_v60 = vor.u32 1.1754944e-38, %v1680_v33 }
 0x15e   : > { %v1673_v2 = vadd.f32 %v3067_v39, %v1672_v56  ;;  %3070 = vrcp.f32 %v4199_v23  ;;  %v1380_v30 = vadd.f32 0.001143296, %v1379_v32  ;;  %v1419_v34 = vmul.f32 3.8918573e-05, %v3743_v63 }
 0x15f   : > { %v3069_v52 = vpop.eup %3068  ;;  %v1950_v19 = vadd.f32 1.0, %v3009_v25  ;;  %v1467_v48 = vmul.f32 %v1466_v14, %v3762_v53  ;;  %v1505_v13 = vmul.f32 %v1504_v31, %v3781_v21  ;;  %vm1554_vm2 = vweird.f32 %v4179_v55 }
 0x160   : > { %v1677_v27 = vsel %vm1676_vm1, %v3067_v39, %v1673_v2  ;;  %v1550_v41 = vmul.f32 %v3069_v52, %v4179_v55  ;;  %vm4210_vm3 = vcmp.eq.f32.partialorder %v1558_v49, 8.507059e+37  ;;  %v1561_v36 = vor.u32 1.1754944e-38, %v1560_v57 }
 0x161   : > { %v1982_v62 = vmul.f32 %v1950_v19, %v3869_v26  ;;  %v1682_v51 = vsel %vm4192_vm15, %v1681_v60, %v1677_v27  ;;  %v4217_v53 = vadd.f32 1.0, %v1467_v48  ;;  %v1506_v15 = vadd.f32 0.4994258, %v1505_v13 }
 0x162   : > { %v1683_v4 = vmul.f32 %v1682_v51, %v4163_v8  ;;  %v1551_v37 = vsub.f32 1.0, %v1550_v41  ;;  %v1381_v59 = vmul.f32 %v1380_v30, %v3723_v10  ;;  %vm1555_vm4 = vweird.f32 %v3069_v52 }
 0x163   : > { %2049 = vmatpush.msra.mxu2 %v1982_v62  ;;  %v1598_v40 = vand.u32 2147483647, %v4199_v23  ;;  %v1600_v22 = vand.u32 2147483648, %v4199_v23  ;;  %3072 = vrcp.f32 %v4217_v53  ;;  %v1507_v44 = vmul.f32 %v1506_v15, %v3781_v21  ;;  %vm1556_vm6 = vmor %vm1554_vm2, %vm1555_vm4 }
 0x164   : > { %v3071_v26 = vpop.eup %3070  ;;  %v3010_v54 = vclamps-f32 %v1683_v4, 1.0  ;;  %v1552_v7 = vmul.f32 %v3069_v52, %v1551_v37  ;;  %v1382_v18 = vadd.f32 0.014752088, %v1381_v59  ;;  %vm1594_vm5 = vweird.f32 %v4199_v23 }
 0x165   : > { %v1590_v8 = vmul.f32 %v3071_v26, %v4199_v23  ;;  %v1478_v1 = vand.u32 2147483647, %v4217_v53  ;;  %v1480_v3 = vand.u32 2147483648, %v4217_v53  ;;  %v4229_v11 = vadd.f32 1.0, %v1507_v44 }
 0x166   : > { %v1951_v58 = vadd.f32 1.0, %v3010_v54  ;;  %v1553_v39 = vadd.f32 %v3069_v52, %v1552_v7  ;;  %v1383_v0 = vmul.f32 %v1382_v18, %v3723_v10  ;;  %vm4235_vm7 = vcmp.eq.f32.partialorder %v1598_v40, 8.507059e+37 }
 0x167   : > { %v1591_v21 = vsub.f32 1.0, %v1590_v8  ;;  %v1601_v45 = vor.u32 1.1754944e-38, %v1600_v22  ;;  %v1420_v50 = vadd.f32 0.001143296, %v1419_v34  ;;  %vm1474_vm8 = vweird.f32 %v4217_v53  ;;  %v5482_v34 = vld [vmem:[#allocation78_spill] sm:$0xff] }
 0x168   : > { %v1983_v9 = vmul.f32 %v1951_v58, %v3896_v12  ;;  %v1557_v61 = vsel %vm1556_vm6, %v3069_v52, %v1553_v39  ;;  %3074 = vrcp.f32 %v4229_v11  ;;  %v1299_v47 = vmul.f32 3.8918573e-05, %v3668_v46  ;;  %v5486_v58 = vld [vmem:[#allocation77_spill] sm:$0xff] }
 0x169   : > { %v3073_v33 = vpop.eup %3072  ;;  %v1562_v55 = vsel %vm4210_vm3, %v1561_v36, %v1557_v61  ;;  %v1592_v43 = vmul.f32 %v3071_v26, %v1591_v21  ;;  %vm1595_vm9 = vweird.f32 %v3071_v26  ;;  %v1481_v20 = vor.u32 1.1754944e-38, %v1480_v3 }
 0x16a   : > { %2090 = vmatpush.msra.mxu3 %v1983_v9  ;;  %v1563_v6 = vmul.f32 %v1562_v55, %v3967_v42  ;;  %v1470_v32 = vmul.f32 %v3073_v33, %v4217_v53  ;;  %vm4247_vm10 = vcmp.eq.f32.partialorder %v1478_v1, 8.507059e+37  ;;  %v1518_v17 = vand.u32 2147483647, %v4229_v11  ;;  %vm1596_vm12 = vmor %vm1594_vm5, %vm1595_vm9  ;;  %v5484_v1 = vld [vmem:[#allocation74_spill] sm:$0xff]  ;;  %v5485_v53 = vld [vmem:[#allocation61_spill] sm:$0xff] }
 0x16b   : > { %v1384_v35 = vadd.f32 0.112945676, %v1383_v0  ;;  %v1593_v38 = vadd.f32 %v3071_v26, %v1592_v43  ;;  %vm1475_vm11 = vweird.f32 %v3073_v33  ;;  %v1520_v16 = vand.u32 2147483648, %v4229_v11  ;;  %v5487_v0 = vld [vmem:[#allocation76_spill] sm:$0xff] }
 0x16c   : > { %v1421_v56 = vmul.f32 %v1420_v50, %v3743_v63  ;;  %v3007_v49 = vclamps-f32 %v1563_v6, 1.0  ;;  %v1471_v42 = vsub.f32 1.0, %v1470_v32  ;;  %v1300_v57 = vadd.f32 0.001143296, %v1299_v47  ;;  %vm1476_vm14 = vmor %vm1474_vm8, %vm1475_vm11 }
 0x16d   : > { %v1385_v25 = vmul.f32 %v1384_v35, %v3723_v10  ;;  %v1597_v14 = vsel %vm1596_vm12, %v3071_v26, %v1593_v38  ;;  %v1339_v2 = vmul.f32 3.8918573e-05, %v3699_v5  ;;  %v1219_v60 = vmul.f32 3.8918573e-05, %v3627_v28  ;;  %v5489_v38 = vld [vmem:[#allocation58_spill] sm:$0xff] }
 0x16e   : > { %v1422_v31 = vadd.f32 0.014752088, %v1421_v56  ;;  %v3075_v30 = vpop.eup %3074  ;;  %v1948_v52 = vadd.f32 1.0, %v3007_v49  ;;  %v1602_v19 = vsel %vm4235_vm7, %v1601_v45, %v1597_v14  ;;  %v1472_v48 = vmul.f32 %v3073_v33, %v1471_v42 }
 0x16f   : > { %v1386_v13 = vadd.f32 0.4994258, %v1385_v25  ;;  %v1603_v23 = vmul.f32 %v1602_v19, %v5482_v34  ;;  %v1510_v27 = vmul.f32 %v3075_v30, %v4229_v11  ;;  %vm1515_vm13 = vweird.f32 %v3075_v30 }
 0x170   : > { %v1423_v41 = vmul.f32 %v1422_v31, %v3743_v63  ;;  %v1980_v62 = vmul.f32 %v1948_v52, %v5483_v29  ;;  %v1473_v51 = vadd.f32 %v3073_v33, %v1472_v48  ;;  %v1301_v4 = vmul.f32 %v1300_v57, %v3668_v46  ;;  %v5490_v57 = vld [vmem:[#allocation66_spill] sm:$0xff]  ;;  %v5491_v31 = vld [vmem:[#allocation45_spill] sm:$0xff] }
 0x171   : > { %v1387_v36 = vmul.f32 %v1386_v13, %v3723_v10  ;;  %v3008_v37 = vclamps-f32 %v1603_v23, 1.0  ;;  %v1511_v15 = vsub.f32 1.0, %v1510_v27  ;;  %v1340_v40 = vadd.f32 0.001143296, %v1339_v2  ;;  %v5492_v13 = vld [vmem:[#allocation40_spill] sm:$0xff] }
 0x172   : > { %v1424_v59 = vadd.f32 0.112945676, %v1423_v41  ;;  %2050 = vmatpush.msra.mxu2 %v1980_v62  ;;  %v1477_v22 = vsel %vm1476_vm14, %v3073_v33, %v1473_v51  ;;  %v1302_v54 = vadd.f32 0.014752088, %v1301_v4  ;;  %v1220_v7 = vadd.f32 0.001143296, %v1219_v60 }
 0x173   : > { %v4270_v26 = vadd.f32 1.0, %v1387_v36  ;;  %v1949_v44 = vadd.f32 1.0, %v3008_v37  ;;  %v1482_v10 = vsel %vm4247_vm10, %v1481_v20, %v1477_v22  ;;  %v1512_v18 = vmul.f32 %v3075_v30, %v1511_v15  ;;  %v5493_v37 = vld [vmem:[#allocation69_spill] sm:$0xff] }
 0x174   : > { %v1425_v8 = vmul.f32 %v1424_v59, %v3743_v63  ;;  %v1417_v3 = vadd.f32 1.1283791, %v5484_v1  ;;  %v1498_v39 = vmul.f32 %v5486_v58, %v5485_v53  ;;  %v1483_v21 = vmul.f32 %v1482_v10, %v5487_v0 }
 0x175   : > { %3076 = vrcp.f32 %v4270_v26  ;;  %v1981_v45 = vmul.f32 %v1949_v44, %v5488_v24  ;;  %v1513_v50 = vadd.f32 %v3075_v30, %v1512_v18  ;;  %vm1514_vm15 = vweird.f32 %v4229_v11 }
 0x176   : > { %v1426_v9 = vadd.f32 0.4994258, %v1425_v8  ;;  %v3005_v61 = vclamps-f32 %v1483_v21, 1.0  ;;  %vm1516_vm0 = vmor %vm1514_vm15, %vm1515_vm13  ;;  %v1521_v47 = vor.u32 1.1754944e-38, %v1520_v16  ;;  %v1303_v33 = vmul.f32 %v1302_v54, %v3668_v46 }
 0x177   : > { %v1341_v55 = vmul.f32 %v1340_v40, %v3699_v5  ;;  %2091 = vmatpush.msra.mxu3 %v1981_v45  ;;  %v1517_v43 = vsel %vm1516_vm0, %v3075_v30, %v1513_v50  ;;  %vm1519_vm1 = vcmp.eq.f32.partialorder %v1518_v17, 8.507059e+37  ;;  %v1221_v6 = vmul.f32 %v1220_v7, %v3627_v28 }
 0x178   : > { %v1427_v20 = vmul.f32 %v1426_v9, %v3743_v63  ;;  %v1946_v32 = vadd.f32 1.0, %v3005_v61  ;;  %v1522_v12 = vsel %vm1519_vm1, %v1521_v47, %v1517_v43  ;;  %v1304_v35 = vadd.f32 0.112945676, %v1303_v33  ;;  %v5498_v9 = vld [vmem:[#allocation75_spill] sm:$0xff] }
 0x179   : > { %v1342_v11 = vadd.f32 0.014752088, %v1341_v55  ;;  %v4288_v56 = vmul.f32 %v1417_v3, %v5489_v38  ;;  %v1523_v49 = vmul.f32 %v1522_v12, %v1498_v39  ;;  %v1222_v42 = vadd.f32 0.014752088, %v1221_v6  ;;  %v5499_v55 = vld [vmem:[#allocation41_spill] sm:$0xff] }
 0x17a   : > { %v4290_v16 = vadd.f32 1.0, %v1427_v20  ;;  %v1978_v14 = vmul.f32 %v1946_v32, %v5490_v57  ;;  %v1305_v17 = vmul.f32 %v1304_v35, %v3668_v46  ;;  %v1259_v2 = vmul.f32 3.8918573e-05, %v5491_v31  ;;  %v5500_v35 = vld [vmem:[#allocation34_spill] sm:$0xff] }
 0x17b   : > { %v3077_v25 = vpop.eup %3076  ;;  %v1343_v63 = vmul.f32 %v1342_v11, %v3699_v5  ;;  %v3006_v60 = vclamps-f32 %v1523_v49, 1.0  ;;  %v1398_v52 = vand.u32 2147483647, %v4270_v26  ;;  %v1400_v19 = vand.u32 2147483648, %v4270_v26 }
 0x17c   : > { %v1390_v30 = vmul.f32 %v3077_v25, %v4270_v26  ;;  %3078 = vrcp.f32 %v4290_v16  ;;  %2051 = vmatpush.msra.mxu2 %v1978_v14  ;;  %vm1395_vm2 = vweird.f32 %v3077_v25  ;;  %v1306_v48 = vadd.f32 0.4994258, %v1305_v17 }
 0x17d   : > { %v1139_v34 = vmul.f32 3.8918573e-05, %v5492_v13  ;;  %v1947_v23 = vadd.f32 1.0, %v3006_v60  ;;  %v1344_v41 = vadd.f32 0.112945676, %v1343_v63  ;;  %v1223_v29 = vmul.f32 %v1222_v42, %v3627_v28 }
 0x17e   : > { %v1391_v27 = vsub.f32 1.0, %v1390_v30  ;;  %v1438_v62 = vand.u32 2147483647, %v4290_v16  ;;  %v1440_v51 = vand.u32 2147483648, %v4290_v16  ;;  %v1307_v36 = vmul.f32 %v1306_v48, %v3668_v46  ;;  %v5503_v30 = vld [vmem:[#allocation62_spill] sm:$0xff] }
 0x17f   : > { %v1260_v4 = vadd.f32 0.001143296, %v1259_v2  ;;  %v1979_v15 = vmul.f32 %v1947_v23, %v5493_v37  ;;  %v1345_v40 = vmul.f32 %v1344_v41, %v3699_v5  ;;  %v1224_v22 = vadd.f32 0.112945676, %v1223_v29  ;;  %v5514_v37 = vld [vmem:[#allocation25_spill] sm:$0xff] }
 0x180   : > { %v1392_v59 = vmul.f32 %v3077_v25, %v1391_v27  ;;  %vm1394_vm3 = vweird.f32 %v4270_v26  ;;  %vm4308_vm4 = vcmp.eq.f32.partialorder %v1398_v52, 8.507059e+37  ;;  %v4312_v7 = vadd.f32 1.0, %v1307_v36  ;;  %v5506_v26 = vld [vmem:[#allocation37_spill] sm:$0xff] }
 0x181   : > { %v1261_v44 = vmul.f32 %v1260_v4, %v5491_v31  ;;  %2092 = vmatpush.msra.mxu3 %v1979_v15  ;;  %v1401_v18 = vor.u32 1.1754944e-38, %v1400_v19  ;;  %v1346_v8 = vadd.f32 0.4994258, %v1345_v40  ;;  %v1225_v1 = vmul.f32 %v1224_v22, %v3627_v28  ;;  %vm1396_vm5 = vmor %vm1394_vm3, %vm1395_vm2 }
 0x182   : > { %v3079_v10 = vpop.eup %3078  ;;  %v1393_v46 = vadd.f32 %v3077_v25, %v1392_v59  ;;  %vm1434_vm6 = vweird.f32 %v4290_v16  ;;  %vm4319_vm7 = vcmp.eq.f32.partialorder %v1438_v62, 8.507059e+37  ;;  %3080 = vrcp.f32 %v4312_v7 }
 0x183   : > { %v1430_v3 = vmul.f32 %v3079_v10, %v4290_v16  ;;  %v1441_v58 = vor.u32 1.1754944e-38, %v1440_v51  ;;  %v1347_v39 = vmul.f32 %v1346_v8, %v3699_v5  ;;  %v1140_v0 = vadd.f32 0.001143296, %v1139_v34 }
 0x184   : > { %v1397_v53 = vsel %vm1396_vm5, %v3077_v25, %v1393_v46  ;;  %v1226_v45 = vadd.f32 0.4994258, %v1225_v1  ;;  %v1262_v50 = vadd.f32 0.014752088, %v1261_v44  ;;  %v1318_v47 = vand.u32 2147483647, %v4312_v7 }
 0x185   : > { %v1402_v21 = vsel %vm4308_vm4, %v1401_v18, %v1397_v53  ;;  %v1431_v24 = vsub.f32 1.0, %v1430_v3  ;;  %v4329_v33 = vadd.f32 1.0, %v1347_v39  ;;  %v1179_v43 = vmul.f32 3.8918573e-05, %v5499_v55 }
 0x186   : > { %v1403_v61 = vmul.f32 %v1402_v21, %v5498_v9  ;;  %vm1435_vm8 = vweird.f32 %v3079_v10  ;;  %v1227_v6 = vmul.f32 %v1226_v45, %v3627_v28  ;;  %v1263_v5 = vmul.f32 %v1262_v50, %v5491_v31 }
 0x187   : > { %v1432_v20 = vmul.f32 %v3079_v10, %v1431_v24  ;;  %v1320_v12 = vand.u32 2147483648, %v4312_v7  ;;  %3082 = vrcp.f32 %v4329_v33  ;;  %v1059_v11 = vmul.f32 3.8918573e-05, %v5500_v35  ;;  %vm1436_vm9 = vmor %vm1434_vm6, %vm1435_vm8 }
 0x188   : > { %v3003_v32 = vclamps-f32 %v1403_v61, 1.0  ;;  %v3081_v38 = vpop.eup %3080  ;;  %v4337_v42 = vadd.f32 1.0, %v1227_v6  ;;  %v1264_v25 = vadd.f32 0.112945676, %v1263_v5  ;;  %v1141_v57 = vmul.f32 %v1140_v0, %v5492_v13 }
 0x189   : > { %v1433_v49 = vadd.f32 %v3079_v10, %v1432_v20  ;;  %v1310_v28 = vmul.f32 %v3081_v38, %v4312_v7  ;;  %vm1314_vm10 = vweird.f32 %v4312_v7  ;;  %vm4344_vm11 = vcmp.eq.f32.partialorder %v1318_v47, 8.507059e+37  ;;  %v5508_v7 = vld [vmem:[#allocation71_spill] sm:$0xff] }
 0x18a   : > { %v1944_v14 = vadd.f32 1.0, %v3003_v32  ;;  %v1358_v2 = vand.u32 2147483647, %v4329_v33  ;;  %v1360_v60 = vand.u32 2147483648, %v4329_v33  ;;  %3084 = vrcp.f32 %v4337_v42 }
 0x18b   : > { %v1437_v63 = vsel %vm1436_vm9, %v3079_v10, %v1433_v49  ;;  %v1311_v19 = vsub.f32 1.0, %v1310_v28  ;;  %v1321_v48 = vor.u32 1.1754944e-38, %v1320_v12  ;;  %vm1354_vm12 = vweird.f32 %v4329_v33 }
 0x18c   : > { %v1976_v52 = vmul.f32 %v1944_v14, %v5503_v30  ;;  %v1442_v16 = vsel %vm4319_vm7, %v1441_v58, %v1437_v63  ;;  %v1265_v23 = vmul.f32 %v1264_v25, %v5491_v31  ;;  %v1142_v27 = vadd.f32 0.014752088, %v1141_v57  ;;  %v5507_v58 = vld [vmem:[#allocation65_spill] sm:$0xff]  ;;  %v5510_v63 = vld [vmem:[#allocation56_spill] sm:$0xff] }
 0x18d   : > { %v1443_v34 = vmul.f32 %v1442_v16, %v4288_v56  ;;  %v3083_v41 = vpop.eup %3082  ;;  %v1312_v29 = vmul.f32 %v3081_v38, %v1311_v19  ;;  %vm1315_vm13 = vweird.f32 %v3081_v38  ;;  %v1180_v62 = vadd.f32 0.001143296, %v1179_v43  ;;  %v5509_v14 = vld [vmem:[#allocation73_spill] sm:$0xff]  ;;  %v5512_v16 = vld [vmem:[#allocation64_spill] sm:$0xff] }
 0x18e   : > { %2052 = vmatpush.msra.mxu2 %v1976_v52  ;;  %v1060_v51 = vadd.f32 0.001143296, %v1059_v11  ;;  %v1350_v4 = vmul.f32 %v3083_v41, %v4329_v33  ;;  %vm4358_vm14 = vcmp.eq.f32.partialorder %v1358_v2, 8.507059e+37  ;;  %v1361_v15 = vor.u32 1.1754944e-38, %v1360_v60  ;;  %vm1316_vm15 = vmor %vm1314_vm10, %vm1315_vm13  ;;  %v5511_v52 = vld [vmem:[#allocation38_spill] sm:$0xff] }
 0x18f   : > { %v3004_v36 = vclamps-f32 %v1443_v34, 1.0  ;;  %v1238_v56 = vand.u32 2147483647, %v4337_v42  ;;  %v1313_v59 = vadd.f32 %v3081_v38, %v1312_v29  ;;  %v1266_v40 = vadd.f32 0.4994258, %v1265_v23 }
 0x190   : > { %v1143_v22 = vmul.f32 %v1142_v27, %v5492_v13  ;;  %v1181_v54 = vmul.f32 %v1180_v62, %v5499_v55  ;;  %v3085_v44 = vpop.eup %3084  ;;  %v1351_v46 = vsub.f32 1.0, %v1350_v4  ;;  %vm1355_vm0 = vweird.f32 %v3083_v41 }
 0x191   : > { %v1945_v10 = vadd.f32 1.0, %v3004_v36  ;;  %v1061_v18 = vmul.f32 %v1060_v51, %v5500_v35  ;;  %v1317_v8 = vsel %vm1316_vm15, %v3081_v38, %v1313_v59  ;;  %v1230_v1 = vmul.f32 %v3085_v44, %v4337_v42  ;;  %vm1356_vm2 = vmor %vm1354_vm12, %vm1355_vm0  ;;  %v5516_v59 = vld [vmem:[#allocation67_spill] sm:$0xff] }
 0x192   : > { %v1267_v3 = vmul.f32 %v1266_v40, %v5491_v31  ;;  %v1099_v53 = vmul.f32 3.8918573e-05, %v5506_v26  ;;  %v1322_v0 = vsel %vm4344_vm11, %v1321_v48, %v1317_v8  ;;  %v1352_v21 = vmul.f32 %v3083_v41, %v1351_v46 }
 0x193   : > { %v1977_v39 = vmul.f32 %v1945_v10, %v5507_v58  ;;  %v1144_v24 = vadd.f32 0.112945676, %v1143_v22  ;;  %v1323_v45 = vmul.f32 %v1322_v0, %v5508_v7  ;;  %v1231_v50 = vsub.f32 1.0, %v1230_v1 }
 0x194   : > { %v4375_v9 = vadd.f32 1.0, %v1267_v3  ;;  %v1182_v61 = vadd.f32 0.014752088, %v1181_v54  ;;  %v1353_v47 = vadd.f32 %v3083_v41, %v1352_v21  ;;  %vm1235_vm1 = vweird.f32 %v3085_v44 }
 0x195   : > { %2093 = vmatpush.msra.mxu3 %v1977_v39  ;;  %v1240_v31 = vand.u32 2147483648, %v4337_v42  ;;  %v1145_v43 = vmul.f32 %v1144_v24, %v5492_v13  ;;  %v3001_v20 = vclamps-f32 %v1323_v45, 1.0  ;;  %v1232_v6 = vmul.f32 %v3085_v44, %v1231_v50  ;;  %v5518_v24 = vld [vmem:[#allocation52_spill] sm:$0xff] }
 0x196   : > { %3086 = vrcp.f32 %v4375_v9  ;;  %v1062_v5 = vadd.f32 0.014752088, %v1061_v18  ;;  %v1357_v32 = vsel %vm1356_vm2, %v3083_v41, %v1353_v47  ;;  %vm1234_vm3 = vweird.f32 %v4337_v42  ;;  %v5513_v41 = vld [vmem:[#allocation68_spill] sm:$0xff] }
 0x197   : > { %v1146_v12 = vadd.f32 0.4994258, %v1145_v43  ;;  %v1100_v11 = vadd.f32 0.001143296, %v1099_v53  ;;  %v1942_v38 = vadd.f32 1.0, %v3001_v20  ;;  %v1362_v49 = vsel %vm4358_vm14, %v1361_v15, %v1357_v32  ;;  %vm1236_vm4 = vmor %vm1234_vm3, %vm1235_vm1 }
 0x198   : > { %v1233_v25 = vadd.f32 %v3085_v44, %v1232_v6  ;;  %v1183_v57 = vmul.f32 %v1182_v61, %v5499_v55  ;;  %v1363_v28 = vmul.f32 %v1362_v49, %v5509_v14  ;;  %vm1239_vm5 = vcmp.eq.f32.partialorder %v1238_v56, 8.507059e+37  ;;  %v5515_v56 = vld [vmem:[#allocation43_spill] sm:$0xff]  ;;  %v5521_v61 = vld [vmem:[#allocation29_spill] sm:$0xff] }
 0x199   : > { %v1241_v33 = vor.u32 1.1754944e-38, %v1240_v31  ;;  %v1147_v17 = vmul.f32 %v1146_v12, %v5492_v13  ;;  %v1974_v2 = vmul.f32 %v1942_v38, %v5510_v63  ;;  %v1063_v30 = vmul.f32 %v1062_v5, %v5500_v35 }
 0x19a   : > { %v1237_v42 = vsel %vm1236_vm4, %v3085_v44, %v1233_v25  ;;  %v1184_v60 = vadd.f32 0.112945676, %v1183_v57  ;;  %v4394_v19 = vmul.f32 %v5512_v16, %v5511_v52  ;;  %v3002_v48 = vclamps-f32 %v1363_v28, 1.0  ;;  %v5517_v44 = vld [vmem:[#allocation57_spill] sm:$0xff]  ;;  %v5522_v25 = vld [vmem:[#allocation20_spill] sm:$0xff] }
 0x19b   : > { %v1242_v34 = vsel %vm1239_vm5, %v1241_v33, %v1237_v42  ;;  %v4396_v23 = vadd.f32 1.0, %v1147_v17  ;;  %2053 = vmatpush.msra.mxu2 %v1974_v2  ;;  %v1064_v62 = vadd.f32 0.112945676, %v1063_v30  ;;  %v1101_v51 = vmul.f32 %v1100_v11, %v5506_v26  ;;  %v5533_v30 = vld [vmem:[#allocation12_spill] sm:$0xff] }
 0x19c   : > { %v3087_v27 = vpop.eup %3086  ;;  %v1243_v29 = vmul.f32 %v1242_v34, %v5513_v41  ;;  %v1185_v13 = vmul.f32 %v1184_v60, %v5499_v55  ;;  %v1943_v36 = vadd.f32 1.0, %v3002_v48  ;;  %v979_v15 = vmul.f32 3.8918573e-05, %v5514_v37 }
 0x19d   : > { %v1270_v4 = vmul.f32 %v3087_v27, %v4375_v9  ;;  %3088 = vrcp.f32 %v4396_v23  ;;  %v1258_v40 = vmul.f32 %v5516_v59, %v5515_v56  ;;  %vm1274_vm6 = vweird.f32 %v4375_v9 }
 0x19e   : > { %v2999_v22 = vclamps-f32 %v1243_v29, 1.0  ;;  %v1278_v54 = vand.u32 2147483647, %v4375_v9  ;;  %v1975_v10 = vmul.f32 %v1943_v36, %v5517_v44  ;;  %v1186_v18 = vadd.f32 0.4994258, %v1185_v13 }
 0x19f   : > { %v1271_v46 = vsub.f32 1.0, %v1270_v4  ;;  %v1065_v8 = vmul.f32 %v1064_v62, %v5500_v35  ;;  %vm1275_vm7 = vweird.f32 %v3087_v27  ;;  %v1280_v3 = vand.u32 2147483648, %v4375_v9 }
 0x1a0   : > { %v1940_v1 = vadd.f32 1.0, %v2999_v22  ;;  %v1102_v53 = vadd.f32 0.014752088, %v1101_v51  ;;  %2094 = vmatpush.msra.mxu3 %v1975_v10  ;;  %v1187_v39 = vmul.f32 %v1186_v18, %v5499_v55  ;;  %v980_v21 = vadd.f32 0.001143296, %v979_v15  ;;  %vm1276_vm9 = vmor %vm1274_vm6, %vm1275_vm7  ;;  %v5527_v22 = vld [vmem:[#allocation53_spill] sm:$0xff] }
 0x1a1   : > { %v1272_v58 = vmul.f32 %v3087_v27, %v1271_v46  ;;  %v1066_v0 = vadd.f32 0.4994258, %v1065_v8  ;;  %vm4413_vm8 = vcmp.eq.f32.partialorder %v1278_v54, 8.507059e+37  ;;  %v1019_v47 = vmul.f32 3.8918573e-05, %v5521_v61 }
 0x1a2   : > { %v1972_v7 = vmul.f32 %v1940_v1, %v5518_v24  ;;  %v1103_v50 = vmul.f32 %v1102_v53, %v5506_v26  ;;  %v4419_v20 = vadd.f32 1.0, %v1187_v39  ;;  %v981_v55 = vmul.f32 %v980_v21, %v5514_v37 }
 0x1a3   : > { %v3089_v31 = vpop.eup %3088  ;;  %v1273_v43 = vadd.f32 %v3087_v27, %v1272_v58  ;;  %v1067_v6 = vmul.f32 %v1066_v0, %v5500_v35  ;;  %v1281_v5 = vor.u32 1.1754944e-38, %v1280_v3  ;;  %v1158_v12 = vand.u32 2147483647, %v4396_v23 }
 0x1a4   : > { %2054 = vmatpush.msra.mxu2 %v1972_v7  ;;  %v1150_v32 = vmul.f32 %v3089_v31, %v4396_v23  ;;  %v1104_v11 = vadd.f32 0.112945676, %v1103_v50  ;;  %v1160_v49 = vand.u32 2147483648, %v4396_v23  ;;  %3090 = vrcp.f32 %v4419_v20 }
 0x1a5   : > { %v1277_v38 = vsel %vm1276_vm9, %v3087_v27, %v1273_v43  ;;  %v899_v35 = vmul.f32 3.8918573e-05, %v5522_v25  ;;  %v4433_v28 = vadd.f32 1.0, %v1067_v6  ;;  %v1020_v9 = vadd.f32 0.001143296, %v1019_v47 }
 0x1a6   : > { %v1282_v57 = vsel %vm4413_vm8, %v1281_v5, %v1277_v38  ;;  %v1151_v14 = vsub.f32 1.0, %v1150_v32  ;;  %vm1154_vm10 = vweird.f32 %v4396_v23  ;;  %v1105_v17 = vmul.f32 %v1104_v11, %v5506_v26 }
 0x1a7   : > { %v1283_v33 = vmul.f32 %v1282_v57, %v1258_v40  ;;  %v982_v63 = vadd.f32 0.014752088, %v981_v55  ;;  %vm1155_vm11 = vweird.f32 %v3089_v31  ;;  %v1198_v42 = vand.u32 2147483647, %v4419_v20 }
 0x1a8   : > { %v1152_v2 = vmul.f32 %v3089_v31, %v1151_v14  ;;  %3092 = vrcp.f32 %v4433_v28  ;;  %vm4439_vm12 = vcmp.eq.f32.partialorder %v1158_v12, 8.507059e+37  ;;  %v1161_v52 = vor.u32 1.1754944e-38, %v1160_v49  ;;  %vm1156_vm14 = vmor %vm1154_vm10, %vm1155_vm11  ;;  %v5531_v12 = vld [vmem:[#allocation49_spill] sm:$0xff] }
 0x1a9   : > { %v3000_v60 = vclamps-f32 %v1283_v33, 1.0  ;;  %v1106_v16 = vadd.f32 0.4994258, %v1105_v17  ;;  %vm1194_vm13 = vweird.f32 %v4419_v20  ;;  %v983_v34 = vmul.f32 %v982_v63, %v5514_v37 }
 0x1aa   : > { %v1153_v48 = vadd.f32 %v3089_v31, %v1152_v2  ;;  %v1021_v27 = vmul.f32 %v1020_v9, %v5521_v61  ;;  %v900_v41 = vadd.f32 0.001143296, %v899_v35  ;;  %v3091_v29 = vpop.eup %3090  ;;  %v1200_v62 = vand.u32 2147483648, %v4419_v20  ;;  %v5532_v2 = vld [vmem:[#allocation21_spill] sm:$0xff] }
 0x1ab   : > { %v1941_v13 = vadd.f32 1.0, %v3000_v60  ;;  %v1078_v51 = vand.u32 2147483647, %v4433_v28  ;;  %v1107_v36 = vmul.f32 %v1106_v16, %v5506_v26  ;;  %v1190_v15 = vmul.f32 %v3091_v29, %v4419_v20  ;;  %v5528_v26 = vld [vmem:[#allocation63_spill] sm:$0xff] }
 0x1ac   : > { %v1157_v4 = vsel %vm1156_vm14, %v3089_v31, %v1153_v48  ;;  %vm4452_vm15 = vcmp.eq.f32.partialorder %v1198_v42, 8.507059e+37  ;;  %v1080_v59 = vand.u32 2147483648, %v4433_v28  ;;  %v984_v40 = vadd.f32 0.112945676, %v983_v34  ;;  %v5536_v34 = vld [vmem:[#allocation59_spill] sm:$0xff] }
 0x1ad   : > { %v1973_v54 = vmul.f32 %v1941_v13, %v5527_v22  ;;  %v1162_v23 = vsel %vm4439_vm12, %v1161_v52, %v1157_v4  ;;  %v4460_v44 = vadd.f32 1.0, %v1107_v36  ;;  %v1022_v10 = vadd.f32 0.014752088, %v1021_v27 }
 0x1ae   : > { %v3093_v46 = vpop.eup %3092  ;;  %v1163_v18 = vmul.f32 %v1162_v23, %v5528_v26  ;;  %v1191_v8 = vsub.f32 1.0, %v1190_v15  ;;  %v985_v1 = vmul.f32 %v984_v40, %v5514_v37  ;;  %v901_v3 = vmul.f32 %v900_v41, %v5522_v25  ;;  %v5537_v40 = vld [vmem:[#allocation51_spill] sm:$0xff] }
 0x1af   : > { %2095 = vmatpush.msra.mxu3 %v1973_v54  ;;  %v1201_v53 = vor.u32 1.1754944e-38, %v1200_v62  ;;  %v1070_v58 = vmul.f32 %v3093_v46, %v4433_v28  ;;  %vm1074_vm0 = vweird.f32 %v4433_v28  ;;  %3094 = vrcp.f32 %v4460_v44 }
 0x1b0   : > { %v2997_v39 = vclamps-f32 %v1163_v18, 1.0  ;;  %v1192_v0 = vmul.f32 %v3091_v29, %v1191_v8  ;;  %vm1195_vm1 = vweird.f32 %v3091_v29  ;;  %vm4468_vm2 = vcmp.eq.f32.partialorder %v1078_v51, 8.507059e+37 }
 0x1b1   : > { %v1071_v24 = vsub.f32 1.0, %v1070_v58  ;;  %v986_v7 = vadd.f32 0.4994258, %v985_v1  ;;  %v1023_v45 = vmul.f32 %v1022_v10, %v5521_v61  ;;  %v902_v50 = vadd.f32 0.014752088, %v901_v3  ;;  %vm1196_vm4 = vmor %vm1194_vm13, %vm1195_vm1  ;;  %v5538_v10 = vld [vmem:[#allocation16_spill] sm:$0xff] }
 0x1b2   : > { %v1938_v47 = vadd.f32 1.0, %v2997_v39  ;;  %v1193_v31 = vadd.f32 %v3091_v29, %v1192_v0  ;;  %vm1075_vm3 = vweird.f32 %v3093_v46  ;;  %v1081_v43 = vor.u32 1.1754944e-38, %v1080_v59  ;;  %v5539_v0 = vld [vmem:[#allocation46_spill] sm:$0xff] }
 0x1b3   : > { %v1072_v6 = vmul.f32 %v3093_v46, %v1071_v24  ;;  %v987_v55 = vmul.f32 %v986_v7, %v5514_v37  ;;  %v1024_v5 = vadd.f32 0.112945676, %v1023_v45  ;;  %v903_v32 = vmul.f32 %v902_v50, %v5522_v25  ;;  %vm1076_vm5 = vmor %vm1074_vm0, %vm1075_vm3  ;;  %v5540_v7 = vld [vmem:[#allocation26_spill] sm:$0xff]  ;;  %v5542_v50 = vld [vmem:[#allocation60_spill] sm:$0xff] }
 0x1b4   : > { %v1970_v11 = vmul.f32 %v1938_v47, %v5531_v12  ;;  %v1197_v38 = vsel %vm1196_vm4, %v3091_v29, %v1193_v31  ;;  %v1118_v49 = vand.u32 2147483647, %v4460_v44  ;;  %v1120_v35 = vand.u32 2147483648, %v4460_v44 }
 0x1b5   : > { %v3095_v57 = vpop.eup %3094  ;;  %v1202_v14 = vsel %vm4452_vm15, %v1201_v53, %v1197_v38  ;;  %v1073_v9 = vadd.f32 %v3093_v46, %v1072_v6  ;;  %v4482_v20 = vadd.f32 1.0, %v987_v55  ;;  %v1025_v33 = vmul.f32 %v1024_v5, %v5521_v61 }
 0x1b6   : > { %2055 = vmatpush.msra.mxu2 %v1970_v11  ;;  %v1203_v37 = vmul.f32 %v1202_v14, %v4394_v19  ;;  %v1110_v17 = vmul.f32 %v3095_v57, %v4460_v44  ;;  %v904_v63 = vadd.f32 0.112945676, %v903_v32  ;;  %v939_v42 = vmul.f32 3.8918573e-05, %v5532_v2 }
 0x1b7   : > { %v1077_v60 = vsel %vm1076_vm5, %v3093_v46, %v1073_v9  ;;  %vm1114_vm6 = vweird.f32 %v4460_v44  ;;  %3096 = vrcp.f32 %v4482_v20  ;;  %v819_v52 = vmul.f32 3.8918573e-05, %v5533_v30 }
 0x1b8   : > { %v2998_v16 = vclamps-f32 %v1203_v37, 1.0  ;;  %v1082_v19 = vsel %vm4468_vm2, %v1081_v43, %v1077_v60  ;;  %v1111_v48 = vsub.f32 1.0, %v1110_v17  ;;  %vm4496_vm7 = vcmp.eq.f32.partialorder %v1118_v49, 8.507059e+37 }
 0x1b9   : > { %v1083_v27 = vmul.f32 %v1082_v19, %v5536_v34  ;;  %v1121_v41 = vor.u32 1.1754944e-38, %v1120_v35  ;;  %v1026_v29 = vadd.f32 0.4994258, %v1025_v33  ;;  %v905_v13 = vmul.f32 %v904_v63, %v5522_v25 }
 0x1ba   : > { %v1939_v62 = vadd.f32 1.0, %v2998_v16  ;;  %v1112_v51 = vmul.f32 %v3095_v57, %v1111_v48  ;;  %vm1115_vm8 = vweird.f32 %v3095_v57  ;;  %v940_v36 = vadd.f32 0.001143296, %v939_v42  ;;  %v5545_v42 = vld [vmem:[#allocation8_spill] sm:$0xff] }
 0x1bb   : > { %v2995_v4 = vclamps-f32 %v1083_v27, 1.0  ;;  %v1027_v15 = vmul.f32 %v1026_v29, %v5521_v61  ;;  %v906_v56 = vadd.f32 0.4994258, %v905_v13  ;;  %v820_v59 = vadd.f32 0.001143296, %v819_v52  ;;  %vm1116_vm9 = vmor %vm1114_vm6, %vm1115_vm8  ;;  %v5546_v52 = vld [vmem:[#allocation47_spill] sm:$0xff] }
 0x1bc   : > { %v1971_v22 = vmul.f32 %v1939_v62, %v5537_v40  ;;  %v1113_v54 = vadd.f32 %v3095_v57, %v1112_v51  ;;  %v941_v23 = vmul.f32 %v940_v36, %v5532_v2  ;;  %v859_v46 = vmul.f32 3.8918573e-05, %v5538_v10  ;;  %v5549_v62 = vld [vmem:[#allocation54_spill] sm:$0xff] }
 0x1bd   : > { %v3097_v26 = vpop.eup %3096  ;;  %v1936_v18 = vadd.f32 1.0, %v2995_v4  ;;  %v4508_v8 = vadd.f32 1.0, %v1027_v15  ;;  %v907_v1 = vmul.f32 %v906_v56, %v5522_v25  ;;  %v821_v61 = vmul.f32 %v820_v59, %v5533_v30  ;;  %v5541_v25 = vld [vmem:[#allocation55_spill] sm:$0xff]  ;;  %v5550_v15 = vld [vmem:[#allocation9_spill] sm:$0xff] }
 0x1be   : > { %2096 = vmatpush.msra.mxu3 %v1971_v22  ;;  %v1117_v3 = vsel %vm1116_vm9, %v3095_v57, %v1113_v54  ;;  %v990_v53 = vmul.f32 %v3097_v26, %v4482_v20  ;;  %v998_v58 = vand.u32 2147483647, %v4482_v20  ;;  %v942_v39 = vadd.f32 0.014752088, %v941_v23 }
 0x1bf   : > { %v1968_v21 = vmul.f32 %v1936_v18, %v5539_v0  ;;  %v1122_v24 = vsel %vm4496_vm7, %v1121_v41, %v1117_v3  ;;  %v1000_v44 = vand.u32 2147483648, %v4482_v20  ;;  %3098 = vrcp.f32 %v4508_v8 }
 0x1c0   : > { %v4521_v45 = vmul.f32 %v5541_v25, %v5540_v7  ;;  %v1123_v47 = vmul.f32 %v1122_v24, %v5542_v50  ;;  %v991_v31 = vsub.f32 1.0, %v990_v53  ;;  %v1040_v43 = vand.u32 2147483648, %v4508_v8 }
 0x1c1   : > { %2056 = vmatpush.msra.mxu2 %v1968_v21  ;;  %v4525_v6 = vadd.f32 1.0, %v907_v1  ;;  %v943_v55 = vmul.f32 %v942_v39, %v5532_v2  ;;  %v822_v5 = vadd.f32 0.014752088, %v821_v61  ;;  %v860_v32 = vadd.f32 0.001143296, %v859_v46 }
 0x1c2   : > { %v2996_v12 = vclamps-f32 %v1123_v47, 1.0  ;;  %v992_v11 = vmul.f32 %v3097_v26, %v991_v31  ;;  %vm995_vm10 = vweird.f32 %v3097_v26  ;;  %v1038_v38 = vand.u32 2147483647, %v4508_v8 }
 0x1c3   : > { %vm994_vm11 = vweird.f32 %v4482_v20  ;;  %vm4530_vm12 = vcmp.eq.f32.partialorder %v998_v58, 8.507059e+37  ;;  %v1001_v35 = vor.u32 1.1754944e-38, %v1000_v44  ;;  %3100 = vrcp.f32 %v4525_v6 }
 0x1c4   : > { %v1937_v57 = vadd.f32 1.0, %v2996_v12  ;;  %v993_v14 = vadd.f32 %v3097_v26, %v992_v11  ;;  %vm1034_vm13 = vweird.f32 %v4508_v8  ;;  %v944_v9 = vadd.f32 0.112945676, %v943_v55  ;;  %vm996_vm14 = vmor %vm994_vm11, %vm995_vm10  ;;  %v5553_v55 = vld [vmem:[#allocation48_spill] sm:$0xff] }
 0x1c5   : > { %v823_v33 = vmul.f32 %v822_v5, %v5533_v30  ;;  %v3099_v37 = vpop.eup %3098  ;;  %v1041_v17 = vor.u32 1.1754944e-38, %v1040_v43  ;;  %v918_v63 = vand.u32 2147483647, %v4525_v6  ;;  %v861_v20 = vmul.f32 %v860_v32, %v5538_v10  ;;  %v5552_v43 = vld [vmem:[#allocation15_spill] sm:$0xff]  ;;  %v5554_v32 = vld [vmem:[#allocation50_spill] sm:$0xff] }
 0x1c6   : > { %v739_v60 = vmul.f32 3.8918573e-05, %v5545_v42  ;;  %v1969_v16 = vmul.f32 %v1937_v57, %v5546_v52  ;;  %v997_v19 = vsel %vm996_vm14, %v3097_v26, %v993_v14  ;;  %v1030_v48 = vmul.f32 %v3099_v37, %v4508_v8 }
 0x1c7   : > { %vm4542_vm15 = vcmp.eq.f32.partialorder %v1038_v38, 8.507059e+37  ;;  %v920_v34 = vand.u32 2147483648, %v4525_v6  ;;  %v1002_v27 = vsel %vm4530_vm12, %v1001_v35, %v997_v19  ;;  %v945_v41 = vmul.f32 %v944_v9, %v5532_v2 }
 0x1c8   : > { %v824_v29 = vadd.f32 0.112945676, %v823_v33  ;;  %v862_v13 = vadd.f32 0.014752088, %v861_v20  ;;  %2097 = vmatpush.msra.mxu3 %v1969_v16  ;;  %v1003_v51 = vmul.f32 %v1002_v27, %v5549_v62  ;;  %v1031_v36 = vsub.f32 1.0, %v1030_v48  ;;  %v5557_v20 = vld [vmem:[#allocation35_spill] sm:$0xff] }
 0x1c9   : > { %v740_v4 = vadd.f32 0.001143296, %v739_v60  ;;  %v779_v56 = vmul.f32 3.8918573e-05, %v5550_v15  ;;  %v3101_v59 = vpop.eup %3100  ;;  %vm1035_vm0 = vweird.f32 %v3099_v37  ;;  %v946_v40 = vadd.f32 0.4994258, %v945_v41 }
 0x1ca   : > { %v825_v22 = vmul.f32 %v824_v29, %v5533_v30  ;;  %v863_v54 = vmul.f32 %v862_v13, %v5538_v10  ;;  %v2993_v23 = vclamps-f32 %v1003_v51, 1.0  ;;  %v1032_v46 = vmul.f32 %v3099_v37, %v1031_v36  ;;  %vm1036_vm2 = vmor %vm1034_vm13, %vm1035_vm0  ;;  %v5558_v60 = vld [vmem:[#allocation24_spill] sm:$0xff]  ;;  %v5560_v51 = vld [vmem:[#allocation17_spill] sm:$0xff] }
 0x1cb   : > { %v910_v26 = vmul.f32 %v3101_v59, %v4525_v6  ;;  %vm915_vm1 = vweird.f32 %v3101_v59  ;;  %v947_v18 = vmul.f32 %v946_v40, %v5532_v2  ;;  %v741_v3 = vmul.f32 %v740_v4, %v5545_v42  ;;  %v5551_v2 = vld [vmem:[#allocation39_spill] sm:$0xff]  ;;  %v5559_v41 = vld [vmem:[#allocation44_spill] sm:$0xff] }
 0x1cc   : > { %v826_v1 = vadd.f32 0.4994258, %v825_v22  ;;  %v864_v61 = vadd.f32 0.112945676, %v863_v54  ;;  %v1934_v53 = vadd.f32 1.0, %v2993_v23  ;;  %v1033_v58 = vadd.f32 %v3099_v37, %v1032_v46 }
 0x1cd   : > { %v911_v39 = vsub.f32 1.0, %v910_v26  ;;  %v780_v0 = vadd.f32 0.001143296, %v779_v56  ;;  %v4560_v21 = vadd.f32 1.0, %v947_v18  ;;  %v742_v7 = vadd.f32 0.014752088, %v741_v3 }
 0x1ce   : > { %v827_v24 = vmul.f32 %v826_v1, %v5533_v30  ;;  %v865_v44 = vmul.f32 %v864_v61, %v5538_v10  ;;  %v1966_v25 = vmul.f32 %v1934_v53, %v5551_v2  ;;  %v1037_v50 = vsel %vm1036_vm2, %v3099_v37, %v1033_v58  ;;  %v5555_v37 = vld [vmem:[#allocation42_spill] sm:$0xff]  ;;  %v5561_v18 = vld [vmem:[#allocation23_spill] sm:$0xff] }
 0x1cf   : > { %v912_v47 = vmul.f32 %v3101_v59, %v911_v39  ;;  %v781_v31 = vmul.f32 %v780_v0, %v5550_v15  ;;  %v898_v5 = vmul.f32 %v5553_v55, %v5552_v43  ;;  %v937_v12 = vadd.f32 1.1283791, %v5554_v32  ;;  %v5562_v58 = vld [vmem:[#allocation30_spill] sm:$0xff] }
 0x1d0   : > { %v1042_v8 = vsel %vm4542_vm15, %v1041_v17, %v1037_v50  ;;  %3102 = vrcp.f32 %v4560_v21  ;;  %2057 = vmatpush.msra.mxu2 %v1966_v25  ;;  %vm914_vm3 = vweird.f32 %v4525_v6  ;;  %v4574_v38 = vadd.f32 1.0, %v827_v24 }
 0x1d1   : > { %v1043_v30 = vmul.f32 %v1042_v8, %v4521_v45  ;;  %v913_v11 = vadd.f32 %v3101_v59, %v912_v47  ;;  %vm916_vm4 = vmor %vm914_vm3, %vm915_vm1  ;;  %v921_v49 = vor.u32 1.1754944e-38, %v920_v34  ;;  %v866_v35 = vadd.f32 0.4994258, %v865_v44  ;;  %v5556_v45 = vld [vmem:[#allocation22_spill] sm:$0xff] }
 0x1d2   : > { %v743_v57 = vmul.f32 %v742_v7, %v5545_v42  ;;  %v782_v14 = vadd.f32 0.014752088, %v781_v31  ;;  %vm919_vm5 = vcmp.eq.f32.partialorder %v918_v63, 8.507059e+37  ;;  %3104 = vrcp.f32 %v4574_v38 }
 0x1d3   : > { %v2994_v9 = vclamps-f32 %v1043_v30, 1.0  ;;  %v917_v33 = vsel %vm916_vm4, %v3101_v59, %v913_v11  ;;  %v4580_v17 = vadd.f32 1.1283791, %v5555_v37  ;;  %v4584_v6 = vmul.f32 %v5557_v20, %v5556_v45 }
 0x1d4   : > { %v584_v52 = vmul.f32 0.5, %v5558_v60  ;;  %v922_v16 = vsel %vm919_vm5, %v921_v49, %v917_v33  ;;  %v867_v28 = vmul.f32 %v866_v35, %v5538_v10  ;;  %v744_v34 = vadd.f32 0.112945676, %v743_v57  ;;  %v5563_v33 = vld [vmem:[#allocation10_spill] sm:$0xff] }
 0x1d5   : > { %v1935_v19 = vadd.f32 1.0, %v2994_v9  ;;  %v923_v48 = vmul.f32 %v922_v16, %v898_v5  ;;  %v4589_v63 = vadd.f32 1.1283791, %v5559_v41  ;;  %v960_v29 = vand.u32 2147483648, %v4560_v21 }
 0x1d6   : > { %v3103_v27 = vpop.eup %3102  ;;  %v783_v13 = vmul.f32 %v782_v14, %v5550_v15  ;;  %v659_v62 = vmul.f32 3.8918573e-05, %v5556_v45  ;;  %v938_v36 = vmul.f32 %v937_v12, %v5560_v51  ;;  %v4596_v40 = vadd.f32 1.0, %v867_v28  ;;  %v5565_v51 = vld [vmem:[#allocation31_spill] sm:$0xff] }
 0x1d7   : > { %v1967_v4 = vmul.f32 %v1935_v19, %v584_v52  ;;  %v2991_v56 = vclamps-f32 %v923_v48, 1.0  ;;  %v950_v59 = vmul.f32 %v3103_v27, %v4560_v21  ;;  %v745_v10 = vmul.f32 %v744_v34, %v5545_v42 }
 0x1d8   : > { %v784_v22 = vadd.f32 0.112945676, %v783_v13  ;;  %v660_v54 = vadd.f32 0.001143296, %v659_v62  ;;  %v3105_v23 = vpop.eup %3104  ;;  %vm954_vm6 = vweird.f32 %v4560_v21  ;;  %v699_v1 = vmul.f32 3.8918573e-05, %v5561_v18 }
 0x1d9   : > { %2098 = vmatpush.msra.mxu3 %v1967_v4  ;;  %v1932_v46 = vadd.f32 1.0, %v2991_v56  ;;  %v951_v26 = vsub.f32 1.0, %v950_v59  ;;  %v958_v61 = vand.u32 2147483647, %v4560_v21  ;;  %v961_v3 = vor.u32 1.1754944e-38, %v960_v29  ;;  %v5564_v29 = vld [vmem:[#allocation36_spill] sm:$0xff] }
 0x1da   : > { %v830_v53 = vmul.f32 %v3105_v23, %v4574_v38  ;;  %3106 = vrcp.f32 %v4596_v40  ;;  %vm955_vm7 = vweird.f32 %v3103_v27  ;;  %v840_v24 = vand.u32 2147483648, %v4574_v38 }
 0x1db   : > { %v1964_v39 = vmul.f32 %v1932_v46, %v5562_v58  ;;  %v952_v0 = vmul.f32 %v3103_v27, %v951_v26  ;;  %v746_v7 = vadd.f32 0.4994258, %v745_v10  ;;  %v785_v2 = vmul.f32 %v784_v22, %v5550_v15  ;;  %vm956_vm9 = vmor %vm954_vm6, %vm955_vm7  ;;  %v5566_v10 = vld [vmem:[#allocation11_spill] sm:$0xff] }
 0x1dc   : > { %v831_v44 = vsub.f32 1.0, %v830_v53  ;;  %v661_v25 = vmul.f32 %v660_v54, %v5556_v45  ;;  %vm835_vm8 = vweird.f32 %v3105_v23  ;;  %v838_v47 = vand.u32 2147483647, %v4574_v38 }
 0x1dd   : > { %2058 = vmatpush.msra.mxu2 %v1964_v39  ;;  %v953_v50 = vadd.f32 %v3103_v27, %v952_v0  ;;  %v700_v31 = vadd.f32 0.001143296, %v699_v1  ;;  %v747_v55 = vmul.f32 %v746_v7, %v5545_v42  ;;  %v786_v5 = vadd.f32 0.4994258, %v785_v2  ;;  %v5568_v39 = vld [vmem:[#allocation6_spill] sm:$0xff]  ;;  %v5569_v0 = vld [vmem:[#allocation32_spill] sm:$0xff] }
 0x1de   : > { %v832_v43 = vmul.f32 %v3105_v23, %v831_v44  ;;  %v662_v32 = vadd.f32 0.014752088, %v661_v25  ;;  %vm959_vm10 = vcmp.eq.f32.partialorder %v958_v61, 8.507059e+37  ;;  %vm834_vm11 = vweird.f32 %v4574_v38  ;;  %v5567_v61 = vld [vmem:[#allocation27_spill] sm:$0xff] }
 0x1df   : > { %v957_v12 = vsel %vm956_vm9, %v3103_v27, %v953_v50  ;;  %v841_v8 = vor.u32 1.1754944e-38, %v840_v24  ;;  %v4613_v35 = vadd.f32 1.0, %v747_v55  ;;  %v787_v57 = vmul.f32 %v786_v5, %v5550_v15  ;;  %vm836_vm12 = vmor %vm834_vm11, %vm835_vm8 }
 0x1e0   : > { %v3107_v30 = vpop.eup %3106  ;;  %v962_v11 = vsel %vm959_vm10, %v961_v3, %v957_v12  ;;  %v833_v49 = vadd.f32 %v3105_v23, %v832_v43  ;;  %v663_v42 = vmul.f32 %v662_v32, %v5556_v45  ;;  %v701_v9 = vmul.f32 %v700_v31, %v5561_v18  ;;  %v5578_v32 = vld [vmem:[#allocation19_spill] sm:$0xff] }
 0x1e1   : > { %v963_v14 = vmul.f32 %v962_v11, %v938_v36  ;;  %v870_v21 = vmul.f32 %v3107_v30, %v4596_v40  ;;  %v818_v38 = vmul.f32 %v4580_v17, %v5563_v33  ;;  %vm839_vm13 = vcmp.eq.f32.partialorder %v838_v47, 8.507059e+37 }
 0x1e2   : > { %v837_v37 = vsel %vm836_vm12, %v3105_v23, %v833_v49  ;;  %3108 = vrcp.f32 %v4613_v35  ;;  %v878_v15 = vand.u32 2147483647, %v4596_v40  ;;  %v880_v19 = vand.u32 2147483648, %v4596_v40 }
 0x1e3   : > { %v2992_v20 = vclamps-f32 %v963_v14, 1.0  ;;  %v842_v60 = vsel %vm839_vm13, %v841_v8, %v837_v37  ;;  %v871_v52 = vsub.f32 1.0, %v870_v21  ;;  %v4625_v48 = vadd.f32 1.0, %v787_v57 }
 0x1e4   : > { %v843_v16 = vmul.f32 %v842_v60, %v818_v38  ;;  %v664_v28 = vadd.f32 0.112945676, %v663_v42  ;;  %vm875_vm14 = vweird.f32 %v3107_v30  ;;  %v702_v41 = vadd.f32 0.014752088, %v701_v9 }
 0x1e5   : > { %v1933_v34 = vadd.f32 1.0, %v2992_v20  ;;  %v872_v27 = vmul.f32 %v3107_v30, %v871_v52  ;;  %v653_v17 = vadd.f32 0.05243302, %v4584_v6  ;;  %v692_v13 = vmul.f32 %v5564_v29, %v5561_v18 }
 0x1e6   : > { %v2989_v62 = vclamps-f32 %v843_v16, 1.0  ;;  %3110 = vrcp.f32 %v4625_v48  ;;  %vm874_vm15 = vweird.f32 %v4596_v40  ;;  %v665_v56 = vmul.f32 %v664_v28, %v5556_v45  ;;  %v5574_v28 = vld [vmem:[#allocation33_spill] sm:$0xff] }
 0x1e7   : > { %v1965_v36 = vmul.f32 %v1933_v34, %v5565_v51  ;;  %v873_v4 = vadd.f32 %v3107_v30, %v872_v27  ;;  %v858_v22 = vmul.f32 %v4589_v63, %v5566_v10  ;;  %vm876_vm0 = vmor %vm874_vm15, %vm875_vm14  ;;  %v881_v6 = vor.u32 1.1754944e-38, %v880_v19  ;;  %v5573_v19 = vld [vmem:[#allocation7_spill] sm:$0xff] }
 0x1e8   : > { %v3109_v59 = vpop.eup %3108  ;;  %v1930_v54 = vadd.f32 1.0, %v2989_v62  ;;  %v703_v23 = vmul.f32 %v702_v41, %v5561_v18  ;;  %vm879_vm1 = vcmp.eq.f32.partialorder %v878_v15, 8.507059e+37  ;;  %v758_v1 = vand.u32 2147483647, %v4613_v35 }
 0x1e9   : > { %2099 = vmatpush.msra.mxu3 %v1965_v36  ;;  %v877_v46 = vsel %vm876_vm0, %v3107_v30, %v873_v4  ;;  %v750_v26 = vmul.f32 %v3109_v59, %v4613_v35  ;;  %v666_v53 = vadd.f32 0.4994258, %v665_v56  ;;  %v738_v63 = vmul.f32 %v5569_v0, %v5568_v39  ;;  %v5575_v36 = vld [vmem:[#allocation4_spill] sm:$0xff] }
 0x1ea   : > { %v1962_v40 = vmul.f32 %v1930_v54, %v5567_v61  ;;  %v882_v3 = vsel %vm879_vm1, %v881_v6, %v877_v46  ;;  %v704_v58 = vadd.f32 0.112945676, %v703_v23  ;;  %v760_v7 = vand.u32 2147483648, %v4613_v35  ;;  %v5576_v6 = vld [vmem:[#allocation5_spill] sm:$0xff] }
 0x1eb   : > { %v883_v24 = vmul.f32 %v882_v3, %v858_v22  ;;  %v751_v44 = vsub.f32 1.0, %v750_v26  ;;  %v654_v25 = vmul.f32 %v653_v17, %v5556_v45  ;;  %v693_v50 = vadd.f32 0.05243302, %v692_v13 }
 0x1ec   : > { %v3111_v2 = vpop.eup %3110  ;;  %2059 = vmatpush.msra.mxu2 %v1962_v40  ;;  %v667_v47 = vmul.f32 %v666_v53, %v5556_v45  ;;  %v705_v31 = vmul.f32 %v704_v58, %v5561_v18  ;;  %vm755_vm2 = vweird.f32 %v3109_v59  ;;  %vm754_vm3 = vweird.f32 %v4613_v35  ;;  %v5572_v35 = vld [vmem:[#allocation28_spill] sm:$0xff] }
 0x1ed   : > { %v2990_v43 = vclamps-f32 %v883_v24, 1.0  ;;  %v752_v55 = vmul.f32 %v3109_v59, %v751_v44  ;;  %v790_v5 = vmul.f32 %v3111_v2, %v4625_v48  ;;  %vm4648_vm4 = vcmp.eq.f32.partialorder %v758_v1, 8.507059e+37  ;;  %vm756_vm5 = vmor %vm754_vm3, %vm755_vm2  ;;  %v5577_v44 = vld [vmem:[#allocation18_spill] sm:$0xff] }
 0x1ee   : > { %v4652_v12 = vadd.f32 1.0, %v667_v47  ;;  %v706_v8 = vadd.f32 0.4994258, %v705_v31  ;;  %v761_v49 = vor.u32 1.1754944e-38, %v760_v7  ;;  %vm795_vm6 = vweird.f32 %v3111_v2 }
 0x1ef   : > { %v1931_v30 = vadd.f32 1.0, %v2990_v43  ;;  %v753_v11 = vadd.f32 %v3109_v59, %v752_v55  ;;  %v791_v57 = vsub.f32 1.0, %v790_v5  ;;  %v798_v14 = vand.u32 2147483647, %v4625_v48 }
 0x1f0   : > { %v800_v21 = vand.u32 2147483648, %v4625_v48  ;;  %3112 = vrcp.f32 %v4652_v12  ;;  %v707_v38 = vmul.f32 %v706_v8, %v5561_v18  ;;  %v655_v37 = vadd.f32 0.18741608, %v654_v25 }
 0x1f1   : > { %v1963_v42 = vmul.f32 %v1931_v30, %v5572_v35  ;;  %v757_v9 = vsel %vm756_vm5, %v3109_v59, %v753_v11  ;;  %v792_v33 = vmul.f32 %v3111_v2, %v791_v57  ;;  %v694_v20 = vmul.f32 %v693_v50, %v5561_v18  ;;  %v5579_v30 = vld [vmem:[#allocation13_spill] sm:$0xff]  ;;  %v1990_v35 = vld [vmem:[%s5319_s3] sm:$0xff] }
 0x1f2   : > { %v762_v60 = vsel %vm4648_vm4, %v761_v49, %v757_v9  ;;  %vm794_vm7 = vweird.f32 %v4625_v48  ;;  %v708_v16 = vadd.f32 1.0, %v707_v38  ;;  %v778_v34 = vmul.f32 %v5574_v28, %v5573_v19  ;;  %v5580_v9 = vld [vmem:[#allocation14_spill] sm:$0xff]  ;;  %v1996_v19 = vld [vmem:[%s5319_s3 + $0x30] sm:$0xff] }
 0x1f3   : > { %2100 = vmatpush.msra.mxu3 %v1963_v42  ;;  %v763_v52 = vmul.f32 %v762_v60, %v738_v63  ;;  %v793_v15 = vadd.f32 %v3111_v2, %v792_v33  ;;  %vm796_vm8 = vmor %vm794_vm7, %vm795_vm6  ;;  %v801_v27 = vor.u32 1.1754944e-38, %v800_v21  ;;  %vm799_vm9 = vcmp.eq.f32.partialorder %v798_v14, 8.507059e+37  ;;  %v1992_v60 = vld [vmem:[%s5319_s3 + $0x10] sm:$0xff]  ;;  %v1997_v28 = vld [vmem:[%s5319_s3 + $0x38] sm:$0xff] }
 0x1f4   : > { %3114 = vrcp.f32 %v708_v16  ;;  %v656_v13 = vmul.f32 %v655_v37, %v5556_v45  ;;  %v695_v62 = vadd.f32 0.18741608, %v694_v20  ;;  %v577_v4 = vmul.f32 0.5, %v5575_v36  ;;  %v1991_v20 = vld [vmem:[%s5319_s3 + $0x8] sm:$0xff]  ;;  %v4704_v36 = vpop.permute.xlu0 %2033 }
 0x1f5   : > { %v2987_v41 = vclamps-f32 %v763_v52, 1.0  ;;  %v797_v17 = vsel %vm796_vm8, %v3111_v2, %v793_v15  ;;  %v578_v23 = vmul.f32 0.5, %v5576_v6  ;;  %v680_v1 = vand.u32 2147483648, %v4652_v12  ;;  %v1993_v52 = vld [vmem:[%s5319_s3 + $0x18] sm:$0xff]  ;;  %v1994_v15 = vld [vmem:[%s5319_s3 + $0x20] sm:$0xff] }
 0x1f6   : > { %v3113_v29 = vpop.eup %3112  ;;  %v802_v51 = vsel %vm799_vm9, %v801_v27, %v797_v17  ;;  %v657_v46 = vadd.f32 1.1283791, %v656_v13  ;;  %v696_v26 = vmul.f32 %v695_v62, %v5561_v18  ;;  %v678_v3 = vand.u32 2147483647, %v4652_v12  ;;  %v4702_v13 = vpop.permute.xlu2 %2038 }
 0x1f7   : > { %v1928_v56 = vadd.f32 1.0, %v2987_v41  ;;  %v803_v48 = vmul.f32 %v802_v51, %v778_v34  ;;  %v670_v59 = vmul.f32 %v3113_v29, %v4652_v12  ;;  %vm675_vm10 = vweird.f32 %v3113_v29  ;;  %v2044_v51 = vpop.permute.xlu1 %2043 }
 0x1f8   : > { %vm674_vm11 = vweird.f32 %v4652_v12  ;;  %v697_v0 = vadd.f32 1.1283791, %v696_v26  ;;  %v681_v63 = vor.u32 1.1754944e-38, %v680_v1  ;;  %v658_v18 = vmul.f32 %v657_v46, %v5577_v44  ;;  %v5581_v46 = vld [vmem:[#allocation3_spill] sm:$0xff] }
 0x1f9   : > { %v1960_v10 = vmul.f32 %v1928_v56, %v577_v4  ;;  %v2988_v22 = vclamps-f32 %v803_v48, 1.0  ;;  %v671_v54 = vsub.f32 1.0, %v670_v59  ;;  %vm676_vm12 = vmor %vm674_vm11, %vm675_vm10  ;;  %vm679_vm13 = vcmp.eq.f32.partialorder %v678_v3, 8.507059e+37 }
 0x1fa   : > { %v3115_v61 = vpop.eup %3114  ;;  %v720_v2 = vand.u32 2147483648, %v708_v16  ;;  %v718_v47 = vand.u32 2147483647, %v708_v16  ;;  %vm714_vm15 = vweird.f32 %v708_v16  ;;  %v698_v12 = vmul.f32 %v697_v0, %v5578_v32 }
 0x1fb   : > { %2060 = vmatpush.msra.mxu2 %v1960_v10  ;;  %v1929_v45 = vadd.f32 1.0, %v2988_v22  ;;  %v672_v40 = vmul.f32 %v3113_v29, %v671_v54  ;;  %v710_v53 = vmul.f32 %v3115_v61, %v708_v16  ;;  %vm715_vm14 = vweird.f32 %v3115_v61  ;;  %v1995_v16 = vld [vmem:[%s5319_s3 + $0x28] sm:$0xff] }
 0x1fc   : > { %vm716_vm0 = vmor %vm714_vm15, %vm715_vm14  ;;  %v721_v5 = vor.u32 1.1754944e-38, %v720_v2  ;;  %vm719_vm1 = vcmp.eq.f32.partialorder %v718_v47, 8.507059e+37  ;;  %v575_v11 = vmul.f32 0.5, %v5579_v30  ;;  %v576_v33 = vmul.f32 0.5, %v5580_v9  ;;  %v2019_v22 = vpop.permute.xlu0 %2018 }
 0x1fd   : > { %v1961_v58 = vmul.f32 %v1929_v45, %v578_v23  ;;  %v673_v39 = vadd.f32 %v3113_v29, %v672_v40  ;;  %v711_v24 = vsub.f32 1.0, %v710_v53 }
 0x1fe   : > { %v2024_v56 = vpop.permute.xlu2 %2023 }
 0x1ff   : > { %2101 = vmatpush.msra.mxu3 %v1961_v58  ;;  %v677_v7 = vsel %vm676_vm12, %v3113_v29, %v673_v39  ;;  %v712_v50 = vmul.f32 %v3115_v61, %v711_v24  ;;  %v4706_v59 = vpop.permute.xlu1 %2028 }
 0x200   : > { %v682_v25 = vsel %vm679_vm13, %v681_v63, %v677_v7 }
 0x201   : > { %v683_v31 = vmul.f32 %v682_v25, %v658_v18  ;;  %v713_v43 = vadd.f32 %v3115_v61, %v712_v50 }
 0x203   : > { %v2985_v55 = vclamps-f32 %v683_v31, 1.0  ;;  %v717_v8 = vsel %vm716_vm0, %v3115_v61, %v713_v43 }
 0x204   : > { %v722_v57 = vsel %vm719_vm1, %v721_v5, %v717_v8 }
 0x205   : > { %v1926_v49 = vadd.f32 1.0, %v2985_v55  ;;  %v723_v14 = vmul.f32 %v722_v57, %v698_v12 }
 0x206   : > { %v2009_v23 = vpop.permute.xlu2 %2008 }
 0x207   : > { %v1958_v21 = vmul.f32 %v1926_v49, %v575_v11  ;;  %v2986_v42 = vclamps-f32 %v723_v14, 1.0  ;;  %v2014_v40 = vpop.permute.xlu1 %2013 }
 0x209   : > { %2061 = vmatpush.msra.mxu2 %v1958_v21  ;;  %v1927_v38 = vadd.f32 1.0, %v2986_v42 }
 0x20a   : > { %2062 = vmatmul.f32.vlgmr.msra.gmra.mxu2 %v1990_v35 }
 0x20b   : > { %v1959_v37 = vmul.f32 %v1927_v38, %v576_v33 }
 0x20d   : > { %2102 = vmatpush.msra.mxu3 %v1959_v37 }
 0x20e   : > { %2103 = vmatmul.f32.vlgmr.msra.gmra.mxu3 %v1990_v35 }
 0x212   : > { %2065 = vmatmul.f32.gmra.mxu2 %v1991_v20 }
 0x216   : > { %2106 = vmatmul.f32.gmra.mxu3 %v1991_v20 }
 0x21a   : > { %2068 = vmatmul.f32.gmra.mxu2 %v1992_v60 }
 0x21e   : > { %2109 = vmatmul.f32.gmra.mxu3 %v1992_v60 }
 0x222   : > { %2071 = vmatmul.f32.gmra.mxu2 %v1993_v52 }
 0x226   : > { %2112 = vmatmul.f32.gmra.mxu3 %v1993_v52 }
 0x22a   : > { %2074 = vmatmul.f32.gmra.mxu2 %v1994_v15 }
 0x22e   : > { %2115 = vmatmul.f32.gmra.mxu3 %v1994_v15 }
 0x232   : > { %2077 = vmatmul.f32.gmra.mxu2 %v1995_v16 }
 0x236   : > { %2118 = vmatmul.f32.gmra.mxu3 %v1995_v16 }
 0x23a   : > { %2080 = vmatmul.f32.gmra.mxu2 %v1996_v19 }
 0x23e   : > { %2121 = vmatmul.f32.gmra.mxu3 %v1996_v19 }
 0x242   : > { %2083 = vmatmul.f32.gmra.mxu2 %v1997_v28 }
 0x246   : > { %2124 = vmatmul.f32.gmra.mxu3 %v1997_v28 }
 0x28d   : > { %v2063_v34 = vpop.f32.mrf.mxu2 }
 0x28e   : > { %v4716_v1 = vadd.f32 %v2063_v34, %v2009_v23 }
 0x290   : > { %5582 = vst [vmem:[#allocation78_spill] sm:$0xff] %v4716_v1  ;;  %v4726_v53 = vmul.f32 %v4716_v1, %v5581_v46 }
 0x291   : > { %v2104_v27 = vpop.f32.mrf.mxu3 }
 0x292   : > { %v4720_v45 = vadd.f32 %v2104_v27, %v2009_v23  ;;  %5584 = vst [vmem:[#allocation74_spill] sm:$0xff] %v4726_v53  ;;  %v2160_v44 = vmul.f32 %v4726_v53, %v4726_v53 }
 0x294   : > { %5583 = vst [vmem:[#allocation70_spill] sm:$0xff] %v4720_v45  ;;  %v4732_v39 = vmul.f32 %v4720_v45, %v5581_v46  ;;  %v4755_v31 = vmin.f32 %v2160_v44, 16.0 }
 0x295   : > { %v2066_v41 = vpop.f32.mrf.mxu2 }
 0x296   : > { %v4728_v58 = vadd.f32 %v2066_v41, %v2014_v40  ;;  %5586 = vst [vmem:[#allocation77_spill] sm:$0xff] %v4732_v39  ;;  %v2200_v25 = vmul.f32 %v4732_v39, %v4732_v39  ;;  %v2162_v49 = vmul.f32 2.1237322e-06, %v4755_v31 }
 0x297   : > { %5589 = vst [vmem:[#allocation58_spill] sm:$0xff] %v4755_v31 }
 0x298   : > { %5585 = vst [vmem:[#allocation61_spill] sm:$0xff] %v4728_v58  ;;  %v4744_v18 = vmul.f32 %v4728_v58, %v5581_v46  ;;  %v4765_v32 = vmin.f32 %v2200_v25, 16.0  ;;  %v2163_v37 = vadd.f32 0.00028619796, %v2162_v49 }
 0x299   : > { %v2107_v17 = vpop.f32.mrf.mxu3 }
 0x29a   : > { %5587 = vst [vmem:[#allocation76_spill] sm:$0xff] %v4744_v18  ;;  %v2240_v43 = vmul.f32 %v4744_v18, %v4744_v18  ;;  %v4767_v12 = vadd.f32 %v2107_v17, %v2014_v40  ;;  %v2202_v42 = vmul.f32 2.1237322e-06, %v4765_v32  ;;  %v2164_v17 = vmul.f32 %v2163_v37, %v4755_v31 }
 0x29b   : > { %5592 = vst [vmem:[#allocation40_spill] sm:$0xff] %v4765_v32 }
 0x29c   : > { %5593 = vst [vmem:[#allocation69_spill] sm:$0xff] %v4767_v12  ;;  %v4774_v57 = vmin.f32 %v2240_v43, 16.0  ;;  %v4785_v9 = vmul.f32 %v4767_v12, %v5581_v46  ;;  %v2203_v16 = vadd.f32 0.00028619796, %v2202_v42 }
 0x29d   : > { %v2069_v29 = vpop.f32.mrf.mxu2 }
 0x29e   : > { %v4708_v54 = vadd.f32 %v2069_v29, %v2019_v22  ;;  %5594 = vst [vmem:[#allocation75_spill] sm:$0xff] %v4785_v9  ;;  %v2242_v20 = vmul.f32 2.1237322e-06, %v4774_v57  ;;  %v2280_v19 = vmul.f32 %v4785_v9, %v4785_v9 }
 0x2a0   : > { %v4714_v26 = vmul.f32 %v4708_v54, %v5581_v46  ;;  %v2243_v29 = vadd.f32 0.00028619796, %v2242_v20  ;;  %v4813_v23 = vmin.f32 %v2280_v19, 16.0 }
 0x2a1   : > { %v2110_v62 = vpop.f32.mrf.mxu3 }
 0x2a2   : > { %v2320_v3 = vmul.f32 %v4714_v26, %v4714_v26  ;;  %v4746_v7 = vadd.f32 %v2110_v62, %v2019_v22  ;;  %v2204_v22 = vmul.f32 %v2203_v16, %v4765_v32  ;;  %v2244_v43 = vmul.f32 %v2243_v29, %v4774_v57 }
 0x2a4   : > { %v4736_v63 = vmin.f32 %v2320_v3, 16.0  ;;  %5588 = vst [vmem:[#allocation72_spill] sm:$0xff] %v4746_v7  ;;  %v4761_v55 = vmul.f32 %v4746_v7, %v5581_v46  ;;  %v4835_v42 = vadd.f32 0.0036580483, %v2204_v22  ;;  %v2245_v19 = vadd.f32 0.0036580483, %v2244_v43 }
 0x2a5   : > { %v2072_v4 = vpop.f32.mrf.mxu2 }
 0x2a6   : > { %v4738_v24 = vadd.f32 %v2072_v4, %v2024_v56  ;;  %v2322_v50 = vmul.f32 2.1237322e-06, %v4736_v63  ;;  %5590 = vst [vmem:[#allocation66_spill] sm:$0xff] %v4761_v55  ;;  %v2360_v14 = vmul.f32 %v4761_v55, %v4761_v55 }
 0x2a7   : > { %5596 = vst [vmem:[#allocation34_spill] sm:$0xff] %v4835_v42 }
 0x2a8   : > { %v4753_v47 = vmul.f32 %v4738_v24, %v5581_v46  ;;  %v2323_v30 = vadd.f32 0.00028619796, %v2322_v50  ;;  %v4791_v60 = vmin.f32 %v2360_v14, 16.0  ;;  %v2165_v50 = vadd.f32 0.0036580483, %v2164_v17 }
 0x2a9   : > { %v2113_v48 = vpop.f32.mrf.mxu3 }
 0x2aa   : > { %v4763_v5 = vadd.f32 %v2113_v48, %v2024_v56  ;;  %v2400_v11 = vmul.f32 %v4753_v47, %v4753_v47  ;;  %v2324_v33 = vmul.f32 %v2323_v30, %v4736_v63  ;;  %v2362_v62 = vmul.f32 2.1237322e-06, %v4791_v60 }
 0x2ac   : > { %5591 = vst [vmem:[#allocation45_spill] sm:$0xff] %v4763_v5  ;;  %v4780_v21 = vmul.f32 %v4763_v5, %v5581_v46  ;;  %v4788_v38 = vmin.f32 %v2400_v11, 16.0  ;;  %v2325_v34 = vadd.f32 0.0036580483, %v2324_v33  ;;  %v2363_v30 = vadd.f32 0.00028619796, %v2362_v62 }
 0x2ad   : > { %v2075_v10 = vpop.f32.mrf.mxu2  ;;  %v2282_v33 = vmul.f32 2.1237322e-06, %v4813_v23 }
 0x2ae   : > { %v2440_v15 = vmul.f32 %v4780_v21, %v4780_v21  ;;  %v2402_v27 = vmul.f32 2.1237322e-06, %v4788_v38  ;;  %v4816_v40 = vadd.f32 %v2075_v10, %v4706_v59  ;;  %v2326_v44 = vmul.f32 %v2325_v34, %v4736_v63 }
 0x2af   : > { %v2364_v17 = vmul.f32 %v2363_v30, %v4791_v60 }
 0x2b0   : > { %v4808_v56 = vmin.f32 %v2440_v15, 16.0  ;;  %v4840_v37 = vmul.f32 %v4816_v40, %v5581_v46  ;;  %v2327_v15 = vadd.f32 0.05243302, %v2326_v44 }
 0x2b1   : > { %v4710_v6 = vpop.f32.mrf.mxu3 }
 0x2b2   : > { %v2442_v49 = vmul.f32 2.1237322e-06, %v4808_v56  ;;  %v4831_v10 = vadd.f32 %v4710_v6, %v4706_v59  ;;  %v2328_v44 = vmul.f32 %v2327_v15, %v4736_v63 }
 0x2b4   : > { %5595 = vst [vmem:[#allocation41_spill] sm:$0xff] %v4831_v10  ;;  %v2443_v29 = vadd.f32 0.00028619796, %v2442_v49 }
 0x2b5   : > { %v4718_v61 = vpop.f32.mrf.mxu2 }
 0x2b6   : > { %v4844_v20 = vadd.f32 %v4718_v61, %v4704_v36  ;;  %v4858_v61 = vmul.f32 %v4831_v10, %v5581_v46  ;;  %v2444_v15 = vmul.f32 %v2443_v29, %v4808_v56 }
 0x2b9   : > { %v4734_v0 = vpop.f32.mrf.mxu3 }
 0x2bd   : > { %v2081_v2 = vpop.f32.mrf.mxu2 }
 0x2be   : > { %v4848_v6 = vadd.f32 %v2081_v2, %v4702_v13  ;;  %v2480_v2 = vmul.f32 %v4840_v37, %v4840_v37 }
 0x2c0   : > { %v4871_v43 = vmul.f32 %v4848_v6, %v5581_v46 }
 0x2c1   : > { %v4769_v8 = vpop.f32.mrf.mxu3 }
 0x2c2   : > { %v4875_v30 = vadd.f32 %v4769_v8, %v4702_v13  ;;  %v4891_v8 = vadd.f32 %v4734_v0, %v4704_v36 }
 0x2c4   : > { %v4899_v29 = vmul.f32 %v4875_v30, %v5581_v46  ;;  %v4911_v39 = vmul.f32 %v4891_v8, %v5581_v46 }
 0x2c5   : > { %v2084_v35 = vpop.f32.mrf.mxu2 }
 0x2c6   : > { %v4793_v52 = vadd.f32 %v2084_v35, %v2044_v51 }
 0x2c8   : > { %v4802_v41 = vmul.f32 %v4793_v52, %v5581_v46 }
 0x2c9   : > { %v2125_v28 = vpop.f32.mrf.mxu3 }
 0x2ca   : > { %v4806_v4 = vadd.f32 %v2125_v28, %v2044_v51  ;;  %v2720_v48 = vmul.f32 %v4802_v41, %v4802_v41  ;;  %v2403_v51 = vadd.f32 0.00028619796, %v2402_v27  ;;  %v4851_v28 = vmul.f32 0.5, %v4708_v54 }
 0x2cb   : > { %v4865_v54 = vmul.f32 %v4844_v20, %v5581_v46 }
 0x2cc   : > { %v4820_v3 = vmul.f32 %v4806_v4, %v5581_v46  ;;  %v4823_v25 = vmin.f32 %v2720_v48, 16.0  ;;  %v2404_v59 = vmul.f32 %v2403_v51, %v4788_v38  ;;  %5597 = vst [vmem:[#allocation62_spill] sm:$0xff] %v4851_v28  ;;  %v2283_v48 = vadd.f32 0.00028619796, %v2282_v33 }
 0x2cd   : > { %v2246_v33 = vmul.f32 %v2245_v19, %v4774_v57  ;;  %v2560_v13 = vmul.f32 %v4865_v54, %v4865_v54  ;;  %v2329_v19 = vadd.f32 0.18741608, %v2328_v44 }
 0x2ce   : > { %v2760_v11 = vmul.f32 %v4820_v3, %v4820_v3  ;;  %v2722_v14 = vmul.f32 2.1237322e-06, %v4823_v25  ;;  %v2733_v35 = vmul.f32 3.8918573e-05, %v4823_v25  ;;  %v2405_v51 = vadd.f32 0.0036580483, %v2404_v59 }
 0x2cf   : > { %v2520_v59 = vmul.f32 %v4858_v61, %v4858_v61  ;;  %v2247_v36 = vadd.f32 0.05243302, %v2246_v33  ;;  %v4907_v44 = vmin.f32 %v2560_v13, 16.0  ;;  %v2680_v33 = vmul.f32 %v4899_v29, %v4899_v29 }
 0x2d0   : > { %v2723_v16 = vadd.f32 0.00028619796, %v2722_v14  ;;  %v4853_v34 = vmin.f32 %v2760_v11, 16.0  ;;  %v2734_v27 = vadd.f32 0.001143296, %v2733_v35  ;;  %v4878_v11 = vmul.f32 %v2165_v50, %v4755_v31 }
 0x2d1   : > { %v4904_v12 = vmin.f32 %v2520_v59, 16.0 }
 0x2d2   : > { %v2724_v62 = vmul.f32 %v2723_v16, %v4823_v25  ;;  %v2735_v22 = vmul.f32 %v2734_v27, %v4823_v25  ;;  %5598 = vst [vmem:[#allocation37_spill] sm:$0xff] %v4878_v11  ;;  %v2762_v14 = vmul.f32 2.1237322e-06, %v4853_v34  ;;  %v2365_v16 = vadd.f32 0.0036580483, %v2364_v17 }
 0x2d3   : > { %v4885_v27 = vmin.f32 %v2480_v2, 16.0  ;;  %v2640_v17 = vmul.f32 %v4871_v43, %v4871_v43  ;;  %v2406_v2 = vmul.f32 %v2405_v51, %v4788_v38  ;;  %v2522_v9 = vmul.f32 2.1237322e-06, %v4904_v12 }
 0x2d4   : > { %v2725_v49 = vadd.f32 0.0036580483, %v2724_v62  ;;  %v2736_v35 = vadd.f32 0.014752088, %v2735_v22  ;;  %v2284_v62 = vmul.f32 %v2283_v48, %v4813_v23  ;;  %v2763_v45 = vadd.f32 0.00028619796, %v2762_v14 }
 0x2d5   : > { %v2366_v0 = vmul.f32 %v2365_v16, %v4791_v60  ;;  %v2482_v48 = vmul.f32 2.1237322e-06, %v4885_v27  ;;  %v4915_v14 = vmin.f32 %v2640_v17, 16.0  ;;  %v2773_v16 = vmul.f32 3.8918573e-05, %v4853_v34 }
 0x2d6   : > { %v2737_v50 = vmul.f32 %v2736_v35, %v4823_v25  ;;  %v2726_v22 = vmul.f32 %v2725_v49, %v4823_v25  ;;  %v2445_v35 = vadd.f32 0.0036580483, %v2444_v15  ;;  %v2330_v49 = vmul.f32 %v2329_v19, %v4736_v63 }
 0x2d7   : > { %v2407_v15 = vadd.f32 0.05243302, %v2406_v2  ;;  %v2764_v13 = vmul.f32 %v2763_v45, %v4853_v34  ;;  %v2367_v53 = vadd.f32 0.05243302, %v2366_v0  ;;  %v2483_v58 = vadd.f32 0.00028619796, %v2482_v48 }
 0x2d8   : > { %v2738_v1 = vadd.f32 0.112945676, %v2737_v50  ;;  %v2727_v59 = vadd.f32 0.05243302, %v2726_v22  ;;  %v2446_v46 = vmul.f32 %v2445_v35, %v4808_v56  ;;  %v2562_v19 = vmul.f32 2.1237322e-06, %v4907_v44 }
 0x2d9   : > { %v2600_v17 = vmul.f32 %v4911_v39, %v4911_v39  ;;  %v2331_v7 = vadd.f32 1.1283791, %v2330_v49  ;;  %v2642_v2 = vmul.f32 2.1237322e-06, %v4915_v14  ;;  %v4928_v22 = vmin.f32 %v2680_v33, 16.0 }
 0x2da   : > { %v2739_v51 = vmul.f32 %v2738_v1, %v4823_v25  ;;  %v2774_v1 = vadd.f32 0.001143296, %v2773_v16  ;;  %v2408_v0 = vmul.f32 %v2407_v15, %v4788_v38  ;;  %v2728_v35 = vmul.f32 %v2727_v59, %v4823_v25 }
 0x2db   : > { %v2368_v16 = vmul.f32 %v2367_v53, %v4791_v60  ;;  %v2447_v55 = vadd.f32 0.05243302, %v2446_v46  ;;  %v2523_v42 = vadd.f32 0.00028619796, %v2522_v9  ;;  %v2484_v49 = vmul.f32 %v2483_v58, %v4885_v27 }
 0x2dc   : > { %v2740_v50 = vadd.f32 0.4994258, %v2739_v51  ;;  %v2775_v45 = vmul.f32 %v2774_v1, %v4853_v34  ;;  %v2765_v51 = vadd.f32 0.0036580483, %v2764_v13  ;;  %v4937_v28 = vmin.f32 %v2600_v17, 16.0 }
 0x2dd   : > { %v4940_v33 = vadd.f32 0.0036580483, %v2284_v62  ;;  %v2643_v15 = vadd.f32 0.00028619796, %v2642_v2  ;;  %v2682_v59 = vmul.f32 2.1237322e-06, %v4928_v22  ;;  %v4945_v13 = vmul.f32 %v2247_v36, %v4774_v57 }
 0x2de   : > { %v2741_v18 = vmul.f32 %v2740_v50, %v4823_v25  ;;  %v2776_v11 = vadd.f32 0.014752088, %v2775_v45  ;;  %v2563_v50 = vadd.f32 0.00028619796, %v2562_v19  ;;  %v2409_v53 = vadd.f32 0.18741608, %v2408_v0 }
 0x2df   : > { %v2729_v9 = vadd.f32 0.18741608, %v2728_v35  ;;  %v2766_v46 = vmul.f32 %v2765_v51, %v4853_v34  ;;  %v4948_v58 = vadd.f32 0.18741608, %v2368_v16  ;;  %v2448_v1 = vmul.f32 %v2447_v55, %v4808_v56 }
 0x2e0   : > { %v4933_v48 = vadd.f32 1.0, %v2741_v18  ;;  %v2777_v18 = vmul.f32 %v2776_v11, %v4853_v34  ;;  %v2524_v19 = vmul.f32 %v2523_v42, %v4904_v12  ;;  %v4953_v17 = vmul.f32 %v2331_v7, %v4714_v26 }
 0x2e1   : > { %5599 = vst [vmem:[#allocation65_spill] sm:$0xff] %v4948_v58  ;;  %v2485_v2 = vadd.f32 0.0036580483, %v2484_v49  ;;  %v2564_v11 = vmul.f32 %v2563_v50, %v4907_v44  ;;  %v2602_v36 = vmul.f32 2.1237322e-06, %v4937_v28  ;;  %v4958_v45 = vmul.f32 0.5, %v4844_v20 }
 0x2e2   : > { %3116 = vrcp.f32 %v4933_v48  ;;  %v2778_v62 = vadd.f32 0.112945676, %v2777_v18  ;;  %v2644_v0 = vmul.f32 %v2643_v15, %v4915_v14  ;;  %v2683_v35 = vadd.f32 0.00028619796, %v2682_v59 }
 0x2e3   : > { %v2410_v42 = vmul.f32 %v2409_v53, %v4788_v38  ;;  %v2730_v16 = vmul.f32 %v2729_v9, %v4823_v25  ;;  %v2767_v26 = vadd.f32 0.05243302, %v2766_v46  ;;  %v2653_v7 = vmul.f32 3.8918573e-05, %v4915_v14 }
 0x2e4   : > { %v2779_v51 = vmul.f32 %v2778_v62, %v4853_v34  ;;  %v2449_v49 = vadd.f32 0.18741608, %v2448_v1  ;;  %v2525_v50 = vadd.f32 0.0036580483, %v2524_v19  ;;  %v2486_v20 = vmul.f32 %v2485_v2, %v4885_v27 }
 0x2e5   : > { %v2565_v32 = vadd.f32 0.0036580483, %v2564_v11  ;;  %v2603_v15 = vadd.f32 0.00028619796, %v2602_v36  ;;  %v2654_v59 = vadd.f32 0.001143296, %v2653_v7  ;;  %v2684_v62 = vmul.f32 %v2683_v35, %v4928_v22 }
 0x2e6   : > { %v2780_v5 = vadd.f32 0.4994258, %v2779_v51  ;;  %v2645_v31 = vadd.f32 0.0036580483, %v2644_v0  ;;  %v2731_v25 = vadd.f32 1.1283791, %v2730_v16  ;;  %v2768_v9 = vmul.f32 %v2767_v26, %v4853_v34 }
 0x2e7   : > { %v2754_v46 = vand.u32 2147483648, %v4933_v48  ;;  %v2655_v1 = vmul.f32 %v2654_v59, %v4915_v14  ;;  %v2752_v2 = vand.u32 2147483647, %v4933_v48  ;;  %v2487_v36 = vadd.f32 0.05243302, %v2486_v20 }
 0x2e8   : > { %v3117_v55 = vpop.eup %3116  ;;  %v2781_v53 = vmul.f32 %v2780_v5, %v4853_v34  ;;  %v2526_v0 = vmul.f32 %v2525_v50, %v4904_v12  ;;  %v2604_v35 = vmul.f32 %v2603_v15, %v4937_v28  ;;  %v2566_v5 = vmul.f32 %v2565_v32, %v4907_v44 }
 0x2e9   : > { %v2744_v18 = vmul.f32 %v3117_v55, %v4933_v48  ;;  %vm2749_vm2 = vweird.f32 %v3117_v55  ;;  %v2656_v51 = vadd.f32 0.014752088, %v2655_v1  ;;  %vm2748_vm3 = vweird.f32 %v4933_v48 }
 0x2ea   : > { %v4973_v11 = vadd.f32 1.0, %v2781_v53  ;;  %v2685_v26 = vadd.f32 0.0036580483, %v2684_v62  ;;  %vm2750_vm4 = vmor %vm2748_vm3, %vm2749_vm2  ;;  %v2755_v7 = vor.u32 1.1754944e-38, %v2754_v46  ;;  %v2732_v20 = vmul.f32 %v2731_v25, %v4802_v41 }
 0x2eb   : > { %v2745_v58 = vsub.f32 1.0, %v2744_v18  ;;  %v2657_v18 = vmul.f32 %v2656_v51, %v4915_v14  ;;  %v2769_v50 = vadd.f32 0.18741608, %v2768_v9  ;;  %vm2753_vm5 = vcmp.eq.f32.partialorder %v2752_v2, 8.507059e+37 }
 0x2ec   : > { %3118 = vrcp.f32 %v4973_v11  ;;  %v2488_v15 = vmul.f32 %v2487_v36, %v4885_v27  ;;  %v4985_v32 = vmul.f32 0.5, %v4891_v8  ;;  %v2411_v1 = vadd.f32 1.1283791, %v2410_v42 }
 0x2ed   : > { %v2746_v19 = vmul.f32 %v3117_v55, %v2745_v58  ;;  %v2646_v58 = vmul.f32 %v2645_v31, %v4915_v14  ;;  %v2658_v53 = vadd.f32 0.112945676, %v2657_v18  ;;  %v2605_v31 = vadd.f32 0.0036580483, %v2604_v35 }
 0x2ee   : > { %v2450_v46 = vmul.f32 %v2449_v49, %v4808_v56  ;;  %v2686_v51 = vmul.f32 %v2685_v26, %v4928_v22  ;;  %v2527_v25 = vadd.f32 0.05243302, %v2526_v0  ;;  %v2770_v9 = vmul.f32 %v2769_v50, %v4853_v34 }
 0x2ef   : > { %v2747_v16 = vadd.f32 %v3117_v55, %v2746_v19  ;;  %v2567_v19 = vadd.f32 0.05243302, %v2566_v5  ;;  %v2647_v10 = vadd.f32 0.05243302, %v2646_v58  ;;  %v2659_v41 = vmul.f32 %v2658_v53, %v4915_v14 }
 0x2f0   : > { %v2693_v8 = vmul.f32 3.8918573e-05, %v4928_v22  ;;  %v2489_v36 = vadd.f32 0.18741608, %v2488_v15  ;;  %v2142_v42 = vmul.f32 0.5, %v4793_v52  ;;  %vm2788_vm7 = vweird.f32 %v4973_v11 }
 0x2f1   : > { %v2751_v59 = vsel %vm2750_vm4, %v3117_v55, %v2747_v16  ;;  %v2660_v5 = vadd.f32 0.4994258, %v2659_v41  ;;  %v2568_v49 = vmul.f32 %v2567_v19, %v4907_v44  ;;  %v2606_v16 = vmul.f32 %v2605_v31, %v4937_v28 }
 0x2f2   : > { %v2756_v48 = vsel %vm2753_vm5, %v2755_v7, %v2751_v59  ;;  %v3119_v55 = vpop.eup %3118  ;;  %v2694_v26 = vadd.f32 0.001143296, %v2693_v8  ;;  %v2648_v7 = vmul.f32 %v2647_v10, %v4915_v14  ;;  %v2687_v0 = vadd.f32 0.05243302, %v2686_v51 }
 0x2f3   : > { %v2757_v62 = vmul.f32 %v2756_v48, %v2732_v20  ;;  %v2784_v35 = vmul.f32 %v3119_v55, %v4973_v11  ;;  %v2661_v34 = vmul.f32 %v2660_v5, %v4915_v14  ;;  %v2771_v20 = vadd.f32 1.1283791, %v2770_v9 }
 0x2f4   : > { %v2794_v59 = vand.u32 2147483648, %v4973_v11  ;;  %v2695_v52 = vmul.f32 %v2694_v26, %v4928_v22  ;;  %vm2789_vm6 = vweird.f32 %v3119_v55  ;;  %v2792_v48 = vand.u32 2147483647, %v4973_v11 }
 0x2f5   : > { %v3031_v2 = vclamps-f32 %v2757_v62, 1.0  ;;  %v2785_v18 = vsub.f32 1.0, %v2784_v35  ;;  %v5001_v53 = vadd.f32 1.0, %v2661_v34  ;;  %v2451_v19 = vadd.f32 1.1283791, %v2450_v46  ;;  %vm2790_vm8 = vmor %vm2788_vm7, %vm2789_vm6 }
 0x2f6   : > { %v2528_v31 = vmul.f32 %v2527_v25, %v4904_v12  ;;  %v2607_v10 = vadd.f32 0.05243302, %v2606_v16  ;;  %v2696_v62 = vadd.f32 0.014752088, %v2695_v52  ;;  %v2569_v51 = vadd.f32 0.18741608, %v2568_v49 }
 0x2f7   : > { %v2814_v58 = vadd.f32 1.0, %v3031_v2  ;;  %v2786_v15 = vmul.f32 %v3119_v55, %v2785_v18  ;;  %3120 = vrcp.f32 %v5001_v53  ;;  %v2649_v9 = vadd.f32 0.18741608, %v2648_v7 }
 0x2f8   : > { %v2688_v2 = vmul.f32 %v2687_v0, %v4928_v22  ;;  %v2795_v8 = vor.u32 1.1754944e-38, %v2794_v59  ;;  %v2490_v46 = vmul.f32 %v2489_v36, %v4885_v27  ;;  %v2772_v25 = vmul.f32 %v2771_v20, %v4820_v3 }
 0x2f9   : > { %v2830_v50 = vmul.f32 %v2814_v58, %v2142_v42  ;;  %v2787_v41 = vadd.f32 %v3119_v55, %v2786_v15  ;;  %v2697_v42 = vmul.f32 %v2696_v62, %v4928_v22  ;;  %vm2793_vm9 = vcmp.eq.f32.partialorder %v2792_v48, 8.507059e+37 }
 0x2fa   : > { %v2529_v5 = vadd.f32 0.18741608, %v2528_v31  ;;  %v2608_v49 = vmul.f32 %v2607_v10, %v4937_v28  ;;  %v5012_v58 = vmul.f32 %v2411_v1, %v4753_v47  ;;  %v2570_v26 = vmul.f32 %v2569_v51, %v4907_v44 }
 0x2fb   : > { %2852 = vmatpush.msrb.mxu2 %v2830_v50  ;;  %v2791_v35 = vsel %vm2790_vm8, %v3119_v55, %v2787_v41  ;;  %v2698_v11 = vadd.f32 0.112945676, %v2697_v42  ;;  %v5016_v7 = vmul.f32 0.5, %v4848_v6  ;;  %v2650_v36 = vmul.f32 %v2649_v9, %v4915_v14 }
 0x2fc   : > { %v2796_v16 = vsel %vm2793_vm9, %v2795_v8, %v2791_v35  ;;  %v5020_v3 = vmul.f32 0.5, %v4875_v30  ;;  %v2689_v55 = vadd.f32 0.18741608, %v2688_v2  ;;  %v5024_v20 = vmul.f32 %v2451_v19, %v4780_v21 }
 0x2fd   : > { %v2797_v0 = vmul.f32 %v2796_v16, %v2772_v25  ;;  %v2699_v18 = vmul.f32 %v2698_v11, %v4928_v22  ;;  %v3121_v34 = vpop.eup %3120  ;;  %v2491_v47 = vadd.f32 1.1283791, %v2490_v46  ;;  %v2573_v50 = vmul.f32 3.8918573e-05, %v4907_v44 }
 0x2fe   : > { %v2530_v6 = vmul.f32 %v2529_v5, %v4904_v12  ;;  %v2609_v59 = vadd.f32 0.18741608, %v2608_v49  ;;  %v2664_v52 = vmul.f32 %v3121_v34, %v5001_v53  ;;  %v2571_v15 = vadd.f32 1.1283791, %v2570_v26 }
 0x2ff   : > { %v3032_v1 = vclamps-f32 %v2797_v0, 1.0  ;;  %v2700_v14 = vadd.f32 0.4994258, %v2699_v18  ;;  %v2143_v30 = vmul.f32 0.5, %v4806_v4  ;;  %v2574_v31 = vadd.f32 0.001143296, %v2573_v50 }
 0x300   : > { %v2651_v10 = vadd.f32 1.1283791, %v2650_v36  ;;  %v2690_v62 = vmul.f32 %v2689_v55, %v4928_v22  ;;  %v2665_v21 = vsub.f32 1.0, %v2664_v52  ;;  %v2672_v41 = vand.u32 2147483647, %v5001_v53 }
 0x301   : > { %v2815_v48 = vadd.f32 1.0, %v3032_v1  ;;  %v2701_v19 = vmul.f32 %v2700_v14, %v4928_v22  ;;  %v2674_v9 = vand.u32 2147483648, %v5001_v53  ;;  %v2575_v2 = vmul.f32 %v2574_v31, %v4907_v44 }
 0x302   : > { %v2666_v8 = vmul.f32 %v3121_v34, %v2665_v21  ;;  %vm2669_vm10 = vweird.f32 %v3121_v34  ;;  %v2253_v4 = vmul.f32 3.8918573e-05, %v4774_v57  ;;  %v2610_v46 = vmul.f32 %v2609_v59, %v4937_v28 }
 0x303   : > { %v2831_v51 = vmul.f32 %v2815_v48, %v2143_v30  ;;  %v5035_v42 = vadd.f32 1.0, %v2701_v19  ;;  %v2576_v25 = vadd.f32 0.014752088, %v2575_v2  ;;  %v2333_v35 = vmul.f32 3.8918573e-05, %v4736_v63 }
 0x304   : > { %v2373_v22 = vmul.f32 3.8918573e-05, %v4791_v60  ;;  %v2691_v5 = vadd.f32 1.1283791, %v2690_v62  ;;  %v2667_v49 = vadd.f32 %v3121_v34, %v2666_v8  ;;  %vm2668_vm11 = vweird.f32 %v5001_v53 }
 0x305   : > { %2872 = vmatpush.msrb.mxu3 %v2831_v51  ;;  %3122 = vrcp.f32 %v5035_v42  ;;  %vm2670_vm12 = vmor %vm2668_vm11, %vm2669_vm10  ;;  %v2675_v16 = vor.u32 1.1754944e-38, %v2674_v9  ;;  %v2577_v11 = vmul.f32 %v2576_v25, %v4907_v44  ;;  %v2334_v26 = vadd.f32 0.001143296, %v2333_v35 }
 0x306   : > { %v2374_v0 = vadd.f32 0.001143296, %v2373_v22  ;;  %v2652_v36 = vmul.f32 %v2651_v10, %v4871_v43  ;;  %v2671_v55 = vsel %vm2670_vm12, %v3121_v34, %v2667_v49  ;;  %vm2673_vm13 = vcmp.eq.f32.partialorder %v2672_v41, 8.507059e+37 }
 0x307   : > { %v2254_v18 = vadd.f32 0.001143296, %v2253_v4  ;;  %v5046_v1 = vmul.f32 %v2491_v47, %v4840_v37  ;;  %v2676_v50 = vsel %vm2673_vm13, %v2675_v16, %v2671_v55  ;;  %v2578_v59 = vadd.f32 0.112945676, %v2577_v11 }
 0x308   : > { %v2335_v53 = vmul.f32 %v2334_v26, %v4736_v63  ;;  %v5049_v52 = vadd.f32 1.1283791, %v2530_v6  ;;  %v5052_v14 = vmul.f32 %v2571_v15, %v4865_v54  ;;  %v2677_v30 = vmul.f32 %v2676_v50, %v2652_v36 }
 0x309   : > { %v2375_v48 = vmul.f32 %v2374_v0, %v4791_v60  ;;  %v5055_v31 = vadd.f32 1.1283791, %v2610_v46  ;;  %v2692_v43 = vmul.f32 %v2691_v5, %v4899_v29  ;;  %v2579_v34 = vmul.f32 %v2578_v59, %v4907_v44 }
 0x30a   : > { %v2336_v37 = vadd.f32 0.014752088, %v2335_v53  ;;  %v3029_v10 = vclamps-f32 %v2677_v30, 1.0  ;;  %v2712_v62 = vand.u32 2147483647, %v5035_v42  ;;  %v2255_v21 = vmul.f32 %v2254_v18, %v4774_v57 }
 0x30b   : > { %v3123_v47 = vpop.eup %3122  ;;  %v2613_v6 = vmul.f32 3.8918573e-05, %v4937_v28  ;;  %v2580_v15 = vadd.f32 0.4994258, %v2579_v34  ;;  %v2413_v19 = vmul.f32 3.8918573e-05, %v4788_v38  ;;  %vm2708_vm15 = vweird.f32 %v5035_v42 }
 0x30c   : > { %v2704_v54 = vmul.f32 %v3123_v47, %v5035_v42  ;;  %v2376_v51 = vadd.f32 0.014752088, %v2375_v48  ;;  %v2812_v41 = vadd.f32 1.0, %v3029_v10  ;;  %v2453_v29 = vmul.f32 3.8918573e-05, %v4808_v56 }
 0x30d   : > { %v2614_v9 = vadd.f32 0.001143296, %v2613_v6  ;;  %v2337_v2 = vmul.f32 %v2336_v37, %v4736_v63  ;;  %v2714_v4 = vand.u32 2147483648, %v5035_v42  ;;  %v2581_v46 = vmul.f32 %v2580_v15, %v4907_v44 }
 0x30e   : > { %v2705_v8 = vsub.f32 1.0, %v2704_v54  ;;  %v2414_v25 = vadd.f32 0.001143296, %v2413_v19  ;;  %v2828_v35 = vmul.f32 %v2812_v41, %v5016_v7  ;;  %v2454_v5 = vadd.f32 0.001143296, %v2453_v29 }
 0x30f   : > { %v2615_v22 = vmul.f32 %v2614_v9, %v4937_v28  ;;  %v2338_v49 = vadd.f32 0.112945676, %v2337_v2  ;;  %vm2709_vm14 = vweird.f32 %v3123_v47  ;;  %v5070_v11 = vadd.f32 1.0, %v2581_v46 }
 0x310   : > { %v2706_v16 = vmul.f32 %v3123_v47, %v2705_v8  ;;  %v2415_v26 = vmul.f32 %v2414_v25, %v4788_v38  ;;  %2853 = vmatpush.msrb.mxu2 %v2828_v35  ;;  %v2455_v36 = vmul.f32 %v2454_v5, %v4808_v56  ;;  %v2377_v44 = vmul.f32 %v2376_v51, %v4791_v60  ;;  %vm2710_vm1 = vmor %vm2708_vm15, %vm2709_vm14 }
 0x311   : > { %v2616_v0 = vadd.f32 0.014752088, %v2615_v22  ;;  %vm2713_vm0 = vcmp.eq.f32.partialorder %v2712_v62, 8.507059e+37  ;;  %v2715_v7 = vor.u32 1.1754944e-38, %v2714_v4  ;;  %3124 = vrcp.f32 %v5070_v11 }
 0x312   : > { %v2707_v55 = vadd.f32 %v3123_v47, %v2706_v16  ;;  %v2416_v50 = vadd.f32 0.014752088, %v2415_v26  ;;  %v2456_v59 = vadd.f32 0.014752088, %v2455_v36  ;;  %v2339_v53 = vmul.f32 %v2338_v49, %v4736_v63 }
 0x313   : > { %v2617_v18 = vmul.f32 %v2616_v0, %v4937_v28  ;;  %v2493_v42 = vmul.f32 3.8918573e-05, %v4885_v27  ;;  %v2533_v48 = vmul.f32 3.8918573e-05, %v4904_v12  ;;  %v2256_v34 = vadd.f32 0.014752088, %v2255_v21 }
 0x314   : > { %v2711_v30 = vsel %vm2710_vm1, %v3123_v47, %v2707_v55  ;;  %v2417_v62 = vmul.f32 %v2416_v50, %v4788_v38  ;;  %v2378_v6 = vadd.f32 0.112945676, %v2377_v44  ;;  %v2457_v51 = vmul.f32 %v2456_v59, %v4808_v56 }
 0x315   : > { %v2716_v37 = vsel %vm2713_vm0, %v2715_v7, %v2711_v30  ;;  %v2618_v10 = vadd.f32 0.112945676, %v2617_v18  ;;  %v2494_v15 = vadd.f32 0.001143296, %v2493_v42  ;;  %v2534_v19 = vadd.f32 0.001143296, %v2533_v48 }
 0x316   : > { %v2717_v54 = vmul.f32 %v2716_v37, %v2692_v43  ;;  %v2592_v41 = vand.u32 2147483647, %v5070_v11  ;;  %v2418_v47 = vadd.f32 0.112945676, %v2417_v62  ;;  %v2340_v29 = vadd.f32 0.4994258, %v2339_v53 }
 0x317   : > { %v2619_v9 = vmul.f32 %v2618_v10, %v4937_v28  ;;  %v3125_v2 = vpop.eup %3124  ;;  %v2495_v21 = vmul.f32 %v2494_v15, %v4885_v27  ;;  %v2535_v4 = vmul.f32 %v2534_v19, %v4904_v12  ;;  %v2458_v46 = vadd.f32 0.112945676, %v2457_v51 }
 0x318   : > { %v3030_v8 = vclamps-f32 %v2717_v54, 1.0  ;;  %v2584_v25 = vmul.f32 %v3125_v2, %v5070_v11  ;;  %v2594_v43 = vand.u32 2147483648, %v5070_v11  ;;  %v2419_v22 = vmul.f32 %v2418_v47, %v4788_v38 }
 0x319   : > { %v2620_v35 = vadd.f32 0.4994258, %v2619_v9  ;;  %v2496_v49 = vadd.f32 0.014752088, %v2495_v21  ;;  %v2536_v16 = vadd.f32 0.014752088, %v2535_v4  ;;  %v2459_v26 = vmul.f32 %v2458_v46, %v4808_v56 }
 0x31a   : > { %v2813_v5 = vadd.f32 1.0, %v3030_v8  ;;  %v2585_v0 = vsub.f32 1.0, %v2584_v25  ;;  %v2420_v44 = vadd.f32 0.4994258, %v2419_v22  ;;  %v2341_v55 = vmul.f32 %v2340_v29, %v4736_v63 }
 0x31b   : > { %v2621_v36 = vmul.f32 %v2620_v35, %v4937_v28  ;;  %v2497_v18 = vmul.f32 %v2496_v49, %v4885_v27  ;;  %v2537_v50 = vmul.f32 %v2536_v16, %v4904_v12  ;;  %v2460_v59 = vadd.f32 0.4994258, %v2459_v26 }
 0x31c   : > { %v2829_v7 = vmul.f32 %v2813_v5, %v5020_v3  ;;  %v2586_v53 = vmul.f32 %v3125_v2, %v2585_v0  ;;  %vm2589_vm2 = vweird.f32 %v3125_v2  ;;  %v2421_v42 = vmul.f32 %v2420_v44, %v4788_v38 }
 0x31d   : > { %v5096_v30 = vadd.f32 1.0, %v2621_v36  ;;  %v2498_v48 = vadd.f32 0.112945676, %v2497_v18  ;;  %v2538_v37 = vadd.f32 0.112945676, %v2537_v50  ;;  %v2461_v28 = vmul.f32 %v2460_v59, %v4808_v56 }
 0x31e   : > { %2873 = vmatpush.msrb.mxu3 %v2829_v7  ;;  %v5100_v10 = vadd.f32 1.0, %v2341_v55  ;;  %v2587_v63 = vadd.f32 %v3125_v2, %v2586_v53  ;;  %vm2588_vm3 = vweird.f32 %v5070_v11  ;;  %v2257_v3 = vmul.f32 %v2256_v34, %v4774_v57 }
 0x31f   : > { %3126 = vrcp.f32 %v5096_v30  ;;  %vm2590_vm4 = vmor %vm2588_vm3, %vm2589_vm2  ;;  %v2595_v62 = vor.u32 1.1754944e-38, %v2594_v43  ;;  %v2499_v54 = vmul.f32 %v2498_v48, %v4885_v27  ;;  %v2539_v38 = vmul.f32 %v2538_v37, %v4904_v12 }
 0x320   : > { %v5107_v15 = vadd.f32 1.0, %v2421_v42  ;;  %v2591_v19 = vsel %vm2590_vm4, %v3125_v2, %v2587_v63  ;;  %vm2593_vm5 = vcmp.eq.f32.partialorder %v2592_v41, 8.507059e+37  ;;  %v5109_v56 = vadd.f32 1.0, %v2461_v28 }
 0x321   : > { %v2379_v51 = vmul.f32 %v2378_v6, %v4791_v60  ;;  %v2596_v9 = vsel %vm2593_vm5, %v2595_v62, %v2591_v19  ;;  %v2500_v11 = vadd.f32 0.4994258, %v2499_v54  ;;  %v2540_v47 = vadd.f32 0.4994258, %v2539_v38 }
 0x322   : > { %3128 = vrcp.f32 %v5100_v10  ;;  %v5115_v34 = vmul.f32 %v5049_v52, %v4858_v61  ;;  %v2597_v29 = vmul.f32 %v2596_v9, %v5052_v14  ;;  %v2632_v8 = vand.u32 2147483647, %v5096_v30 }
 0x323   : > { %3130 = vrcp.f32 %v5107_v15  ;;  %v2634_v41 = vand.u32 2147483648, %v5096_v30  ;;  %v2501_v2 = vmul.f32 %v2500_v11, %v4885_v27  ;;  %v2541_v6 = vmul.f32 %v2540_v47, %v4904_v12 }
 0x324   : > { %3132 = vrcp.f32 %v5109_v56  ;;  %v2612_v4 = vmul.f32 %v5055_v31, %v4911_v39  ;;  %v3027_v61 = vclamps-f32 %v2597_v29, 1.0  ;;  %v5126_v52 = vadd.f32 0.4994258, %v2379_v51 }
 0x325   : > { %v3127_v21 = vpop.eup %3126  ;;  %v5128_v14 = vadd.f32 0.112945676, %v2257_v3  ;;  %v5131_v25 = vadd.f32 1.0, %v2501_v2  ;;  %v5133_v43 = vadd.f32 1.0, %v2541_v6  ;;  %v2434_v27 = vand.u32 2147483648, %v5107_v15 }
 0x326   : > { %v2624_v46 = vmul.f32 %v3127_v21, %v5096_v30  ;;  %v2810_v12 = vadd.f32 1.0, %v3027_v61  ;;  %vm2628_vm6 = vweird.f32 %v5096_v30  ;;  %vm5137_vm7 = vcmp.eq.f32.partialorder %v2632_v8, 8.507059e+37 }
 0x327   : > { %v2432_v39 = vand.u32 2147483647, %v5107_v15  ;;  %v2635_v5 = vor.u32 1.1754944e-38, %v2634_v41  ;;  %3134 = vrcp.f32 %v5131_v25  ;;  %v2472_v49 = vand.u32 2147483647, %v5109_v56 }
 0x328   : > { %v5142_v31 = vpop.eup %3128  ;;  %v2625_v22 = vsub.f32 1.0, %v2624_v46  ;;  %v2826_v26 = vmul.f32 %v2810_v12, %v4958_v45  ;;  %vm2629_vm8 = vweird.f32 %v3127_v21  ;;  %v2514_v0 = vand.u32 2147483648, %v5131_v25 }
 0x329   : > { %v5146_v16 = vpop.eup %3130  ;;  %3136 = vrcp.f32 %v5133_v43  ;;  %vm2428_vm9 = vweird.f32 %v5107_v15  ;;  %v2554_v55 = vand.u32 2147483648, %v5133_v43  ;;  %v2435_v7 = vor.u32 1.1754944e-38, %v2434_v27  ;;  %vm2630_vm14 = vmor %vm2628_vm6, %vm2629_vm8 }
 0x32a   : > { %v3133_v36 = vpop.eup %3132  ;;  %v2626_v44 = vmul.f32 %v3127_v21, %v2625_v22  ;;  %vm2468_vm10 = vweird.f32 %v5109_v56  ;;  %v2474_v18 = vand.u32 2147483648, %v5109_v56  ;;  %2854 = vmatpush.msrb.mxu2 %v2826_v26  ;;  %v2512_v50 = vand.u32 2147483647, %v5131_v25 }
 0x32b   : > { %v2552_v45 = vand.u32 2147483647, %v5133_v43  ;;  %v2424_v59 = vmul.f32 %v5146_v16, %v5107_v15  ;;  %vm5159_vm11 = vcmp.eq.f32.partialorder %v2432_v39, 8.507059e+37  ;;  %v2464_v42 = vmul.f32 %v3133_v36, %v5109_v56 }
 0x32c   : > { %v2627_v48 = vadd.f32 %v3127_v21, %v2626_v44  ;;  %v2515_v37 = vor.u32 1.1754944e-38, %v2514_v0  ;;  %v5164_v28 = vor.u32 1.1754944e-38, %v2554_v55  ;;  %vm2429_vm12 = vweird.f32 %v5146_v16 }
 0x32d   : > { %vm5167_vm13 = vcmp.eq.f32.partialorder %v2472_v49, 8.507059e+37  ;;  %vm2508_vm15 = vweird.f32 %v5131_v25  ;;  %v2425_v3 = vsub.f32 1.0, %v2424_v59  ;;  %v2465_v62 = vsub.f32 1.0, %v2464_v42  ;;  %v3135_v38 = vpop.eup %3134 }
 0x32e   : > { %vm2469_vm0 = vweird.f32 %v3133_v36  ;;  %v2344_v54 = vmul.f32 %v5142_v31, %v5100_v10  ;;  %v2631_v19 = vsel %vm2630_vm14, %v3127_v21, %v2627_v48  ;;  %vm2548_vm1 = vweird.f32 %v5133_v43 }
 0x32f   : > { %v2475_v51 = vor.u32 1.1754944e-38, %v2474_v18  ;;  %vm2348_vm2 = vweird.f32 %v5100_v10  ;;  %vm2349_vm3 = vweird.f32 %v5142_v31  ;;  %v3137_v9 = vpop.eup %3136  ;;  %v2636_v30 = vsel %vm5137_vm7, %v2635_v5, %v2631_v19  ;;  %vm2430_vm7 = vmor %vm2428_vm9, %vm2429_vm12 }
 0x330   : > { %v2504_v11 = vmul.f32 %v3135_v38, %v5131_v25  ;;  %vm5183_vm4 = vcmp.eq.f32.partialorder %v2512_v50, 8.507059e+37  ;;  %v2426_v29 = vmul.f32 %v5146_v16, %v2425_v3  ;;  %v2352_v8 = vand.u32 2147483647, %v5100_v10  ;;  %vm2470_vm8 = vmor %vm2468_vm10, %vm2469_vm0 }
 0x331   : > { %v2637_v41 = vmul.f32 %v2636_v30, %v2612_v4  ;;  %vm2509_vm5 = vweird.f32 %v3135_v38  ;;  %v2544_v2 = vmul.f32 %v3137_v9, %v5133_v43  ;;  %v2466_v6 = vmul.f32 %v3133_v36, %v2465_v62  ;;  %vm5213_vm9 = vmor %vm2348_vm2, %vm2349_vm3 }
 0x332   : > { %v2505_v21 = vsub.f32 1.0, %v2504_v11  ;;  %vm2549_vm6 = vweird.f32 %v3137_v9  ;;  %v2427_v61 = vadd.f32 %v5146_v16, %v2426_v29  ;;  %v2345_v46 = vsub.f32 1.0, %v2344_v54  ;;  %vm2510_vm10 = vmor %vm2508_vm15, %vm2509_vm5  ;;  %v5612_v29 = vld [vmem:[#allocation58_spill] sm:$0xff] }
 0x333   : > { %v3028_v27 = vclamps-f32 %v2637_v41, 1.0  ;;  %v2545_v12 = vsub.f32 1.0, %v2544_v2  ;;  %v2467_v35 = vadd.f32 %v3133_v36, %v2466_v6  ;;  %v2354_v39 = vand.u32 2147483648, %v5100_v10  ;;  %v5613_v6 = vld [vmem:[#allocation40_spill] sm:$0xff] }
 0x334   : > { %v2506_v4 = vmul.f32 %v3135_v38, %v2505_v21  ;;  %v2431_v22 = vsel %vm2430_vm7, %v5146_v16, %v2427_v61  ;;  %v2346_v5 = vmul.f32 %v5142_v31, %v2345_v46  ;;  %v2381_v49 = vmul.f32 %v5126_v52, %v4791_v60  ;;  %v5614_v46 = vld [vmem:[#allocation45_spill] sm:$0xff] }
 0x335   : > { %v2811_v26 = vadd.f32 1.0, %v3028_v27  ;;  %v2546_v0 = vmul.f32 %v3137_v9, %v2545_v12  ;;  %v2436_v15 = vsel %vm5159_vm11, %v2435_v7, %v2431_v22  ;;  %v2471_v44 = vsel %vm2470_vm8, %v3133_v36, %v2467_v35  ;;  %vm2550_vm11 = vmor %vm2548_vm1, %vm2549_vm6 }
 0x336   : > { %v2507_v55 = vadd.f32 %v3135_v38, %v2506_v4  ;;  %v2437_v18 = vmul.f32 %v2436_v15, %v5012_v58  ;;  %v2476_v16 = vsel %vm5167_vm13, %v2475_v51, %v2471_v44  ;;  %v2347_v56 = vadd.f32 %v5142_v31, %v2346_v5  ;;  %v5615_v15 = vld [vmem:[#allocation62_spill] sm:$0xff] }
 0x337   : > { %v2827_v50 = vmul.f32 %v2811_v26, %v4985_v32  ;;  %v2547_v58 = vadd.f32 %v3137_v9, %v2546_v0  ;;  %v2477_v36 = vmul.f32 %v2476_v16, %v5024_v20  ;;  %v2355_v7 = vor.u32 1.1754944e-38, %v2354_v39 }
 0x338   : > { %v2511_v59 = vsel %vm2510_vm10, %v3135_v38, %v2507_v55  ;;  %v2351_v10 = vsel %vm5213_vm9, %v5142_v31, %v2347_v56  ;;  %vm2353_vm12 = vcmp.eq.f32.partialorder %v2352_v8, 8.507059e+37  ;;  %v5228_v53 = vadd.f32 1.0, %v2381_v49 }
 0x339   : > { %2874 = vmatpush.msrb.mxu3 %v2827_v50  ;;  %v2516_v32 = vsel %vm5183_vm4, %v2515_v37, %v2511_v59  ;;  %v2551_v25 = vsel %vm2550_vm11, %v3137_v9, %v2547_v58  ;;  %vm2553_vm13 = vcmp.eq.f32.partialorder %v2552_v45, 8.507059e+37  ;;  %v2356_v20 = vsel %vm2353_vm12, %v2355_v7, %v2351_v10  ;;  %v5616_v59 = vld [vmem:[#allocation37_spill] sm:$0xff] }
 0x33a   : > { %v2517_v42 = vmul.f32 %v2516_v32, %v5046_v1  ;;  %v2556_v48 = vsel %vm2553_vm13, %v5164_v28, %v2551_v25  ;;  %v3023_v63 = vclamps-f32 %v2437_v18, 1.0  ;;  %v2357_v3 = vmul.f32 %v2356_v20, %v4953_v17  ;;  %v5610_v28 = vld [vmem:[#allocation41_spill] sm:$0xff]  ;;  %v5617_v32 = vld [vmem:[#allocation34_spill] sm:$0xff] }
 0x33b   : > { %v2134_v31 = vmul.f32 0.5, %v4738_v24  ;;  %v2557_v62 = vmul.f32 %v2556_v48, %v5115_v34  ;;  %v3024_v54 = vclamps-f32 %v2477_v36, 1.0  ;;  %3138 = vrcp.f32 %v5228_v53  ;;  %v5611_v17 = vld [vmem:[#allocation65_spill] sm:$0xff] }
 0x33c   : > { %v2249_v37 = vadd.f32 0.18741608, %v4945_v13  ;;  %v2286_v43 = vmul.f32 %v4940_v33, %v4813_v23  ;;  %v3025_v45 = vclamps-f32 %v2517_v42, 1.0  ;;  %v3021_v38 = vclamps-f32 %v2357_v3, 1.0 }
 0x33d   : > { %v2136_v1 = vmul.f32 0.5, %v4816_v40  ;;  %v2137_v19 = vmul.f32 0.5, %v5610_v28  ;;  %v3026_v51 = vclamps-f32 %v2557_v62, 1.0  ;;  %v2259_v24 = vmul.f32 %v5128_v14, %v4774_v57  ;;  %v5618_v62 = vld [vmem:[#allocation66_spill] sm:$0xff] }
 0x33e   : > { %v2370_v34 = vmul.f32 %v5611_v17, %v4791_v60  ;;  %v2808_v9 = vadd.f32 1.0, %v3025_v45  ;;  %v2806_v30 = vadd.f32 1.0, %v3023_v63  ;;  %v2293_v13 = vmul.f32 3.8918573e-05, %v4813_v23 }
 0x33f   : > { %v2809_v11 = vadd.f32 1.0, %v3026_v51  ;;  %v2807_v47 = vadd.f32 1.0, %v3024_v54  ;;  %v2260_v33 = vadd.f32 0.4994258, %v2259_v24  ;;  %v2173_v8 = vmul.f32 3.8918573e-05, %v5612_v29 }
 0x340   : > { %v2824_v41 = vmul.f32 %v2808_v9, %v2136_v1  ;;  %v2804_v40 = vadd.f32 1.0, %v3021_v38  ;;  %v2294_v2 = vadd.f32 0.001143296, %v2293_v13  ;;  %v2213_v21 = vmul.f32 3.8918573e-05, %v5613_v6 }
 0x341   : > { %v3139_v61 = vpop.eup %3138  ;;  %v2135_v14 = vmul.f32 0.5, %v5614_v46  ;;  %v2825_v27 = vmul.f32 %v2809_v11, %v2137_v19  ;;  %v2261_v60 = vmul.f32 %v2260_v33, %v4774_v57  ;;  %v2174_v12 = vadd.f32 0.001143296, %v2173_v8 }
 0x342   : > { %2855 = vmatpush.msrb.mxu2 %v2824_v41  ;;  %v2822_v35 = vmul.f32 %v2806_v30, %v2134_v31  ;;  %v2384_v39 = vmul.f32 %v3139_v61, %v5228_v53  ;;  %v2295_v4 = vmul.f32 %v2294_v2, %v4813_v23  ;;  %v2214_v22 = vadd.f32 0.001143296, %v2213_v21  ;;  %v5619_v41 = vld [vmem:[#allocation72_spill] sm:$0xff] }
 0x343   : > { %v2371_v5 = vadd.f32 1.1283791, %v2370_v34  ;;  %2875 = vmatpush.msrb.mxu3 %v2825_v27  ;;  %v2823_v49 = vmul.f32 %v2807_v47, %v2135_v14  ;;  %v5256_v26 = vadd.f32 1.0, %v2261_v60  ;;  %v2175_v0 = vmul.f32 %v2174_v12, %v5612_v29 }
 0x344   : > { %2856 = vmatpush.msrb.mxu2 %v2822_v35  ;;  %v2820_v44 = vmul.f32 %v2804_v40, %v5615_v15  ;;  %v2385_v55 = vsub.f32 1.0, %v2384_v39  ;;  %v2296_v18 = vadd.f32 0.014752088, %v2295_v4  ;;  %v2215_v16 = vmul.f32 %v2214_v22, %v5613_v6  ;;  %v5620_v15 = vld [vmem:[#allocation76_spill] sm:$0xff] }
 0x345   : > { %2876 = vmatpush.msrb.mxu3 %v2823_v49  ;;  %vm2389_vm14 = vweird.f32 %v3139_v61  ;;  %v2392_v56 = vand.u32 2147483647, %v5228_v53  ;;  %v2394_v52 = vand.u32 2147483648, %v5228_v53  ;;  %3140 = vrcp.f32 %v5256_v26 }
 0x346   : > { %2857 = vmatpush.msrb.mxu2 %v2820_v44  ;;  %v2386_v50 = vmul.f32 %v3139_v61, %v2385_v55  ;;  %v2297_v58 = vmul.f32 %v2296_v18, %v4813_v23  ;;  %v2176_v36 = vadd.f32 0.014752088, %v2175_v0  ;;  %v2216_v7 = vadd.f32 0.014752088, %v2215_v16 }
 0x347   : > { %v2167_v10 = vadd.f32 0.05243302, %v5616_v59  ;;  %v2206_v25 = vmul.f32 %v5617_v32, %v5613_v6  ;;  %v2287_v20 = vadd.f32 0.05243302, %v2286_v43  ;;  %vm2388_vm15 = vweird.f32 %v5228_v53 }
 0x348   : > { %v2387_v42 = vadd.f32 %v3139_v61, %v2386_v50  ;;  %v2298_v48 = vadd.f32 0.112945676, %v2297_v58  ;;  %v2177_v63 = vmul.f32 %v2176_v36, %v5612_v29  ;;  %v2217_v3 = vmul.f32 %v2216_v7, %v5613_v6  ;;  %vm2390_vm0 = vmor %vm2388_vm15, %vm2389_vm14 }
 0x349   : > { %v2250_v31 = vmul.f32 %v2249_v37, %v4774_v57  ;;  %v2372_v54 = vmul.f32 %v2371_v5, %v5618_v62  ;;  %vm2393_vm1 = vcmp.eq.f32.partialorder %v2392_v56, 8.507059e+37  ;;  %v2395_v45 = vor.u32 1.1754944e-38, %v2394_v52 }
 0x34a   : > { %v2391_v38 = vsel %vm2390_vm0, %v3139_v61, %v2387_v42  ;;  %v2299_v1 = vmul.f32 %v2298_v48, %v4813_v23  ;;  %v2178_v43 = vadd.f32 0.112945676, %v2177_v63  ;;  %v2218_v28 = vadd.f32 0.112945676, %v2217_v3 }
 0x34b   : > { %v3141_v53 = vpop.eup %3140  ;;  %v2168_v19 = vmul.f32 %v2167_v10, %v5612_v29  ;;  %v2396_v51 = vsel %vm2393_vm1, %v2395_v45, %v2391_v38  ;;  %v2207_v24 = vadd.f32 0.05243302, %v2206_v25  ;;  %v2251_v37 = vadd.f32 1.1283791, %v2250_v31  ;;  %v5621_v10 = vld [vmem:[#allocation61_spill] sm:$0xff] }
 0x34c   : > { %v2397_v17 = vmul.f32 %v2396_v51, %v2372_v54  ;;  %v2264_v34 = vmul.f32 %v3141_v53, %v5256_v26  ;;  %v2300_v57 = vadd.f32 0.4994258, %v2299_v1  ;;  %v2288_v9 = vmul.f32 %v2287_v20, %v4813_v23  ;;  %v5622_v1 = vld [vmem:[#allocation75_spill] sm:$0xff] }
 0x34d   : > { %v2179_v30 = vmul.f32 %v2178_v43, %v5612_v29  ;;  %v2219_v13 = vmul.f32 %v2218_v28, %v5613_v6  ;;  %v2272_v33 = vand.u32 2147483647, %v5256_v26  ;;  %v2133_v40 = vmul.f32 0.5, %v5619_v41 }
 0x34e   : > { %v3022_v11 = vclamps-f32 %v2397_v17, 1.0  ;;  %v2265_v47 = vsub.f32 1.0, %v2264_v34  ;;  %v2301_v8 = vmul.f32 %v2300_v57, %v4813_v23  ;;  %v2274_v2 = vand.u32 2147483648, %v5256_v26 }
 0x34f   : > { %v2180_v21 = vadd.f32 0.4994258, %v2179_v30  ;;  %v2220_v61 = vadd.f32 0.4994258, %v2219_v13  ;;  %vm2269_vm2 = vweird.f32 %v3141_v53  ;;  %v2208_v60 = vmul.f32 %v2207_v24, %v5613_v6 }
 0x350   : > { %v2805_v46 = vadd.f32 1.0, %v3022_v11  ;;  %v2266_v14 = vmul.f32 %v3141_v53, %v2265_v47  ;;  %v2302_v27 = vadd.f32 1.0, %v2301_v8  ;;  %v2289_v12 = vadd.f32 0.18741608, %v2288_v9  ;;  %v5623_v11 = vld [vmem:[#allocation74_spill] sm:$0xff] }
 0x351   : > { %v2181_v35 = vmul.f32 %v2180_v21, %v5612_v29  ;;  %v2221_v39 = vmul.f32 %v2220_v61, %v5613_v6  ;;  %vm2268_vm3 = vweird.f32 %v5256_v26  ;;  %v2275_v5 = vor.u32 1.1754944e-38, %v2274_v2 }
 0x352   : > { %v2821_v4 = vmul.f32 %v2805_v46, %v2133_v40  ;;  %v2267_v22 = vadd.f32 %v3141_v53, %v2266_v14  ;;  %3142 = vrcp.f32 %v2302_v27  ;;  %vm2270_vm4 = vmor %vm2268_vm3, %vm2269_vm2  ;;  %v2252_v44 = vmul.f32 %v2251_v37, %v5620_v15  ;;  %v5624_v46 = vld [vmem:[#allocation77_spill] sm:$0xff]  ;;  %v5626_v15 = vld [vmem:[#allocation78_spill] sm:$0xff] }
 0x353   : > { %v2182_v49 = vadd.f32 1.0, %v2181_v35  ;;  %v5288_v0 = vadd.f32 1.0, %v2221_v39  ;;  %vm2273_vm5 = vcmp.eq.f32.partialorder %v2272_v33, 8.507059e+37  ;;  %v2169_v18 = vadd.f32 0.18741608, %v2168_v19 }
 0x354   : > { %2877 = vmatpush.msrb.mxu3 %v2821_v4  ;;  %v2271_v55 = vsel %vm2270_vm4, %v3141_v53, %v2267_v22  ;;  %v2209_v16 = vadd.f32 0.18741608, %v2208_v60  ;;  %v2290_v52 = vmul.f32 %v2289_v12, %v4813_v23  ;;  %v2130_v32 = vmul.f32 0.5, %v5621_v10  ;;  %v5625_v12 = vld [vmem:[#allocation69_spill] sm:$0xff] }
 0x355   : > { %v2276_v56 = vsel %vm2273_vm5, %v2275_v5, %v2271_v55  ;;  %3144 = vrcp.f32 %v2182_v49  ;;  %v2170_v36 = vmul.f32 %v2169_v18, %v5612_v29  ;;  %v2312_v63 = vand.u32 2147483647, %v2302_v27  ;;  %v5627_v18 = vld [vmem:[#allocation70_spill] sm:$0xff] }
 0x356   : > { %v2277_v50 = vmul.f32 %v2276_v56, %v2252_v44  ;;  %3146 = vrcp.f32 %v5288_v0  ;;  %v2210_v7 = vmul.f32 %v2209_v16, %v5613_v6  ;;  %v2291_v25 = vadd.f32 1.1283791, %v2290_v52 }
 0x357   : > { %v2314_v3 = vand.u32 2147483648, %v2302_v27  ;;  %v2171_v54 = vadd.f32 1.1283791, %v2170_v36  ;;  %vm2308_vm7 = vweird.f32 %v2302_v27  ;;  %vm2313_vm8 = vcmp.eq.f32.partialorder %v2312_v63, 8.507059e+37 }
 0x358   : > { %v3143_v26 = vpop.eup %3142  ;;  %v3019_v58 = vclamps-f32 %v2277_v50, 1.0  ;;  %v2211_v45 = vadd.f32 1.1283791, %v2210_v7  ;;  %v2292_v29 = vmul.f32 %v2291_v25, %v5622_v1  ;;  %v2194_v19 = vand.u32 2147483648, %v2182_v49  ;;  %v2832_v50 = vld [vmem:[%s5321_s5] sm:$0x1] }
 0x359   : > { %v2304_v59 = vmul.f32 %v3143_v26, %v2302_v27  ;;  %vm2309_vm6 = vweird.f32 %v3143_v26  ;;  %v2315_v53 = vor.u32 1.1754944e-38, %v2314_v3  ;;  %v2192_v24 = vand.u32 2147483647, %v2182_v49 }
 0x35a   : > { %v2802_v20 = vadd.f32 1.0, %v3019_v58  ;;  %vm2310_vm9 = vmor %vm2308_vm7, %vm2309_vm6  ;;  %vm2188_vm11 = vweird.f32 %v2182_v49  ;;  %v2232_v57 = vand.u32 2147483647, %v5288_v0  ;;  %v2234_v37 = vand.u32 2147483648, %v5288_v0  ;;  %v2837_v58 = vpop.permute.xlu0 %2836 }
 0x35b   : > { %v3145_v42 = vpop.eup %3144  ;;  %v2305_v48 = vsub.f32 1.0, %v2304_v59  ;;  %v2172_v47 = vmul.f32 %v2171_v54, %v5623_v11  ;;  %v2195_v8 = vor.u32 1.1754944e-38, %v2194_v19  ;;  %vm2193_vm14 = vcmp.eq.f32.partialorder %v2192_v24, 8.507059e+37 }
 0x35c   : > { %v2818_v31 = vmul.f32 %v2802_v20, %v2130_v32  ;;  %v2184_v23 = vmul.f32 %v3145_v42, %v2182_v49  ;;  %v3147_v62 = vpop.eup %3146  ;;  %vm2189_vm10 = vweird.f32 %v3145_v42  ;;  %vm2228_vm15 = vweird.f32 %v5288_v0 }
 0x35d   : > { %v2306_v38 = vmul.f32 %v3143_v26, %v2305_v48  ;;  %v2224_v43 = vmul.f32 %v3147_v62, %v5288_v0  ;;  %vm2229_vm12 = vweird.f32 %v3147_v62  ;;  %vm2190_vm13 = vmor %vm2188_vm11, %vm2189_vm10  ;;  %v2235_v61 = vor.u32 1.1754944e-38, %v2234_v37 }
 0x35e   : > { %2858 = vmatpush.msrb.mxu2 %v2818_v31  ;;  %v2185_v6 = vsub.f32 1.0, %v2184_v23  ;;  %vm2230_vm0 = vmor %vm2228_vm15, %vm2229_vm12  ;;  %v2212_v14 = vmul.f32 %v2211_v45, %v5624_v46  ;;  %vm2233_vm1 = vcmp.eq.f32.partialorder %v2232_v57, 8.507059e+37  ;;  %v2131_v35 = vmul.f32 0.5, %v5625_v12 }
 0x35f   : > { %v2307_v28 = vadd.f32 %v3143_v26, %v2306_v38  ;;  %v2225_v17 = vsub.f32 1.0, %v2224_v43  ;;  %v2128_v44 = vmul.f32 0.5, %v5626_v15  ;;  %v2129_v16 = vmul.f32 0.5, %v5627_v18 }
 0x360   : > { %v2186_v51 = vmul.f32 %v3145_v42, %v2185_v6  ;;  %vm2840_vm2 = vcmask 523264   ;;  %v2839_v36 = vperm.slane %v2837_v58, 0  ;;  %v2890_v7 = vlaneseq }
 0x361   : > { %v2311_v34 = vsel %vm2310_vm9, %v3143_v26, %v2307_v28  ;;  %v2226_v13 = vmul.f32 %v3147_v62, %v2225_v17  ;;  %vm2887_vm3 = vcmask 1040384  }
 0x362   : > { %v2316_v9 = vsel %vm2313_vm8, %v2315_v53, %v2311_v34  ;;  %v2187_v30 = vadd.f32 %v3145_v42, %v2186_v51  ;;  %vm2892_vm4 = vcmp.lt.s32.totalorder %v2890_v7, 256 }
 0x363   : > { %v2317_v33 = vmul.f32 %v2316_v9, %v2292_v29  ;;  %v2227_v40 = vadd.f32 %v3147_v62, %v2226_v13 }
 0x364   : > { %v2191_v41 = vsel %vm2190_vm13, %v3145_v42, %v2187_v30 }
 0x365   : > { %v3020_v2 = vclamps-f32 %v2317_v33, 1.0  ;;  %v2196_v21 = vsel %vm2193_vm14, %v2195_v8, %v2191_v41  ;;  %v2231_v60 = vsel %vm2230_vm0, %v3147_v62, %v2227_v40 }
 0x366   : > { %v2197_v27 = vmul.f32 %v2196_v21, %v2172_v47  ;;  %v2236_v4 = vsel %vm2233_vm1, %v2235_v61, %v2231_v60 }
 0x367   : > { %v2803_v39 = vadd.f32 1.0, %v3020_v2  ;;  %v2237_v5 = vmul.f32 %v2236_v4, %v2212_v14 }
 0x368   : > { %v3017_v22 = vclamps-f32 %v2197_v27, 1.0 }
 0x369   : > { %v2819_v49 = vmul.f32 %v2803_v39, %v2131_v35  ;;  %v3018_v0 = vclamps-f32 %v2237_v5, 1.0 }
 0x36a   : > { %v2800_v55 = vadd.f32 1.0, %v3017_v22 }
 0x36b   : > { %2878 = vmatpush.msrb.mxu3 %v2819_v49  ;;  %v2801_v52 = vadd.f32 1.0, %v3018_v0 }
 0x36c   : > { %v2816_v56 = vmul.f32 %v2800_v55, %v2128_v44 }
 0x36d   : > { %v2817_v26 = vmul.f32 %v2801_v52, %v2129_v16 }
 0x36e   : > { %2859 = vmatpush.msrb.mxu2 %v2816_v56 }
 0x36f   : > { %3033 = vmatmul.msk.f32.vlgmr.msrb.gmra.mxu2 %vm2840_vm2, %v2832_v50  ;;  %2879 = vmatpush.msrb.mxu3 %v2817_v26 }
 0x370   : > { %3034 = vmatmul.msk.f32.vlgmr.msrb.gmra.mxu3 %vm2840_vm2, %v2832_v50 }
 0x3f2   : > { %v2861_v59 = vpop.f32.mrf.mxu2 }
 0x3f3   : > { %v2881_v10 = vpop.f32.mrf.mxu3  ;;  %v2862_v25 = vadd.f32 %v2861_v59, %v2839_v36 }
 0x3f4   : > { %v2882_v32 = vadd.f32 %v2881_v10, %v2839_v36 }
 0x3f6   : > { %v2886_v20 = vrot.slane %v2882_v32, 7 }
 0x3f8   : > { %v2888_v42 = vsel %vm2887_vm3, %v2862_v25, %v2886_v20 }
 0x3f9   : > { %2894 = vst.msk [vmem:[%s280_s21] sm:$0x3] %vm2892_vm4, %v2888_v42 }
 0x3fa PF: > { %s19_s26 = sadd.s32 1, %s3154_s26  }
 0x3fb   : > { %p16_p4 = scmp.ge.s32.totalorder %s19_s26, 4  }
 0x3fd   :  { %18 = sbr.rel (!%p16_p4) target bundleno = 3 (0x3), region = 78 }

</bundles_post_ra>
